<compile_context>
chip_gen: v5e
topology: v5e:2x2
jax: 0.10.0
libtpu: 0.0.40
codegen_flags: <defaults>
</compile_context>

<pallas_src>
import functools

import jax
import jax.numpy as jnp
from jax.experimental import pallas as pl
from jax.experimental.pallas import tpu as pltpu


def _round_up(x, m):
    return ((x + m - 1) // m) * m


# ---------------------------------------------------------------------------
# Pallas kernels
# ---------------------------------------------------------------------------
def _conv_kernel(x_ref, w_ref, b_ref, o_ref, *, apply_relu, tm_inner):
    """x: (TM, K) bf16, w: (K, Cout) bf16, b: (1, Cout) f32, o: (TM, Cout) f32."""

    def compute(s):
        acc = jnp.dot(x_ref[pl.ds(s, tm_inner), :], w_ref[...],
                      preferred_element_type=jnp.float32)
        acc = acc + b_ref[...]
        if apply_relu:
            acc = jnp.maximum(acc, 0.0)
        o_ref[pl.ds(s, tm_inner), :] = acc

    n_sub = o_ref.shape[0] // tm_inner
    if n_sub == 1:
        compute(0)
    else:
        def body(i, carry):
            compute(pl.multiple_of(i * tm_inner, tm_inner))
            return carry
        jax.lax.fori_loop(0, n_sub, body, 0, unroll=True)


def _maxpool_kernel(x_ref, o_ref):
    """x: (TR, 2, Wh, 2*C) -> o: (TR, Wh, C); 2x2 max over row pair + lane halves."""
    v = x_ref[...]
    rmax = jnp.maximum(v[:, 0, :, :], v[:, 1, :, :])        # rows h, h+1
    c = o_ref.shape[-1]
    o_ref[...] = jnp.maximum(rmax[:, :, :c], rmax[:, :, c:])  # cols w, w+1


def _mse_kernel(a_ref, b_ref, o_ref):
    @pl.when(pl.program_id(0) == 0)
    def _init():
        o_ref[...] = jnp.zeros_like(o_ref)

    d = a_ref[...] - b_ref[...]
    o_ref[...] += jnp.sum(d * d).reshape(1, 1)


# ---------------------------------------------------------------------------
# Wrappers
# ---------------------------------------------------------------------------
def _conv_tiles(m8):
    # DMA tile up to 1024 rows (v7x-safe: ~6 MiB with double buffering; v6e
    # could take 2048); compute sub-tile capped at 256 rows so the f32
    # accumulator stays within the 64-vreg register file.
    tm_max, ti = 1024, 256
    if m8 <= ti:
        return m8, m8
    return min(tm_max, (m8 // ti) * ti), ti


def conv3x3_same(x, w, b, *, relu):
    """x: (N,H,W,C_carried) f32, w: (3,3,Cin,Cout) HWIO f32, b: (Cout,) f32.

    Returns (N, H, W, Cout_pad) f32 with Cout padded to 128 (extra channels are
    exactly zero and are dropped by the next layer's im2col).
    """
    N, H, W, _ = x.shape
    _, _, cin, cout = w.shape
    M = N * H * W

    cin_p = _round_up(cin, 8)
    cout_p = _round_up(cout, 128)          # lane-dense output stores
    K = 9 * cin_p

    # im2col in bf16: slice off carried zero channels, 'same' spatial pad,
    # concat the 9 taps along channels -> (M, 9*cin_p).
    xb = x[..., :cin].astype(jnp.bfloat16)
    xp = jnp.pad(xb, ((0, 0), (1, 1), (1, 1), (0, cin_p - cin)))
    taps = [xp[:, dy:dy + H, dx:dx + W, :]
            for dy in range(3) for dx in range(3)]
    x9 = jnp.concatenate(taps, axis=-1).reshape(M, K)

    w9 = jnp.pad(w, ((0, 0), (0, 0), (0, cin_p - cin), (0, cout_p - cout)))
    w9 = w9.reshape(K, cout_p).astype(jnp.bfloat16)
    b9 = jnp.pad(b, (0, cout_p - cout)).astype(jnp.float32).reshape(1, cout_p)

    M8 = _round_up(M, 8)
    if M8 != M:
        x9 = jnp.pad(x9, ((0, M8 - M), (0, 0)))

    TM, tm_inner = _conv_tiles(M8)

    out = pl.pallas_call(
        functools.partial(_conv_kernel, apply_relu=relu, tm_inner=tm_inner),
        grid=(pl.cdiv(M8, TM),),
        in_specs=[
            pl.BlockSpec((TM, K), lambda i: (i, 0)),
            pl.BlockSpec((K, cout_p), lambda i: (0, 0)),   # VMEM-resident
            pl.BlockSpec((1, cout_p), lambda i: (0, 0)),   # VMEM-resident
        ],
        out_specs=pl.BlockSpec((TM, cout_p), lambda i: (i, 0)),
        out_shape=jax.ShapeDtypeStruct((M8, cout_p), jnp.float32),
        compiler_params=pltpu.CompilerParams(
            dimension_semantics=("parallel",),
            vmem_limit_bytes=32 * 1024 * 1024),
    )(x9, w9, b9)

    if M8 != M:
        out = out[:M]
    return out.reshape(N, H, W, cout_p)


def maxpool2x2(x):
    """x: (N,H,W,C) f32 with even H, W -> (N,H//2,W//2,C)."""
    N, H, W, C = x.shape
    Hh, Wh = H // 2, W // 2
    R = N * Hh

    # Free row-major reshape: (N,H,W,C) -> (N*Hh, 2, Wh, 2*C).
    xr = x.reshape(R, 2, Wh, 2 * C)

    row_bytes = 2 * W * C * x.dtype.itemsize
    TR = max(1, min(R, (2 * 1024 * 1024) // row_bytes))

    out = pl.pallas_call(
        _maxpool_kernel,
        grid=(pl.cdiv(R, TR),),
        in_specs=[pl.BlockSpec((TR, 2, Wh, 2 * C), lambda i: (i, 0, 0, 0))],
        out_specs=pl.BlockSpec((TR, Wh, C), lambda i: (i, 0, 0)),
        out_shape=jax.ShapeDtypeStruct((R, Wh, C), x.dtype),
        compiler_params=pltpu.CompilerParams(
            dimension_semantics=("parallel",)),
    )(xr)
    return out.reshape(N, Hh, Wh, C)


def mse(a, b):
    """Mean squared error over all elements (F.mse_loss, reduction='mean')."""
    n = a.size
    a2 = a.reshape(-1, a.shape[-1])
    b2 = b.reshape(-1, b.shape[-1])
    M, C = a2.shape

    TM = min(1024, M)
    Mp = pl.cdiv(M, TM) * TM
    if Mp != M:  # pad both with zeros: contributes 0 to the sum
        a2 = jnp.pad(a2, ((0, Mp - M), (0, 0)))
        b2 = jnp.pad(b2, ((0, Mp - M), (0, 0)))

    ssq = pl.pallas_call(
        _mse_kernel,
        grid=(Mp // TM,),
        in_specs=[pl.BlockSpec((TM, C), lambda i: (i, 0))] * 2,
        out_specs=pl.BlockSpec((1, 1), lambda i: (0, 0)),
        out_shape=jax.ShapeDtypeStruct((1, 1), jnp.float32),
        compiler_params=pltpu.CompilerParams(
            dimension_semantics=("arbitrary",)),
    )(a2, b2)
    return ssq[0, 0] / n


# ---------------------------------------------------------------------------
# VGG16 features[:8]  =  conv(3->64) ReLU conv(64->64) ReLU MaxPool2x2
#                        conv(64->128) ReLU conv(128->128)     (no final ReLU)
# ---------------------------------------------------------------------------
def init_vgg16_head_params(key):
    cfg = [(3, 64), (64, 64), (64, 128), (128, 128)]
    params = []
    for cin, cout in cfg:
        key, kw, kb = jax.random.split(key, 3)
        fan_in = 9 * cin
        w = jax.random.normal(kw, (3, 3, cin, cout), jnp.float32) / jnp.sqrt(fan_in)
        b = 0.01 * jax.random.normal(kb, (cout,), jnp.float32)
        params.append((w, b))
    return params


def vgg16_features_8(x_nhwc, params):
    (w1, b1), (w2, b2), (w3, b3), (w4, b4) = params
    h = conv3x3_same(x_nhwc, w1, b1, relu=True)   # (N,H,W,128)  [64 real]
    h = conv3x3_same(h, w2, b2, relu=True)        # (N,H,W,128)  [64 real]
    h = maxpool2x2(h)                             # (N,H/2,W/2,128)
    h = conv3x3_same(h, w3, b3, relu=True)        # (...,128)
    h = conv3x3_same(h, w4, b4, relu=False)       # features[:8] stops before ReLU
    return h                                      # 128 real channels


def perceptual_loss(fake_nchw, real_nchw, params):
    fake = jnp.transpose(fake_nchw, (0, 2, 3, 1)).astype(jnp.float32)
    real = jnp.transpose(real_nchw, (0, 2, 3, 1)).astype(jnp.float32)
    return mse(vgg16_features_8(fake, params),
               vgg16_features_8(real, params))


# ---------------------------------------------------------------------------
# Pure-JAX f32 reference (numerical sanity check)
# ---------------------------------------------------------------------------
def _reference_loss(fake_nchw, real_nchw, params):
    (w1, b1), (w2, b2), (w3, b3), (w4, b4) = params

    def conv(h, w, b):
        return jax.lax.conv_general_dilated(
            h, w, (1, 1), 'SAME',
            dimension_numbers=('NHWC', 'HWIO', 'NHWC')) + b

    def feats(x_nchw):
        h = jnp.transpose(x_nchw, (0, 2, 3, 1)).astype(jnp.float32)
        h = jnp.maximum(conv(h, w1, b1), 0.0)
        h = jnp.maximum(conv(h, w2, b2), 0.0)
        h = jax.lax.reduce_window(h, -jnp.inf, jax.lax.max,
                                  (1, 2, 2, 1), (1, 2, 2, 1), 'VALID')
        h = jnp.maximum(conv(h, w3, b3), 0.0)
        h = conv(h, w4, b4)
        return h

    f = feats(fake_nchw)
    r = feats(real_nchw)
    return jnp.mean((f - r) ** 2)


if __name__ == "__main__":
    key = jax.random.PRNGKey(0)
    kp, kf, kr = jax.random.split(key, 3)
    params = init_vgg16_head_params(kp)

    fake = jax.random.normal(kf, (2, 3, 16, 16), jnp.float32)   # NCHW
    real = jax.random.normal(kr, (2, 3, 16, 16), jnp.float32)   # NCHW

    loss = jax.jit(perceptual_loss)(fake, real, params)
    loss = jax.block_until_ready(loss)

    ref = jax.block_until_ready(_reference_loss(fake, real, params))
    assert jnp.isfinite(loss), "non-finite loss"
    # bf16 MXU inputs (f32 accumulation) vs the pure-f32 reference.
    assert abs(float(loss) - float(ref)) <= 3e-2 * abs(float(ref)) + 1e-4, \
        (float(loss), float(ref))

    print("KERNEL_OK")
</pallas_src>

<mosaic_0001>
module attributes {stable_mosaic.version = 11 : i64} {
  func.func @_conv_kernel(%arg0: i32, %arg1: memref<512x72xbf16, #tpu.memory_space<vmem>>, %arg2: memref<72x128xbf16, #tpu.memory_space<vmem>>, %arg3: memref<1x128xf32, #tpu.memory_space<vmem>>, %arg4: memref<512x128xf32, #tpu.memory_space<vmem>>) attributes {dimension_semantics = [#tpu.dimension_semantics<parallel>], iteration_bounds = array<i64: 1>, scalar_prefetch = 0 : i64, scratch_operands = 0 : i64, tpu.core_type = #tpu.core_type<tc>, window_params = [{transform_indices = @transform_0, window_bounds = array<i64: 512, 72>}, {pipeline_mode = #tpu.pipeline_mode<synchronous>, transform_indices = @transform_1, window_bounds = array<i64: 72, 128>}, {pipeline_mode = #tpu.pipeline_mode<synchronous>, transform_indices = @transform_2, window_bounds = array<i64: 1, 128>}, {transform_indices = @transform_3, window_bounds = array<i64: 512, 128>}]} {
    %c0_i32 = arith.constant 0 : i32
    %c256_i32 = arith.constant 256 : i32
    %0 = arith.muli %c0_i32, %c256_i32 : i32
    %1 = tpu.assume_multiple %0, 256 : i32
    %2 = arith.index_cast %1 : i32 to index
    %c0 = arith.constant 0 : index
    %3 = vector.load %arg1[%2, %c0] : memref<512x72xbf16, #tpu.memory_space<vmem>>, vector<256x72xbf16>
    %c0_0 = arith.constant 0 : index
    %c0_1 = arith.constant 0 : index
    %4 = vector.load %arg2[%c0_0, %c0_1] : memref<72x128xbf16, #tpu.memory_space<vmem>>, vector<72x128xbf16>
    %cst = arith.constant dense<0.000000e+00> : vector<256x128xf32>
    %5 = tpu.matmul %3, %4, %cst {dimension_numbers = #tpu.dot_dimension_numbers<[1], [0], [0], [1], [0, 0, 1, 1], [], []>} : vector<256x72xbf16>, vector<72x128xbf16>, vector<256x128xf32> -> vector<256x128xf32>
    %c0_2 = arith.constant 0 : index
    %c0_3 = arith.constant 0 : index
    %6 = vector.load %arg3[%c0_2, %c0_3] : memref<1x128xf32, #tpu.memory_space<vmem>>, vector<1x128xf32>
    %7 = vector.broadcast %6 : vector<1x128xf32> to vector<256x128xf32>
    %8 = arith.addf %5, %7 : vector<256x128xf32>
    %cst_4 = arith.constant 0.000000e+00 : f32
    %9 = vector.broadcast %cst_4 : f32 to vector<256x128xf32>
    %10 = arith.maximumf %8, %9 : vector<256x128xf32>
    %11 = arith.index_cast %1 : i32 to index
    %c0_5 = arith.constant 0 : index
    %12 = vector.load %arg4[%11, %c0_5] : memref<512x128xf32, #tpu.memory_space<vmem>>, vector<256x128xf32>
    tpu.vector_store %arg4[%11, %c0_5], %10 {strides = array<i32>} : memref<512x128xf32, #tpu.memory_space<vmem>>, vector<256x128xf32>,
    %c1_i32 = arith.constant 1 : i32
    %c256_i32_6 = arith.constant 256 : i32
    %13 = arith.muli %c1_i32, %c256_i32_6 : i32
    %14 = tpu.assume_multiple %13, 256 : i32
    %15 = arith.index_cast %14 : i32 to index
    %c0_7 = arith.constant 0 : index
    %16 = vector.load %arg1[%15, %c0_7] : memref<512x72xbf16, #tpu.memory_space<vmem>>, vector<256x72xbf16>
    %c0_8 = arith.constant 0 : index
    %c0_9 = arith.constant 0 : index
    %17 = vector.load %arg2[%c0_8, %c0_9] : memref<72x128xbf16, #tpu.memory_space<vmem>>, vector<72x128xbf16>
    %cst_10 = arith.constant dense<0.000000e+00> : vector<256x128xf32>
    %18 = tpu.matmul %16, %17, %cst_10 {dimension_numbers = #tpu.dot_dimension_numbers<[1], [0], [0], [1], [0, 0, 1, 1], [], []>} : vector<256x72xbf16>, vector<72x128xbf16>, vector<256x128xf32> -> vector<256x128xf32>
    %c0_11 = arith.constant 0 : index
    %c0_12 = arith.constant 0 : index
    %19 = vector.load %arg3[%c0_11, %c0_12] : memref<1x128xf32, #tpu.memory_space<vmem>>, vector<1x128xf32>
    %20 = vector.broadcast %19 : vector<1x128xf32> to vector<256x128xf32>
    %21 = arith.addf %18, %20 : vector<256x128xf32>
    %cst_13 = arith.constant 0.000000e+00 : f32
    %22 = vector.broadcast %cst_13 : f32 to vector<256x128xf32>
    %23 = arith.maximumf %21, %22 : vector<256x128xf32>
    %24 = arith.index_cast %14 : i32 to index
    %c0_14 = arith.constant 0 : index
    %25 = vector.load %arg4[%24, %c0_14] : memref<512x128xf32, #tpu.memory_space<vmem>>, vector<256x128xf32>
    tpu.vector_store %arg4[%24, %c0_14], %23 {strides = array<i32>} : memref<512x128xf32, #tpu.memory_space<vmem>>, vector<256x128xf32>,
    %c2_i32 = arith.constant 2 : i32
    return
  }
  func.func @transform_0(%arg0: i32) -> (i32, i32) {
    %c0_i32 = arith.constant 0 : i32
    %c0_i32_0 = arith.constant 0 : i32
    return %arg0, %c0_i32 : i32, i32
  }
  func.func @transform_1(%arg0: i32) -> (i32, i32) {
    %c0_i32 = arith.constant 0 : i32
    %c0_i32_0 = arith.constant 0 : i32
    %c0_i32_1 = arith.constant 0 : i32
    return %c0_i32, %c0_i32_0 : i32, i32
  }
  func.func @transform_2(%arg0: i32) -> (i32, i32) {
    %c0_i32 = arith.constant 0 : i32
    %c0_i32_0 = arith.constant 0 : i32
    %c0_i32_1 = arith.constant 0 : i32
    return %c0_i32, %c0_i32_0 : i32, i32
  }
  func.func @transform_3(%arg0: i32) -> (i32, i32) {
    %c0_i32 = arith.constant 0 : i32
    %c0_i32_0 = arith.constant 0 : i32
    return %arg0, %c0_i32 : i32, i32
  }
}

module attributes {stable_mosaic.version = 11 : i64} {
  func.func @_conv_kernel(%arg0: i32, %arg1: memref<512x576xbf16, #tpu.memory_space<vmem>>, %arg2: memref<576x128xbf16, #tpu.memory_space<vmem>>, %arg3: memref<1x128xf32, #tpu.memory_space<vmem>>, %arg4: memref<512x128xf32, #tpu.memory_space<vmem>>) attributes {dimension_semantics = [#tpu.dimension_semantics<parallel>], iteration_bounds = array<i64: 1>, scalar_prefetch = 0 : i64, scratch_operands = 0 : i64, tpu.core_type = #tpu.core_type<tc>, window_params = [{transform_indices = @transform_0, window_bounds = array<i64: 512, 576>}, {pipeline_mode = #tpu.pipeline_mode<synchronous>, transform_indices = @transform_1, window_bounds = array<i64: 576, 128>}, {pipeline_mode = #tpu.pipeline_mode<synchronous>, transform_indices = @transform_2, window_bounds = array<i64: 1, 128>}, {transform_indices = @transform_3, window_bounds = array<i64: 512, 128>}]} {
    %c0_i32 = arith.constant 0 : i32
    %c256_i32 = arith.constant 256 : i32
    %0 = arith.muli %c0_i32, %c256_i32 : i32
    %1 = tpu.assume_multiple %0, 256 : i32
    %2 = arith.index_cast %1 : i32 to index
    %c0 = arith.constant 0 : index
    %3 = vector.load %arg1[%2, %c0] : memref<512x576xbf16, #tpu.memory_space<vmem>>, vector<256x576xbf16>
    %c0_0 = arith.constant 0 : index
    %c0_1 = arith.constant 0 : index
    %4 = vector.load %arg2[%c0_0, %c0_1] : memref<576x128xbf16, #tpu.memory_space<vmem>>, vector<576x128xbf16>
    %cst = arith.constant dense<0.000000e+00> : vector<256x128xf32>
    %5 = tpu.matmul %3, %4, %cst {dimension_numbers = #tpu.dot_dimension_numbers<[1], [0], [0], [1], [0, 0, 1, 1], [], []>} : vector<256x576xbf16>, vector<576x128xbf16>, vector<256x128xf32> -> vector<256x128xf32>
    %c0_2 = arith.constant 0 : index
    %c0_3 = arith.constant 0 : index
    %6 = vector.load %arg3[%c0_2, %c0_3] : memref<1x128xf32, #tpu.memory_space<vmem>>, vector<1x128xf32>
    %7 = vector.broadcast %6 : vector<1x128xf32> to vector<256x128xf32>
    %8 = arith.addf %5, %7 : vector<256x128xf32>
    %cst_4 = arith.constant 0.000000e+00 : f32
    %9 = vector.broadcast %cst_4 : f32 to vector<256x128xf32>
    %10 = arith.maximumf %8, %9 : vector<256x128xf32>
    %11 = arith.index_cast %1 : i32 to index
    %c0_5 = arith.constant 0 : index
    %12 = vector.load %arg4[%11, %c0_5] : memref<512x128xf32, #tpu.memory_space<vmem>>, vector<256x128xf32>
    tpu.vector_store %arg4[%11, %c0_5], %10 {strides = array<i32>} : memref<512x128xf32, #tpu.memory_space<vmem>>, vector<256x128xf32>,
    %c1_i32 = arith.constant 1 : i32
    %c256_i32_6 = arith.constant 256 : i32
    %13 = arith.muli %c1_i32, %c256_i32_6 : i32
    %14 = tpu.assume_multiple %13, 256 : i32
    %15 = arith.index_cast %14 : i32 to index
    %c0_7 = arith.constant 0 : index
    %16 = vector.load %arg1[%15, %c0_7] : memref<512x576xbf16, #tpu.memory_space<vmem>>, vector<256x576xbf16>
    %c0_8 = arith.constant 0 : index
    %c0_9 = arith.constant 0 : index
    %17 = vector.load %arg2[%c0_8, %c0_9] : memref<576x128xbf16, #tpu.memory_space<vmem>>, vector<576x128xbf16>
    %cst_10 = arith.constant dense<0.000000e+00> : vector<256x128xf32>
    %18 = tpu.matmul %16, %17, %cst_10 {dimension_numbers = #tpu.dot_dimension_numbers<[1], [0], [0], [1], [0, 0, 1, 1], [], []>} : vector<256x576xbf16>, vector<576x128xbf16>, vector<256x128xf32> -> vector<256x128xf32>
    %c0_11 = arith.constant 0 : index
    %c0_12 = arith.constant 0 : index
    %19 = vector.load %arg3[%c0_11, %c0_12] : memref<1x128xf32, #tpu.memory_space<vmem>>, vector<1x128xf32>
    %20 = vector.broadcast %19 : vector<1x128xf32> to vector<256x128xf32>
    %21 = arith.addf %18, %20 : vector<256x128xf32>
    %cst_13 = arith.constant 0.000000e+00 : f32
    %22 = vector.broadcast %cst_13 : f32 to vector<256x128xf32>
    %23 = arith.maximumf %21, %22 : vector<256x128xf32>
    %24 = arith.index_cast %14 : i32 to index
    %c0_14 = arith.constant 0 : index
    %25 = vector.load %arg4[%24, %c0_14] : memref<512x128xf32, #tpu.memory_space<vmem>>, vector<256x128xf32>
    tpu.vector_store %arg4[%24, %c0_14], %23 {strides = array<i32>} : memref<512x128xf32, #tpu.memory_space<vmem>>, vector<256x128xf32>,
    %c2_i32 = arith.constant 2 : i32
    return
  }
  func.func @transform_0(%arg0: i32) -> (i32, i32) {
    %c0_i32 = arith.constant 0 : i32
    %c0_i32_0 = arith.constant 0 : i32
    return %arg0, %c0_i32 : i32, i32
  }
  func.func @transform_1(%arg0: i32) -> (i32, i32) {
    %c0_i32 = arith.constant 0 : i32
    %c0_i32_0 = arith.constant 0 : i32
    %c0_i32_1 = arith.constant 0 : i32
    return %c0_i32, %c0_i32_0 : i32, i32
  }
  func.func @transform_2(%arg0: i32) -> (i32, i32) {
    %c0_i32 = arith.constant 0 : i32
    %c0_i32_0 = arith.constant 0 : i32
    %c0_i32_1 = arith.constant 0 : i32
    return %c0_i32, %c0_i32_0 : i32, i32
  }
  func.func @transform_3(%arg0: i32) -> (i32, i32) {
    %c0_i32 = arith.constant 0 : i32
    %c0_i32_0 = arith.constant 0 : i32
    return %arg0, %c0_i32 : i32, i32
  }
}

module attributes {stable_mosaic.version = 11 : i64} {
  func.func @_maxpool_kernel(%arg0: i32, %arg1: memref<16x2x8x256xf32, #tpu.memory_space<vmem>>, %arg2: memref<16x8x128xf32, #tpu.memory_space<vmem>>) attributes {dimension_semantics = [#tpu.dimension_semantics<parallel>], iteration_bounds = array<i64: 1>, scalar_prefetch = 0 : i64, scratch_operands = 0 : i64, tpu.core_type = #tpu.core_type<tc>, window_params = [{transform_indices = @transform_0, window_bounds = array<i64: 16, 2, 8, 256>}, {transform_indices = @transform_1, window_bounds = array<i64: 16, 8, 128>}]} {
    %c0 = arith.constant 0 : index
    %c0_0 = arith.constant 0 : index
    %c0_1 = arith.constant 0 : index
    %c0_2 = arith.constant 0 : index
    %0 = vector.load %arg1[%c0, %c0_0, %c0_1, %c0_2] : memref<16x2x8x256xf32, #tpu.memory_space<vmem>>, vector<16x2x8x256xf32>
    %1 = vector.extract_strided_slice %0 {offsets = [0, 0, 0, 0], sizes = [16, 1, 8, 256], strides = [1, 1, 1, 1]} : vector<16x2x8x256xf32> to vector<16x1x8x256xf32>
    %2 = vector.shape_cast %1 : vector<16x1x8x256xf32> to vector<16x8x256xf32>
    %3 = vector.extract_strided_slice %0 {offsets = [0, 1, 0, 0], sizes = [16, 1, 8, 256], strides = [1, 1, 1, 1]} : vector<16x2x8x256xf32> to vector<16x1x8x256xf32>
    %4 = vector.shape_cast %3 : vector<16x1x8x256xf32> to vector<16x8x256xf32>
    %5 = arith.maximumf %2, %4 : vector<16x8x256xf32>
    %6 = vector.extract_strided_slice %5 {offsets = [0, 0, 0], sizes = [16, 8, 128], strides = [1, 1, 1]} : vector<16x8x256xf32> to vector<16x8x128xf32>
    %7 = vector.extract_strided_slice %5 {offsets = [0, 0, 128], sizes = [16, 8, 128], strides = [1, 1, 1]} : vector<16x8x256xf32> to vector<16x8x128xf32>
    %8 = arith.maximumf %6, %7 : vector<16x8x128xf32>
    %c0_3 = arith.constant 0 : index
    %c0_4 = arith.constant 0 : index
    %c0_5 = arith.constant 0 : index
    %9 = vector.load %arg2[%c0_3, %c0_4, %c0_5] : memref<16x8x128xf32, #tpu.memory_space<vmem>>, vector<16x8x128xf32>
    tpu.vector_store %arg2[%c0_3, %c0_4, %c0_5], %8 {strides = array<i32>} : memref<16x8x128xf32, #tpu.memory_space<vmem>>, vector<16x8x128xf32>,
    return
  }
  func.func @transform_0(%arg0: i32) -> (i32, i32, i32, i32) {
    %c0_i32 = arith.constant 0 : i32
    %c0_i32_0 = arith.constant 0 : i32
    %c0_i32_1 = arith.constant 0 : i32
    %c0_i32_2 = arith.constant 0 : i32
    return %arg0, %c0_i32, %c0_i32_0, %c0_i32_1 : i32, i32, i32, i32
  }
  func.func @transform_1(%arg0: i32) -> (i32, i32, i32) {
    %c0_i32 = arith.constant 0 : i32
    %c0_i32_0 = arith.constant 0 : i32
    %c0_i32_1 = arith.constant 0 : i32
    return %arg0, %c0_i32, %c0_i32_0 : i32, i32, i32
  }
}

module attributes {stable_mosaic.version = 11 : i64} {
  func.func @_conv_kernel(%arg0: i32, %arg1: memref<128x576xbf16, #tpu.memory_space<vmem>>, %arg2: memref<576x128xbf16, #tpu.memory_space<vmem>>, %arg3: memref<1x128xf32, #tpu.memory_space<vmem>>, %arg4: memref<128x128xf32, #tpu.memory_space<vmem>>) attributes {dimension_semantics = [#tpu.dimension_semantics<parallel>], iteration_bounds = array<i64: 1>, scalar_prefetch = 0 : i64, scratch_operands = 0 : i64, tpu.core_type = #tpu.core_type<tc>, window_params = [{transform_indices = @transform_0, window_bounds = array<i64: 128, 576>}, {pipeline_mode = #tpu.pipeline_mode<synchronous>, transform_indices = @transform_1, window_bounds = array<i64: 576, 128>}, {pipeline_mode = #tpu.pipeline_mode<synchronous>, transform_indices = @transform_2, window_bounds = array<i64: 1, 128>}, {transform_indices = @transform_3, window_bounds = array<i64: 128, 128>}]} {
    %c0 = arith.constant 0 : index
    %c0_0 = arith.constant 0 : index
    %0 = vector.load %arg1[%c0, %c0_0] : memref<128x576xbf16, #tpu.memory_space<vmem>>, vector<128x576xbf16>
    %c0_1 = arith.constant 0 : index
    %c0_2 = arith.constant 0 : index
    %1 = vector.load %arg2[%c0_1, %c0_2] : memref<576x128xbf16, #tpu.memory_space<vmem>>, vector<576x128xbf16>
    %cst = arith.constant dense<0.000000e+00> : vector<128x128xf32>
    %2 = tpu.matmul %0, %1, %cst {dimension_numbers = #tpu.dot_dimension_numbers<[1], [0], [0], [1], [0, 0, 1, 1], [], []>} : vector<128x576xbf16>, vector<576x128xbf16>, vector<128x128xf32> -> vector<128x128xf32>
    %c0_3 = arith.constant 0 : index
    %c0_4 = arith.constant 0 : index
    %3 = vector.load %arg3[%c0_3, %c0_4] : memref<1x128xf32, #tpu.memory_space<vmem>>, vector<1x128xf32>
    %4 = vector.broadcast %3 : vector<1x128xf32> to vector<128x128xf32>
    %5 = arith.addf %2, %4 : vector<128x128xf32>
    %cst_5 = arith.constant 0.000000e+00 : f32
    %6 = vector.broadcast %cst_5 : f32 to vector<128x128xf32>
    %7 = arith.maximumf %5, %6 : vector<128x128xf32>
    %c0_6 = arith.constant 0 : index
    %c0_7 = arith.constant 0 : index
    %8 = vector.load %arg4[%c0_6, %c0_7] : memref<128x128xf32, #tpu.memory_space<vmem>>, vector<128x128xf32>
    tpu.vector_store %arg4[%c0_6, %c0_7], %7 {strides = array<i32>} : memref<128x128xf32, #tpu.memory_space<vmem>>, vector<128x128xf32>,
    return
  }
  func.func @transform_0(%arg0: i32) -> (i32, i32) {
    %c0_i32 = arith.constant 0 : i32
    %c0_i32_0 = arith.constant 0 : i32
    return %arg0, %c0_i32 : i32, i32
  }
  func.func @transform_1(%arg0: i32) -> (i32, i32) {
    %c0_i32 = arith.constant 0 : i32
    %c0_i32_0 = arith.constant 0 : i32
    %c0_i32_1 = arith.constant 0 : i32
    return %c0_i32, %c0_i32_0 : i32, i32
  }
  func.func @transform_2(%arg0: i32) -> (i32, i32) {
    %c0_i32 = arith.constant 0 : i32
    %c0_i32_0 = arith.constant 0 : i32
    %c0_i32_1 = arith.constant 0 : i32
    return %c0_i32, %c0_i32_0 : i32, i32
  }
  func.func @transform_3(%arg0: i32) -> (i32, i32) {
    %c0_i32 = arith.constant 0 : i32
    %c0_i32_0 = arith.constant 0 : i32
    return %arg0, %c0_i32 : i32, i32
  }
}

module attributes {stable_mosaic.version = 11 : i64} {
  func.func @_mse_kernel(%arg0: i32, %arg1: memref<128x128xf32, #tpu.memory_space<vmem>>, %arg2: memref<128x128xf32, #tpu.memory_space<vmem>>, %arg3: memref<1x1xf32, #tpu.memory_space<vmem>>) attributes {dimension_semantics = [#tpu.dimension_semantics<arbitrary>], iteration_bounds = array<i64: 1>, scalar_prefetch = 0 : i64, scratch_operands = 0 : i64, tpu.core_type = #tpu.core_type<tc>, window_params = [{transform_indices = @transform_0, window_bounds = array<i64: 128, 128>}, {transform_indices = @transform_1, window_bounds = array<i64: 128, 128>}, {pipeline_mode = #tpu.pipeline_mode<synchronous>, transform_indices = @transform_2, window_bounds = array<i64: 1, 1>}]} {
    %c0_i32 = arith.constant 0 : i32
    %0 = arith.cmpi eq, %arg0, %c0_i32 : i32
    %1 = arith.extui %0 : i1 to i32
    %c0_i32_0 = arith.constant 0 : i32
    %2 = arith.cmpi ne, %1, %c0_i32_0 : i32
    scf.if %2 {
      %cst_8 = arith.constant 0.000000e+00 : f32
      %15 = vector.broadcast %cst_8 : f32 to vector<1x1xf32>
      %c0_9 = arith.constant 0 : index
      %c0_10 = arith.constant 0 : index
      %16 = vector.load %arg3[%c0_9, %c0_10] : memref<1x1xf32, #tpu.memory_space<vmem>>, vector<1x1xf32>
      tpu.vector_store %arg3[%c0_9, %c0_10], %15 {strides = array<i32>} : memref<1x1xf32, #tpu.memory_space<vmem>>, vector<1x1xf32>,
    } else {
    }
    %c0 = arith.constant 0 : index
    %c0_1 = arith.constant 0 : index
    %3 = vector.load %arg1[%c0, %c0_1] : memref<128x128xf32, #tpu.memory_space<vmem>>, vector<128x128xf32>
    %c0_2 = arith.constant 0 : index
    %c0_3 = arith.constant 0 : index
    %4 = vector.load %arg2[%c0_2, %c0_3] : memref<128x128xf32, #tpu.memory_space<vmem>>, vector<128x128xf32>
    %5 = arith.subf %3, %4 : vector<128x128xf32>
    %c0_4 = arith.constant 0 : index
    %c0_5 = arith.constant 0 : index
    %6 = vector.load %arg3[%c0_4, %c0_5] : memref<1x1xf32, #tpu.memory_space<vmem>>, vector<1x1xf32>
    %7 = arith.mulf %5, %5 : vector<128x128xf32>
    %8 = vector.shape_cast %7 : vector<128x128xf32> to vector<1x128x128xf32>
    %cst = arith.constant dense<0.000000e+00> : vector<1xf32>
    %9 = vector.multi_reduction <add>, %8, %cst [1, 2] : vector<1x128x128xf32> to vector<1xf32>
    %10 = vector.shape_cast %9 : vector<1xf32> to vector<1x1x1xf32>
    %11 = vector.extract %10[0, 0, 0] : f32 from vector<1x1x1xf32>
    %12 = vector.broadcast %11 : f32 to vector<1x1xf32>
    %13 = arith.addf %6, %12 : vector<1x1xf32>
    %c0_6 = arith.constant 0 : index
    %c0_7 = arith.constant 0 : index
    %14 = vector.load %arg3[%c0_6, %c0_7] : memref<1x1xf32, #tpu.memory_space<vmem>>, vector<1x1xf32>
    tpu.vector_store %arg3[%c0_6, %c0_7], %13 {strides = array<i32>} : memref<1x1xf32, #tpu.memory_space<vmem>>, vector<1x1xf32>,
    return
  }
  func.func @transform_0(%arg0: i32) -> (i32, i32) {
    %c0_i32 = arith.constant 0 : i32
    %c0_i32_0 = arith.constant 0 : i32
    return %arg0, %c0_i32 : i32, i32
  }
  func.func @transform_1(%arg0: i32) -> (i32, i32) {
    %c0_i32 = arith.constant 0 : i32
    %c0_i32_0 = arith.constant 0 : i32
    return %arg0, %c0_i32 : i32, i32
  }
  func.func @transform_2(%arg0: i32) -> (i32, i32) {
    %c0_i32 = arith.constant 0 : i32
    %c0_i32_0 = arith.constant 0 : i32
    %c0_i32_1 = arith.constant 0 : i32
    return %c0_i32, %c0_i32_0 : i32, i32
  }
}

module attributes {stable_mosaic.version = 11 : i64} {
  func.func @_conv_kernel(%arg0: i32, %arg1: memref<128x1152xbf16, #tpu.memory_space<vmem>>, %arg2: memref<1152x128xbf16, #tpu.memory_space<vmem>>, %arg3: memref<1x128xf32, #tpu.memory_space<vmem>>, %arg4: memref<128x128xf32, #tpu.memory_space<vmem>>) attributes {dimension_semantics = [#tpu.dimension_semantics<parallel>], iteration_bounds = array<i64: 1>, scalar_prefetch = 0 : i64, scratch_operands = 0 : i64, tpu.core_type = #tpu.core_type<tc>, window_params = [{transform_indices = @transform_0, window_bounds = array<i64: 128, 1152>}, {pipeline_mode = #tpu.pipeline_mode<synchronous>, transform_indices = @transform_1, window_bounds = array<i64: 1152, 128>}, {pipeline_mode = #tpu.pipeline_mode<synchronous>, transform_indices = @transform_2, window_bounds = array<i64: 1, 128>}, {transform_indices = @transform_3, window_bounds = array<i64: 128, 128>}]} {
    %c0 = arith.constant 0 : index
    %c0_0 = arith.constant 0 : index
    %0 = vector.load %arg1[%c0, %c0_0] : memref<128x1152xbf16, #tpu.memory_space<vmem>>, vector<128x1152xbf16>
    %c0_1 = arith.constant 0 : index
    %c0_2 = arith.constant 0 : index
    %1 = vector.load %arg2[%c0_1, %c0_2] : memref<1152x128xbf16, #tpu.memory_space<vmem>>, vector<1152x128xbf16>
    %cst = arith.constant dense<0.000000e+00> : vector<128x128xf32>
    %2 = tpu.matmul %0, %1, %cst {dimension_numbers = #tpu.dot_dimension_numbers<[1], [0], [0], [1], [0, 0, 1, 1], [], []>} : vector<128x1152xbf16>, vector<1152x128xbf16>, vector<128x128xf32> -> vector<128x128xf32>
    %c0_3 = arith.constant 0 : index
    %c0_4 = arith.constant 0 : index
    %3 = vector.load %arg3[%c0_3, %c0_4] : memref<1x128xf32, #tpu.memory_space<vmem>>, vector<1x128xf32>
    %4 = vector.broadcast %3 : vector<1x128xf32> to vector<128x128xf32>
    %5 = arith.addf %2, %4 : vector<128x128xf32>
    %c0_5 = arith.constant 0 : index
    %c0_6 = arith.constant 0 : index
    %6 = vector.load %arg4[%c0_5, %c0_6] : memref<128x128xf32, #tpu.memory_space<vmem>>, vector<128x128xf32>
    tpu.vector_store %arg4[%c0_5, %c0_6], %5 {strides = array<i32>} : memref<128x128xf32, #tpu.memory_space<vmem>>, vector<128x128xf32>,
    return
  }
  func.func @transform_0(%arg0: i32) -> (i32, i32) {
    %c0_i32 = arith.constant 0 : i32
    %c0_i32_0 = arith.constant 0 : i32
    return %arg0, %c0_i32 : i32, i32
  }
  func.func @transform_1(%arg0: i32) -> (i32, i32) {
    %c0_i32 = arith.constant 0 : i32
    %c0_i32_0 = arith.constant 0 : i32
    %c0_i32_1 = arith.constant 0 : i32
    return %c0_i32, %c0_i32_0 : i32, i32
  }
  func.func @transform_2(%arg0: i32) -> (i32, i32) {
    %c0_i32 = arith.constant 0 : i32
    %c0_i32_0 = arith.constant 0 : i32
    %c0_i32_1 = arith.constant 0 : i32
    return %c0_i32, %c0_i32_0 : i32, i32
  }
  func.func @transform_3(%arg0: i32) -> (i32, i32) {
    %c0_i32 = arith.constant 0 : i32
    %c0_i32_0 = arith.constant 0 : i32
    return %arg0, %c0_i32 : i32, i32
  }
}

</mosaic_0001>

<bundles_post_ra>
// kernel: perceptual_loss.16
= control target key start
LH: loop header
LB: loop body
LE: loop exit
PB: predicated region body
PF: predicated region fallthrough
CT: control target
= control target key end

     0   :  { %vm216_vm0 = vcmask 1043456   ;;  %vm167_vm1 = vcmask 588800   ;;  %s1487_s1 = inlined_call_operand.vmem [shape: bf16[72,128], index: 1, kind: input, shape index: {}]   ;;  %s1488_s2 = inlined_call_operand.vmem [shape: f32[1,128], index: 2, kind: input, shape index: {}]   ;;  %s1489_s0 = inlined_call_operand.vmem [shape: bf16[512,72], index: 0, kind: input, shape index: {}]   ;;  %s1490_s3 = inlined_call_operand.vmem [shape: f32[512,128], index: 3, kind: output, shape index: {}]  }
   0x1   :  { %v55_v0 = vld [vmem:[%s1487_s1 + $0x20] sm:$0xf]  ;;  %v1010_v8 = vld [vmem:[%s1487_s1 + $0x18] sm:$0xff]  ;;  %v1009_v10 = vld [vmem:[%s1487_s1 + $0x10] sm:$0xff] }
   0x2   :  { %v414_v1 = vld [vmem:[%s1487_s1 + $0x20] sm:$0xf]  ;;  %v157_v2 = vunpack.c.l.b16 %v55_v0  ;;  %v1030_v9 = vld [vmem:[%s1487_s1 + $0x18] sm:$0xff]  ;;  %v1029_v11 = vld [vmem:[%s1487_s1 + $0x10] sm:$0xff] }
   0x3   :  { %v516_v3 = vunpack.c.l.b16 %v414_v1  ;;  %v1008_v12 = vld [vmem:[%s1487_s1 + $0x8] sm:$0xff]  ;;  %v1007_v14 = vld [vmem:[%s1487_s1] sm:$0xff]  ;;  %v993_v24 = vld [vmem:[%s1489_s0 + $0x10] sm:$0xff] }
   0x4   :  { %v162_v4 = vpack.c.b16 %v157_v2, %v157_v2  ;;  %v1028_v13 = vld [vmem:[%s1487_s1 + $0x8] sm:$0xff]  ;;  %v1027_v15 = vld [vmem:[%s1487_s1] sm:$0xff]  ;;  %v1001_v25 = vld [vmem:[%s1489_s0 + $0x50] sm:$0xff] }
   0x5   :  { %v521_v5 = vpack.c.b16 %v516_v3, %v516_v3  ;;  %v991_v16 = vld [vmem:[%s1489_s0] sm:$0xff]  ;;  %v992_v20 = vld [vmem:[%s1489_s0 + $0x8] sm:$0xff]  ;;  %v1013_v26 = vld [vmem:[%s1489_s0 + $0x90] sm:$0xff] }
   0x6   :  { %v218_v6 = vsel %vm216_vm0, %v162_v4, 0  ;;  %v999_v17 = vld [vmem:[%s1489_s0 + $0x40] sm:$0xff]  ;;  %v1000_v21 = vld [vmem:[%s1489_s0 + $0x48] sm:$0xff]  ;;  %v1021_v27 = vld [vmem:[%s1489_s0 + $0xd0] sm:$0xff] }
   0x7   :  { %v575_v7 = vsel %vm216_vm0, %v521_v5, 0  ;;  %223 = vmatpush.bf16.msra.mxu0 %v218_v6  ;;  %1031 = vmatpush.bf16.msra.mxu2 %v218_v6  ;;  %v1011_v18 = vld [vmem:[%s1489_s0 + $0x80] sm:$0xff]  ;;  %v1012_v22 = vld [vmem:[%s1489_s0 + $0x88] sm:$0xff]  ;;  %v994_v28 = vld [vmem:[%s1489_s0 + $0x18] sm:$0xff] }
   0x8   :  { %580 = vmatpush.bf16.msra.mxu1 %v575_v7  ;;  %1036 = vmatpush.bf16.msra.mxu3 %v575_v7  ;;  %v1019_v19 = vld [vmem:[%s1489_s0 + $0xc0] sm:$0xff]  ;;  %v1020_v23 = vld [vmem:[%s1489_s0 + $0xc8] sm:$0xff]  ;;  %v1002_v29 = vld [vmem:[%s1489_s0 + $0x58] sm:$0xff] }
   0x9   :  { %v1014_v30 = vld [vmem:[%s1489_s0 + $0x98] sm:$0xff]  ;;  %v995_v32 = vld [vmem:[%s1489_s0 + $0x20] sm:$0xff]  ;;  %v996_v36 = vld [vmem:[%s1489_s0 + $0x28] sm:$0xff] }
   0xa   :  { %v1022_v31 = vld [vmem:[%s1489_s0 + $0xd8] sm:$0xff]  ;;  %v1003_v33 = vld [vmem:[%s1489_s0 + $0x60] sm:$0xff]  ;;  %v1004_v37 = vld [vmem:[%s1489_s0 + $0x68] sm:$0xff] }
   0xb   :  { %224 = vmatpush.bf16.msra.mxu0 %v1010_v8  ;;  %1032 = vmatpush.bf16.msra.mxu2 %v1010_v8  ;;  %v1015_v34 = vld [vmem:[%s1489_s0 + $0xa0] sm:$0xff]  ;;  %v1016_v38 = vld [vmem:[%s1489_s0 + $0xa8] sm:$0xff]  ;;  %v997_v40 = vld [vmem:[%s1489_s0 + $0x30] sm:$0xff] }
   0xc   :  { %581 = vmatpush.bf16.msra.mxu1 %v1030_v9  ;;  %1037 = vmatpush.bf16.msra.mxu3 %v1030_v9  ;;  %v1023_v35 = vld [vmem:[%s1489_s0 + $0xe0] sm:$0xff]  ;;  %v1024_v39 = vld [vmem:[%s1489_s0 + $0xe8] sm:$0xff]  ;;  %v1005_v41 = vld [vmem:[%s1489_s0 + $0x70] sm:$0xff] }
   0xd   :  { %v1017_v42 = vld [vmem:[%s1489_s0 + $0xb0] sm:$0xff]  ;;  %v998_v44 = vld [vmem:[%s1489_s0 + $0x38] sm:$0xff]  ;;  %v1224_v48 = vld [vmem:[%s1488_s2] ss:$0 sm:$0xff] }
   0xe   :  { %v1025_v43 = vld [vmem:[%s1489_s0 + $0xf0] sm:$0xff]  ;;  %v1006_v45 = vld [vmem:[%s1489_s0 + $0x78] sm:$0xff]  ;;  %v1229_v49 = vld [vmem:[%s1488_s2] ss:$0 sm:$0xff] }
   0xf   :  { %225 = vmatpush.bf16.msra.mxu0 %v1009_v10  ;;  %1033 = vmatpush.bf16.msra.mxu2 %v1009_v10  ;;  %v1018_v46 = vld [vmem:[%s1489_s0 + $0xb8] sm:$0xff] }
  0x10   :  { %582 = vmatpush.bf16.msra.mxu1 %v1029_v11  ;;  %1038 = vmatpush.bf16.msra.mxu3 %v1029_v11  ;;  %v1026_v47 = vld [vmem:[%s1489_s0 + $0xf8] sm:$0xff] }
  0x13   :  { %226 = vmatpush.bf16.msra.mxu0 %v1008_v12  ;;  %1034 = vmatpush.bf16.msra.mxu2 %v1008_v12 }
  0x14   :  { %583 = vmatpush.bf16.msra.mxu1 %v1028_v13  ;;  %1039 = vmatpush.bf16.msra.mxu3 %v1028_v13 }
  0x17   :  { %227 = vmatpush.bf16.msra.mxu0 %v1007_v14  ;;  %1035 = vmatpush.bf16.msra.mxu2 %v1007_v14 }
  0x18   :  { %584 = vmatpush.bf16.msra.mxu1 %v1027_v15  ;;  %1040 = vmatpush.bf16.msra.mxu3 %v1027_v15 }
  0x1a   :  { %815 = vmatmul.msk.bf16.vlgmr.msra.gmra.mxu0 %vm167_vm1, %v991_v16  ;;  %823 = vmatmul.msk.bf16.vlgmr.msra.gmra.mxu2 %vm167_vm1, %v999_v17 }
  0x1b   :  { %943 = vmatmul.msk.bf16.vlgmr.msra.gmra.mxu1 %vm167_vm1, %v1011_v18  ;;  %951 = vmatmul.msk.bf16.vlgmr.msra.gmra.mxu3 %vm167_vm1, %v1019_v19 }
  0x2a   :  { %816 = vmatmul.msk.bf16.gmra.mxu0 %vm167_vm1, %v992_v20  ;;  %824 = vmatmul.msk.bf16.gmra.mxu2 %vm167_vm1, %v1000_v21 }
  0x2b   :  { %944 = vmatmul.msk.bf16.gmra.mxu1 %vm167_vm1, %v1012_v22  ;;  %952 = vmatmul.msk.bf16.gmra.mxu3 %vm167_vm1, %v1020_v23 }
  0x3a   :  { %817 = vmatmul.msk.bf16.gmra.mxu0 %vm167_vm1, %v993_v24  ;;  %825 = vmatmul.msk.bf16.gmra.mxu2 %vm167_vm1, %v1001_v25 }
  0x3b   :  { %945 = vmatmul.msk.bf16.gmra.mxu1 %vm167_vm1, %v1013_v26  ;;  %953 = vmatmul.msk.bf16.gmra.mxu3 %vm167_vm1, %v1021_v27 }
  0x4a   :  { %818 = vmatmul.msk.bf16.gmra.mxu0 %vm167_vm1, %v994_v28  ;;  %826 = vmatmul.msk.bf16.gmra.mxu2 %vm167_vm1, %v1002_v29 }
  0x4b   :  { %946 = vmatmul.msk.bf16.gmra.mxu1 %vm167_vm1, %v1014_v30  ;;  %954 = vmatmul.msk.bf16.gmra.mxu3 %vm167_vm1, %v1022_v31 }
  0x5a   :  { %819 = vmatmul.msk.bf16.gmra.mxu0 %vm167_vm1, %v995_v32  ;;  %827 = vmatmul.msk.bf16.gmra.mxu2 %vm167_vm1, %v1003_v33 }
  0x5b   :  { %947 = vmatmul.msk.bf16.gmra.mxu1 %vm167_vm1, %v1015_v34  ;;  %955 = vmatmul.msk.bf16.gmra.mxu3 %vm167_vm1, %v1023_v35 }
  0x6a   :  { %820 = vmatmul.msk.bf16.gmra.mxu0 %vm167_vm1, %v996_v36  ;;  %828 = vmatmul.msk.bf16.gmra.mxu2 %vm167_vm1, %v1004_v37 }
  0x6b   :  { %948 = vmatmul.msk.bf16.gmra.mxu1 %vm167_vm1, %v1016_v38  ;;  %956 = vmatmul.msk.bf16.gmra.mxu3 %vm167_vm1, %v1024_v39 }
  0x7a   :  { %821 = vmatmul.msk.bf16.gmra.mxu0 %vm167_vm1, %v997_v40  ;;  %829 = vmatmul.msk.bf16.gmra.mxu2 %vm167_vm1, %v1005_v41 }
  0x7b   :  { %949 = vmatmul.msk.bf16.gmra.mxu1 %vm167_vm1, %v1017_v42  ;;  %957 = vmatmul.msk.bf16.gmra.mxu3 %vm167_vm1, %v1025_v43 }
  0x8a   :  { %822 = vmatmul.msk.bf16.gmra.mxu0 %vm167_vm1, %v998_v44  ;;  %830 = vmatmul.msk.bf16.gmra.mxu2 %vm167_vm1, %v1006_v45 }
  0x8b   :  { %950 = vmatmul.msk.bf16.gmra.mxu1 %vm167_vm1, %v1018_v46  ;;  %958 = vmatmul.msk.bf16.gmra.mxu3 %vm167_vm1, %v1026_v47 }
  0x97   :  { %v229_v50 = vpop.f32.mrf.mxu0 }
  0x98   :  { %v230_v51 = vadd.f32 %v1224_v48, %v229_v50  ;;  %v586_v52 = vpop.f32.mrf.mxu1 }
  0x99   :  { %v587_v53 = vadd.f32 %v1229_v49, %v586_v52 }
  0x9a   :  { %v309_v54 = vmax.f32 %v230_v51, 0.0 }
  0x9b   :  { %v666_v55 = vmax.f32 %v587_v53, 0.0 }
  0x9c   :  { %341 = vst [vmem:[%s1490_s3] sm:$0xff] %v309_v54 }
  0x9d   :  { %959 = vst [vmem:[%s1490_s3 + $0x100] sm:$0xff] %v666_v55  ;;  %v269_v56 = vpop.f32.mrf.mxu2 }
  0x9e   :  { %v270_v57 = vadd.f32 %v1224_v48, %v269_v56  ;;  %v626_v58 = vpop.f32.mrf.mxu3 }
  0x9f   :  { %v627_v59 = vadd.f32 %v1229_v49, %v626_v58  ;;  %v231_v60 = vpop.f32.mrf.mxu0 }
  0xa0   :  { %v325_v61 = vmax.f32 %v270_v57, 0.0  ;;  %v232_v62 = vadd.f32 %v1224_v48, %v231_v60  ;;  %v588_v63 = vpop.f32.mrf.mxu1 }
  0xa1   :  { %v682_v0 = vmax.f32 %v627_v59, 0.0  ;;  %v589_v1 = vadd.f32 %v1229_v49, %v588_v63 }
  0xa2   :  { %357 = vst [vmem:[%s1490_s3 + $0x80] sm:$0xff] %v325_v61  ;;  %v310_v2 = vmax.f32 %v232_v62, 0.0 }
  0xa3   :  { %975 = vst [vmem:[%s1490_s3 + $0x180] sm:$0xff] %v682_v0  ;;  %v667_v3 = vmax.f32 %v589_v1, 0.0 }
  0xa4   :  { %342 = vst [vmem:[%s1490_s3 + $0x8] sm:$0xff] %v310_v2 }
  0xa5   :  { %960 = vst [vmem:[%s1490_s3 + $0x108] sm:$0xff] %v667_v3  ;;  %v271_v4 = vpop.f32.mrf.mxu2 }
  0xa6   :  { %v272_v5 = vadd.f32 %v1224_v48, %v271_v4  ;;  %v628_v6 = vpop.f32.mrf.mxu3 }
  0xa7   :  { %v629_v7 = vadd.f32 %v1229_v49, %v628_v6  ;;  %v234_v8 = vpop.f32.mrf.mxu0 }
  0xa8   :  { %v326_v9 = vmax.f32 %v272_v5, 0.0  ;;  %v235_v10 = vadd.f32 %v1224_v48, %v234_v8  ;;  %v591_v11 = vpop.f32.mrf.mxu1 }
  0xa9   :  { %v683_v12 = vmax.f32 %v629_v7, 0.0  ;;  %v592_v13 = vadd.f32 %v1229_v49, %v591_v11 }
  0xaa   :  { %358 = vst [vmem:[%s1490_s3 + $0x88] sm:$0xff] %v326_v9  ;;  %v311_v14 = vmax.f32 %v235_v10, 0.0 }
  0xab   :  { %976 = vst [vmem:[%s1490_s3 + $0x188] sm:$0xff] %v683_v12  ;;  %v668_v15 = vmax.f32 %v592_v13, 0.0 }
  0xac   :  { %343 = vst [vmem:[%s1490_s3 + $0x10] sm:$0xff] %v311_v14 }
  0xad   :  { %961 = vst [vmem:[%s1490_s3 + $0x110] sm:$0xff] %v668_v15  ;;  %v274_v16 = vpop.f32.mrf.mxu2 }
  0xae   :  { %v275_v17 = vadd.f32 %v1224_v48, %v274_v16  ;;  %v631_v18 = vpop.f32.mrf.mxu3 }
  0xaf   :  { %v632_v19 = vadd.f32 %v1229_v49, %v631_v18  ;;  %v236_v20 = vpop.f32.mrf.mxu0 }
  0xb0   :  { %v327_v21 = vmax.f32 %v275_v17, 0.0  ;;  %v237_v22 = vadd.f32 %v1224_v48, %v236_v20  ;;  %v593_v23 = vpop.f32.mrf.mxu1 }
  0xb1   :  { %v684_v24 = vmax.f32 %v632_v19, 0.0  ;;  %v594_v25 = vadd.f32 %v1229_v49, %v593_v23 }
  0xb2   :  { %359 = vst [vmem:[%s1490_s3 + $0x90] sm:$0xff] %v327_v21  ;;  %v312_v26 = vmax.f32 %v237_v22, 0.0 }
  0xb3   :  { %977 = vst [vmem:[%s1490_s3 + $0x190] sm:$0xff] %v684_v24  ;;  %v669_v27 = vmax.f32 %v594_v25, 0.0 }
  0xb4   :  { %344 = vst [vmem:[%s1490_s3 + $0x18] sm:$0xff] %v312_v26 }
  0xb5   :  { %962 = vst [vmem:[%s1490_s3 + $0x118] sm:$0xff] %v669_v27  ;;  %v276_v28 = vpop.f32.mrf.mxu2 }
  0xb6   :  { %v277_v29 = vadd.f32 %v1224_v48, %v276_v28  ;;  %v633_v30 = vpop.f32.mrf.mxu3 }
  0xb7   :  { %v634_v31 = vadd.f32 %v1229_v49, %v633_v30  ;;  %v239_v32 = vpop.f32.mrf.mxu0 }
  0xb8   :  { %v328_v33 = vmax.f32 %v277_v29, 0.0  ;;  %v240_v34 = vadd.f32 %v1224_v48, %v239_v32  ;;  %v596_v35 = vpop.f32.mrf.mxu1 }
  0xb9   :  { %v685_v36 = vmax.f32 %v634_v31, 0.0  ;;  %v597_v37 = vadd.f32 %v1229_v49, %v596_v35 }
  0xba   :  { %360 = vst [vmem:[%s1490_s3 + $0x98] sm:$0xff] %v328_v33  ;;  %v313_v38 = vmax.f32 %v240_v34, 0.0 }
  0xbb   :  { %978 = vst [vmem:[%s1490_s3 + $0x198] sm:$0xff] %v685_v36  ;;  %v670_v39 = vmax.f32 %v597_v37, 0.0 }
  0xbc   :  { %345 = vst [vmem:[%s1490_s3 + $0x20] sm:$0xff] %v313_v38 }
  0xbd   :  { %963 = vst [vmem:[%s1490_s3 + $0x120] sm:$0xff] %v670_v39  ;;  %v279_v40 = vpop.f32.mrf.mxu2 }
  0xbe   :  { %v280_v41 = vadd.f32 %v1224_v48, %v279_v40  ;;  %v636_v42 = vpop.f32.mrf.mxu3 }
  0xbf   :  { %v637_v43 = vadd.f32 %v1229_v49, %v636_v42  ;;  %v241_v44 = vpop.f32.mrf.mxu0 }
  0xc0   :  { %v329_v45 = vmax.f32 %v280_v41, 0.0  ;;  %v242_v46 = vadd.f32 %v1224_v48, %v241_v44  ;;  %v598_v47 = vpop.f32.mrf.mxu1 }
  0xc1   :  { %v686_v50 = vmax.f32 %v637_v43, 0.0  ;;  %v599_v51 = vadd.f32 %v1229_v49, %v598_v47 }
  0xc2   :  { %361 = vst [vmem:[%s1490_s3 + $0xa0] sm:$0xff] %v329_v45  ;;  %v314_v52 = vmax.f32 %v242_v46, 0.0 }
  0xc3   :  { %979 = vst [vmem:[%s1490_s3 + $0x1a0] sm:$0xff] %v686_v50  ;;  %v671_v53 = vmax.f32 %v599_v51, 0.0 }
  0xc4   :  { %346 = vst [vmem:[%s1490_s3 + $0x28] sm:$0xff] %v314_v52 }
  0xc5   :  { %964 = vst [vmem:[%s1490_s3 + $0x128] sm:$0xff] %v671_v53  ;;  %v281_v54 = vpop.f32.mrf.mxu2 }
  0xc6   :  { %v282_v55 = vadd.f32 %v1224_v48, %v281_v54  ;;  %v638_v56 = vpop.f32.mrf.mxu3 }
  0xc7   :  { %v639_v57 = vadd.f32 %v1229_v49, %v638_v56  ;;  %v244_v58 = vpop.f32.mrf.mxu0 }
  0xc8   :  { %v330_v59 = vmax.f32 %v282_v55, 0.0  ;;  %v245_v60 = vadd.f32 %v1224_v48, %v244_v58  ;;  %v601_v61 = vpop.f32.mrf.mxu1 }
  0xc9   :  { %v687_v62 = vmax.f32 %v639_v57, 0.0  ;;  %v602_v63 = vadd.f32 %v1229_v49, %v601_v61 }
  0xca   :  { %362 = vst [vmem:[%s1490_s3 + $0xa8] sm:$0xff] %v330_v59  ;;  %v315_v0 = vmax.f32 %v245_v60, 0.0 }
  0xcb   :  { %980 = vst [vmem:[%s1490_s3 + $0x1a8] sm:$0xff] %v687_v62  ;;  %v672_v1 = vmax.f32 %v602_v63, 0.0 }
  0xcc   :  { %347 = vst [vmem:[%s1490_s3 + $0x30] sm:$0xff] %v315_v0 }
  0xcd   :  { %965 = vst [vmem:[%s1490_s3 + $0x130] sm:$0xff] %v672_v1  ;;  %v284_v2 = vpop.f32.mrf.mxu2 }
  0xce   :  { %v285_v3 = vadd.f32 %v1224_v48, %v284_v2  ;;  %v641_v4 = vpop.f32.mrf.mxu3 }
  0xcf   :  { %v642_v5 = vadd.f32 %v1229_v49, %v641_v4  ;;  %v246_v6 = vpop.f32.mrf.mxu0 }
  0xd0   :  { %v331_v7 = vmax.f32 %v285_v3, 0.0  ;;  %v247_v8 = vadd.f32 %v1224_v48, %v246_v6  ;;  %v603_v9 = vpop.f32.mrf.mxu1 }
  0xd1   :  { %v688_v10 = vmax.f32 %v642_v5, 0.0  ;;  %v604_v11 = vadd.f32 %v1229_v49, %v603_v9 }
  0xd2   :  { %363 = vst [vmem:[%s1490_s3 + $0xb0] sm:$0xff] %v331_v7  ;;  %v316_v12 = vmax.f32 %v247_v8, 0.0 }
  0xd3   :  { %981 = vst [vmem:[%s1490_s3 + $0x1b0] sm:$0xff] %v688_v10  ;;  %v673_v13 = vmax.f32 %v604_v11, 0.0 }
  0xd4   :  { %348 = vst [vmem:[%s1490_s3 + $0x38] sm:$0xff] %v316_v12 }
  0xd5   :  { %966 = vst [vmem:[%s1490_s3 + $0x138] sm:$0xff] %v673_v13  ;;  %v286_v14 = vpop.f32.mrf.mxu2 }
  0xd6   :  { %v287_v15 = vadd.f32 %v1224_v48, %v286_v14  ;;  %v643_v16 = vpop.f32.mrf.mxu3 }
  0xd7   :  { %v644_v17 = vadd.f32 %v1229_v49, %v643_v16  ;;  %v249_v18 = vpop.f32.mrf.mxu0 }
  0xd8   :  { %v332_v19 = vmax.f32 %v287_v15, 0.0  ;;  %v250_v20 = vadd.f32 %v1224_v48, %v249_v18  ;;  %v606_v21 = vpop.f32.mrf.mxu1 }
  0xd9   :  { %v689_v22 = vmax.f32 %v644_v17, 0.0  ;;  %v607_v23 = vadd.f32 %v1229_v49, %v606_v21 }
  0xda   :  { %364 = vst [vmem:[%s1490_s3 + $0xb8] sm:$0xff] %v332_v19  ;;  %v317_v24 = vmax.f32 %v250_v20, 0.0 }
  0xdb   :  { %982 = vst [vmem:[%s1490_s3 + $0x1b8] sm:$0xff] %v689_v22  ;;  %v674_v25 = vmax.f32 %v607_v23, 0.0 }
  0xdc   :  { %349 = vst [vmem:[%s1490_s3 + $0x40] sm:$0xff] %v317_v24 }
  0xdd   :  { %967 = vst [vmem:[%s1490_s3 + $0x140] sm:$0xff] %v674_v25  ;;  %v289_v26 = vpop.f32.mrf.mxu2 }
  0xde   :  { %v290_v27 = vadd.f32 %v1224_v48, %v289_v26  ;;  %v646_v28 = vpop.f32.mrf.mxu3 }
  0xdf   :  { %v647_v29 = vadd.f32 %v1229_v49, %v646_v28  ;;  %v251_v30 = vpop.f32.mrf.mxu0 }
  0xe0   :  { %v333_v31 = vmax.f32 %v290_v27, 0.0  ;;  %v252_v32 = vadd.f32 %v1224_v48, %v251_v30  ;;  %v608_v33 = vpop.f32.mrf.mxu1 }
  0xe1   :  { %v690_v34 = vmax.f32 %v647_v29, 0.0  ;;  %v609_v35 = vadd.f32 %v1229_v49, %v608_v33 }
  0xe2   :  { %365 = vst [vmem:[%s1490_s3 + $0xc0] sm:$0xff] %v333_v31  ;;  %v318_v36 = vmax.f32 %v252_v32, 0.0 }
  0xe3   :  { %983 = vst [vmem:[%s1490_s3 + $0x1c0] sm:$0xff] %v690_v34  ;;  %v675_v37 = vmax.f32 %v609_v35, 0.0 }
  0xe4   :  { %350 = vst [vmem:[%s1490_s3 + $0x48] sm:$0xff] %v318_v36 }
  0xe5   :  { %968 = vst [vmem:[%s1490_s3 + $0x148] sm:$0xff] %v675_v37  ;;  %v291_v38 = vpop.f32.mrf.mxu2 }
  0xe6   :  { %v292_v39 = vadd.f32 %v1224_v48, %v291_v38  ;;  %v648_v40 = vpop.f32.mrf.mxu3 }
  0xe7   :  { %v649_v41 = vadd.f32 %v1229_v49, %v648_v40  ;;  %v254_v42 = vpop.f32.mrf.mxu0 }
  0xe8   :  { %v334_v43 = vmax.f32 %v292_v39, 0.0  ;;  %v255_v44 = vadd.f32 %v1224_v48, %v254_v42  ;;  %v611_v45 = vpop.f32.mrf.mxu1 }
  0xe9   :  { %v691_v46 = vmax.f32 %v649_v41, 0.0  ;;  %v612_v47 = vadd.f32 %v1229_v49, %v611_v45 }
  0xea   :  { %366 = vst [vmem:[%s1490_s3 + $0xc8] sm:$0xff] %v334_v43  ;;  %v319_v50 = vmax.f32 %v255_v44, 0.0 }
  0xeb   :  { %984 = vst [vmem:[%s1490_s3 + $0x1c8] sm:$0xff] %v691_v46  ;;  %v676_v51 = vmax.f32 %v612_v47, 0.0 }
  0xec   :  { %351 = vst [vmem:[%s1490_s3 + $0x50] sm:$0xff] %v319_v50 }
  0xed   :  { %969 = vst [vmem:[%s1490_s3 + $0x150] sm:$0xff] %v676_v51  ;;  %v294_v52 = vpop.f32.mrf.mxu2 }
  0xee   :  { %v295_v53 = vadd.f32 %v1224_v48, %v294_v52  ;;  %v651_v54 = vpop.f32.mrf.mxu3 }
  0xef   :  { %v652_v55 = vadd.f32 %v1229_v49, %v651_v54  ;;  %v256_v56 = vpop.f32.mrf.mxu0 }
  0xf0   :  { %v335_v57 = vmax.f32 %v295_v53, 0.0  ;;  %v257_v58 = vadd.f32 %v1224_v48, %v256_v56  ;;  %v613_v59 = vpop.f32.mrf.mxu1 }
  0xf1   :  { %v692_v60 = vmax.f32 %v652_v55, 0.0  ;;  %v614_v61 = vadd.f32 %v1229_v49, %v613_v59 }
  0xf2   :  { %367 = vst [vmem:[%s1490_s3 + $0xd0] sm:$0xff] %v335_v57  ;;  %v320_v62 = vmax.f32 %v257_v58, 0.0 }
  0xf3   :  { %985 = vst [vmem:[%s1490_s3 + $0x1d0] sm:$0xff] %v692_v60  ;;  %v677_v63 = vmax.f32 %v614_v61, 0.0 }
  0xf4   :  { %352 = vst [vmem:[%s1490_s3 + $0x58] sm:$0xff] %v320_v62 }
  0xf5   :  { %970 = vst [vmem:[%s1490_s3 + $0x158] sm:$0xff] %v677_v63  ;;  %v296_v0 = vpop.f32.mrf.mxu2 }
  0xf6   :  { %v297_v1 = vadd.f32 %v1224_v48, %v296_v0  ;;  %v653_v2 = vpop.f32.mrf.mxu3 }
  0xf7   :  { %v654_v3 = vadd.f32 %v1229_v49, %v653_v2  ;;  %v259_v4 = vpop.f32.mrf.mxu0 }
  0xf8   :  { %v336_v5 = vmax.f32 %v297_v1, 0.0  ;;  %v260_v6 = vadd.f32 %v1224_v48, %v259_v4  ;;  %v616_v7 = vpop.f32.mrf.mxu1 }
  0xf9   :  { %v693_v8 = vmax.f32 %v654_v3, 0.0  ;;  %v617_v9 = vadd.f32 %v1229_v49, %v616_v7 }
  0xfa   :  { %368 = vst [vmem:[%s1490_s3 + $0xd8] sm:$0xff] %v336_v5  ;;  %v321_v10 = vmax.f32 %v260_v6, 0.0 }
  0xfb   :  { %986 = vst [vmem:[%s1490_s3 + $0x1d8] sm:$0xff] %v693_v8  ;;  %v678_v11 = vmax.f32 %v617_v9, 0.0 }
  0xfc   :  { %353 = vst [vmem:[%s1490_s3 + $0x60] sm:$0xff] %v321_v10 }
  0xfd   :  { %971 = vst [vmem:[%s1490_s3 + $0x160] sm:$0xff] %v678_v11  ;;  %v299_v12 = vpop.f32.mrf.mxu2 }
  0xfe   :  { %v300_v13 = vadd.f32 %v1224_v48, %v299_v12  ;;  %v656_v14 = vpop.f32.mrf.mxu3 }
  0xff   :  { %v657_v15 = vadd.f32 %v1229_v49, %v656_v14  ;;  %v261_v16 = vpop.f32.mrf.mxu0 }
 0x100   :  { %v337_v17 = vmax.f32 %v300_v13, 0.0  ;;  %v262_v18 = vadd.f32 %v1224_v48, %v261_v16  ;;  %v618_v19 = vpop.f32.mrf.mxu1 }
 0x101   :  { %v694_v20 = vmax.f32 %v657_v15, 0.0  ;;  %v619_v21 = vadd.f32 %v1229_v49, %v618_v19 }
 0x102   :  { %369 = vst [vmem:[%s1490_s3 + $0xe0] sm:$0xff] %v337_v17  ;;  %v322_v22 = vmax.f32 %v262_v18, 0.0 }
 0x103   :  { %987 = vst [vmem:[%s1490_s3 + $0x1e0] sm:$0xff] %v694_v20  ;;  %v679_v23 = vmax.f32 %v619_v21, 0.0 }
 0x104   :  { %354 = vst [vmem:[%s1490_s3 + $0x68] sm:$0xff] %v322_v22 }
 0x105   :  { %972 = vst [vmem:[%s1490_s3 + $0x168] sm:$0xff] %v679_v23  ;;  %v301_v24 = vpop.f32.mrf.mxu2 }
 0x106   :  { %v302_v25 = vadd.f32 %v1224_v48, %v301_v24  ;;  %v658_v26 = vpop.f32.mrf.mxu3 }
 0x107   :  { %v659_v27 = vadd.f32 %v1229_v49, %v658_v26  ;;  %v264_v28 = vpop.f32.mrf.mxu0 }
 0x108   :  { %v338_v29 = vmax.f32 %v302_v25, 0.0  ;;  %v265_v30 = vadd.f32 %v1224_v48, %v264_v28  ;;  %v621_v31 = vpop.f32.mrf.mxu1 }
 0x109   :  { %v695_v32 = vmax.f32 %v659_v27, 0.0  ;;  %v622_v33 = vadd.f32 %v1229_v49, %v621_v31 }
 0x10a   :  { %370 = vst [vmem:[%s1490_s3 + $0xe8] sm:$0xff] %v338_v29  ;;  %v323_v34 = vmax.f32 %v265_v30, 0.0 }
 0x10b   :  { %988 = vst [vmem:[%s1490_s3 + $0x1e8] sm:$0xff] %v695_v32  ;;  %v680_v35 = vmax.f32 %v622_v33, 0.0 }
 0x10c   :  { %355 = vst [vmem:[%s1490_s3 + $0x70] sm:$0xff] %v323_v34 }
 0x10d   :  { %973 = vst [vmem:[%s1490_s3 + $0x170] sm:$0xff] %v680_v35  ;;  %v304_v36 = vpop.f32.mrf.mxu2 }
 0x10e   :  { %v305_v37 = vadd.f32 %v1224_v48, %v304_v36  ;;  %v661_v38 = vpop.f32.mrf.mxu3 }
 0x10f   :  { %v662_v39 = vadd.f32 %v1229_v49, %v661_v38  ;;  %v266_v40 = vpop.f32.mrf.mxu0 }
 0x110   :  { %v339_v41 = vmax.f32 %v305_v37, 0.0  ;;  %v267_v42 = vadd.f32 %v1224_v48, %v266_v40  ;;  %v623_v43 = vpop.f32.mrf.mxu1 }
 0x111   :  { %v696_v44 = vmax.f32 %v662_v39, 0.0  ;;  %v624_v45 = vadd.f32 %v1229_v49, %v623_v43 }
 0x112   :  { %371 = vst [vmem:[%s1490_s3 + $0xf0] sm:$0xff] %v339_v41  ;;  %v324_v46 = vmax.f32 %v267_v42, 0.0 }
 0x113   :  { %989 = vst [vmem:[%s1490_s3 + $0x1f0] sm:$0xff] %v696_v44  ;;  %v681_v47 = vmax.f32 %v624_v45, 0.0 }
 0x114   :  { %356 = vst [vmem:[%s1490_s3 + $0x78] sm:$0xff] %v324_v46 }
 0x115   :  { %974 = vst [vmem:[%s1490_s3 + $0x178] sm:$0xff] %v681_v47  ;;  %v306_v50 = vpop.f32.mrf.mxu2 }
 0x116   :  { %v307_v51 = vadd.f32 %v1224_v48, %v306_v50  ;;  %v663_v52 = vpop.f32.mrf.mxu3 }
 0x117   :  { %v664_v53 = vadd.f32 %v1229_v49, %v663_v52 }
 0x118   :  { %v340_v54 = vmax.f32 %v307_v51, 0.0 }
 0x119   :  { %v697_v55 = vmax.f32 %v664_v53, 0.0 }
 0x11a   :  { %372 = vst [vmem:[%s1490_s3 + $0xf8] sm:$0xff] %v340_v54 }
 0x11b   :  { %990 = vst [vmem:[%s1490_s3 + $0x1f8] sm:$0xff] %v697_v55 }

// kernel: perceptual_loss.18
= control target key start
LH: loop header
LB: loop body
LE: loop exit
PB: predicated region body
PF: predicated region fallthrough
CT: control target
= control target key end

     0   :  { %s390_s0 = inlined_call_operand.vmem [shape: f32[16,2,8,256], index: 0, kind: input, shape index: {}]   ;;  %s391_s1 = inlined_call_operand.vmem [shape: f32[16,8,128], index: 1, kind: output, shape index: {}]  }
   0x1   :  { %v8_v0 = vld [vmem:[%s390_s0] sm:$0xff]  ;;  %v9_v1 = vld [vmem:[%s390_s0 + $0x8] sm:$0xff]  ;;  %v10_v2 = vld [vmem:[%s390_s0 + $0x10] sm:$0xff] }
   0x2   :  { %v11_v3 = vld [vmem:[%s390_s0 + $0x18] sm:$0xff]  ;;  %v72_v4 = vmax.f32 %v8_v0, %v10_v2  ;;  %v12_v5 = vld [vmem:[%s390_s0 + $0x20] sm:$0xff]  ;;  %v13_v6 = vld [vmem:[%s390_s0 + $0x28] sm:$0xff] }
   0x3   :  { %v73_v7 = vmax.f32 %v9_v1, %v11_v3  ;;  %v14_v8 = vld [vmem:[%s390_s0 + $0x30] sm:$0xff]  ;;  %v15_v9 = vld [vmem:[%s390_s0 + $0x38] sm:$0xff]  ;;  %v16_v10 = vld [vmem:[%s390_s0 + $0x40] sm:$0xff] }
   0x4   :  { %v74_v11 = vmax.f32 %v12_v5, %v14_v8  ;;  %v75_v12 = vmax.f32 %v13_v6, %v15_v9  ;;  %v17_v13 = vld [vmem:[%s390_s0 + $0x48] sm:$0xff]  ;;  %v18_v14 = vld [vmem:[%s390_s0 + $0x50] sm:$0xff]  ;;  %v19_v15 = vld [vmem:[%s390_s0 + $0x58] sm:$0xff] }
   0x5   :  { %v104_v16 = vmax.f32 %v72_v4, %v73_v7  ;;  %v76_v17 = vmax.f32 %v16_v10, %v18_v14  ;;  %v77_v18 = vmax.f32 %v17_v13, %v19_v15  ;;  %v20_v19 = vld [vmem:[%s390_s0 + $0x60] sm:$0xff]  ;;  %v21_v20 = vld [vmem:[%s390_s0 + $0x68] sm:$0xff]  ;;  %v22_v21 = vld [vmem:[%s390_s0 + $0x70] sm:$0xff] }
   0x6   :  { %v105_v22 = vmax.f32 %v74_v11, %v75_v12  ;;  %v23_v23 = vld [vmem:[%s390_s0 + $0x78] sm:$0xff]  ;;  %v78_v24 = vmax.f32 %v20_v19, %v22_v21  ;;  %v24_v25 = vld [vmem:[%s390_s0 + $0x80] sm:$0xff]  ;;  %v25_v26 = vld [vmem:[%s390_s0 + $0x88] sm:$0xff] }
   0x7   :  { %120 = vst [vmem:[%s391_s1] sm:$0xff] %v104_v16  ;;  %v106_v27 = vmax.f32 %v76_v17, %v77_v18  ;;  %v79_v28 = vmax.f32 %v21_v20, %v23_v23  ;;  %v26_v29 = vld [vmem:[%s390_s0 + $0x90] sm:$0xff]  ;;  %v27_v30 = vld [vmem:[%s390_s0 + $0x98] sm:$0xff]  ;;  %v28_v31 = vld [vmem:[%s390_s0 + $0xa0] sm:$0xff] }
   0x8   :  { %121 = vst [vmem:[%s391_s1 + $0x8] sm:$0xff] %v105_v22  ;;  %v80_v32 = vmax.f32 %v24_v25, %v26_v29  ;;  %v81_v33 = vmax.f32 %v25_v26, %v27_v30  ;;  %v29_v34 = vld [vmem:[%s390_s0 + $0xa8] sm:$0xff]  ;;  %v30_v35 = vld [vmem:[%s390_s0 + $0xb0] sm:$0xff]  ;;  %v31_v36 = vld [vmem:[%s390_s0 + $0xb8] sm:$0xff] }
   0x9   :  { %122 = vst [vmem:[%s391_s1 + $0x10] sm:$0xff] %v106_v27  ;;  %v107_v37 = vmax.f32 %v78_v24, %v79_v28  ;;  %v82_v38 = vmax.f32 %v28_v31, %v30_v35  ;;  %v83_v39 = vmax.f32 %v29_v34, %v31_v36  ;;  %v32_v40 = vld [vmem:[%s390_s0 + $0xc0] sm:$0xff]  ;;  %v33_v41 = vld [vmem:[%s390_s0 + $0xc8] sm:$0xff]  ;;  %v34_v42 = vld [vmem:[%s390_s0 + $0xd0] sm:$0xff] }
   0xa   :  { %v108_v43 = vmax.f32 %v80_v32, %v81_v33  ;;  %v35_v44 = vld [vmem:[%s390_s0 + $0xd8] sm:$0xff]  ;;  %v84_v45 = vmax.f32 %v32_v40, %v34_v42  ;;  %v36_v46 = vld [vmem:[%s390_s0 + $0xe0] sm:$0xff]  ;;  %v37_v47 = vld [vmem:[%s390_s0 + $0xe8] sm:$0xff] }
   0xb   :  { %123 = vst [vmem:[%s391_s1 + $0x18] sm:$0xff] %v107_v37  ;;  %v109_v48 = vmax.f32 %v82_v38, %v83_v39  ;;  %v85_v49 = vmax.f32 %v33_v41, %v35_v44  ;;  %v38_v50 = vld [vmem:[%s390_s0 + $0xf0] sm:$0xff]  ;;  %v39_v51 = vld [vmem:[%s390_s0 + $0xf8] sm:$0xff]  ;;  %v40_v52 = vld [vmem:[%s390_s0 + $0x100] sm:$0xff] }
   0xc   :  { %124 = vst [vmem:[%s391_s1 + $0x20] sm:$0xff] %v108_v43  ;;  %v86_v53 = vmax.f32 %v36_v46, %v38_v50  ;;  %v87_v54 = vmax.f32 %v37_v47, %v39_v51  ;;  %v41_v55 = vld [vmem:[%s390_s0 + $0x108] sm:$0xff]  ;;  %v42_v56 = vld [vmem:[%s390_s0 + $0x110] sm:$0xff]  ;;  %v43_v57 = vld [vmem:[%s390_s0 + $0x118] sm:$0xff] }
   0xd   :  { %125 = vst [vmem:[%s391_s1 + $0x28] sm:$0xff] %v109_v48  ;;  %v110_v58 = vmax.f32 %v84_v45, %v85_v49  ;;  %v88_v59 = vmax.f32 %v40_v52, %v42_v56  ;;  %v89_v60 = vmax.f32 %v41_v55, %v43_v57  ;;  %v44_v61 = vld [vmem:[%s390_s0 + $0x120] sm:$0xff]  ;;  %v45_v62 = vld [vmem:[%s390_s0 + $0x128] sm:$0xff]  ;;  %v46_v63 = vld [vmem:[%s390_s0 + $0x130] sm:$0xff] }
   0xe   :  { %v111_v0 = vmax.f32 %v86_v53, %v87_v54  ;;  %v47_v1 = vld [vmem:[%s390_s0 + $0x138] sm:$0xff]  ;;  %v90_v2 = vmax.f32 %v44_v61, %v46_v63  ;;  %v48_v3 = vld [vmem:[%s390_s0 + $0x140] sm:$0xff]  ;;  %v49_v4 = vld [vmem:[%s390_s0 + $0x148] sm:$0xff] }
   0xf   :  { %126 = vst [vmem:[%s391_s1 + $0x30] sm:$0xff] %v110_v58  ;;  %v112_v5 = vmax.f32 %v88_v59, %v89_v60  ;;  %v91_v6 = vmax.f32 %v45_v62, %v47_v1  ;;  %v50_v7 = vld [vmem:[%s390_s0 + $0x150] sm:$0xff]  ;;  %v51_v8 = vld [vmem:[%s390_s0 + $0x158] sm:$0xff]  ;;  %v52_v9 = vld [vmem:[%s390_s0 + $0x160] sm:$0xff] }
  0x10   :  { %127 = vst [vmem:[%s391_s1 + $0x38] sm:$0xff] %v111_v0  ;;  %v92_v10 = vmax.f32 %v48_v3, %v50_v7  ;;  %v93_v11 = vmax.f32 %v49_v4, %v51_v8  ;;  %v53_v12 = vld [vmem:[%s390_s0 + $0x168] sm:$0xff]  ;;  %v54_v13 = vld [vmem:[%s390_s0 + $0x170] sm:$0xff]  ;;  %v55_v14 = vld [vmem:[%s390_s0 + $0x178] sm:$0xff] }
  0x11   :  { %128 = vst [vmem:[%s391_s1 + $0x40] sm:$0xff] %v112_v5  ;;  %v113_v15 = vmax.f32 %v90_v2, %v91_v6  ;;  %v94_v16 = vmax.f32 %v52_v9, %v54_v13  ;;  %v95_v17 = vmax.f32 %v53_v12, %v55_v14  ;;  %v56_v18 = vld [vmem:[%s390_s0 + $0x180] sm:$0xff]  ;;  %v57_v19 = vld [vmem:[%s390_s0 + $0x188] sm:$0xff]  ;;  %v58_v20 = vld [vmem:[%s390_s0 + $0x190] sm:$0xff] }
  0x12   :  { %v114_v21 = vmax.f32 %v92_v10, %v93_v11  ;;  %v59_v22 = vld [vmem:[%s390_s0 + $0x198] sm:$0xff]  ;;  %v96_v23 = vmax.f32 %v56_v18, %v58_v20  ;;  %v60_v24 = vld [vmem:[%s390_s0 + $0x1a0] sm:$0xff]  ;;  %v61_v25 = vld [vmem:[%s390_s0 + $0x1a8] sm:$0xff] }
  0x13   :  { %129 = vst [vmem:[%s391_s1 + $0x48] sm:$0xff] %v113_v15  ;;  %v115_v26 = vmax.f32 %v94_v16, %v95_v17  ;;  %v97_v27 = vmax.f32 %v57_v19, %v59_v22  ;;  %v62_v28 = vld [vmem:[%s390_s0 + $0x1b0] sm:$0xff]  ;;  %v63_v29 = vld [vmem:[%s390_s0 + $0x1b8] sm:$0xff]  ;;  %v64_v30 = vld [vmem:[%s390_s0 + $0x1c0] sm:$0xff] }
  0x14   :  { %130 = vst [vmem:[%s391_s1 + $0x50] sm:$0xff] %v114_v21  ;;  %v98_v31 = vmax.f32 %v60_v24, %v62_v28  ;;  %v99_v32 = vmax.f32 %v61_v25, %v63_v29  ;;  %v65_v33 = vld [vmem:[%s390_s0 + $0x1c8] sm:$0xff]  ;;  %v66_v34 = vld [vmem:[%s390_s0 + $0x1d0] sm:$0xff]  ;;  %v67_v35 = vld [vmem:[%s390_s0 + $0x1d8] sm:$0xff] }
  0x15   :  { %131 = vst [vmem:[%s391_s1 + $0x58] sm:$0xff] %v115_v26  ;;  %v116_v36 = vmax.f32 %v96_v23, %v97_v27  ;;  %v100_v37 = vmax.f32 %v64_v30, %v66_v34  ;;  %v101_v38 = vmax.f32 %v65_v33, %v67_v35  ;;  %v68_v39 = vld [vmem:[%s390_s0 + $0x1e0] sm:$0xff]  ;;  %v69_v40 = vld [vmem:[%s390_s0 + $0x1e8] sm:$0xff]  ;;  %v70_v41 = vld [vmem:[%s390_s0 + $0x1f0] sm:$0xff] }
  0x16   :  { %v117_v42 = vmax.f32 %v98_v31, %v99_v32  ;;  %v71_v43 = vld [vmem:[%s390_s0 + $0x1f8] sm:$0xff]  ;;  %v102_v44 = vmax.f32 %v68_v39, %v70_v41 }
  0x17   :  { %132 = vst [vmem:[%s391_s1 + $0x60] sm:$0xff] %v116_v36  ;;  %v118_v45 = vmax.f32 %v100_v37, %v101_v38  ;;  %v103_v46 = vmax.f32 %v69_v40, %v71_v43 }
  0x18   :  { %133 = vst [vmem:[%s391_s1 + $0x68] sm:$0xff] %v117_v42 }
  0x19   :  { %134 = vst [vmem:[%s391_s1 + $0x70] sm:$0xff] %v118_v45  ;;  %v119_v47 = vmax.f32 %v102_v44, %v103_v46 }
  0x1b   :  { %135 = vst [vmem:[%s391_s1 + $0x78] sm:$0xff] %v119_v47 }

// kernel: perceptual_loss.17
= control target key start
LH: loop header
LB: loop body
LE: loop exit
PB: predicated region body
PF: predicated region fallthrough
CT: control target
= control target key end

     0   :  { %vm806_vm0 = vcmask 523264   ;;  %s5742_s1 = inlined_call_operand.vmem [shape: bf16[576,128], index: 1, kind: input, shape index: {}]   ;;  %s5743_s2 = inlined_call_operand.vmem [shape: f32[1,128], index: 2, kind: input, shape index: {}]   ;;  %s5744_s0 = inlined_call_operand.vmem [shape: bf16[512,576], index: 0, kind: input, shape index: {}]   ;;  %s5745_s3 = inlined_call_operand.vmem [shape: f32[512,128], index: 3, kind: output, shape index: {}]  }
   0x1   :  { %v3893_v0 = vld [vmem:[%s5742_s1 + $0x38] sm:$0xff]  ;;  %v3892_v2 = vld [vmem:[%s5742_s1 + $0x30] sm:$0xff]  ;;  %v3891_v4 = vld [vmem:[%s5742_s1 + $0x28] sm:$0xff] }
   0x2   :  { %v3901_v1 = vld [vmem:[%s5742_s1 + $0x78] sm:$0xff]  ;;  %4038 = vmatpush.bf16.msra.mxu2 %v3893_v0  ;;  %v3900_v3 = vld [vmem:[%s5742_s1 + $0x70] sm:$0xff]  ;;  %855 = vmatpush.bf16.msra.mxu0 %v3893_v0  ;;  %v3899_v5 = vld [vmem:[%s5742_s1 + $0x68] sm:$0xff] }
   0x3   :  { %4046 = vmatpush.bf16.msra.mxu3 %v3901_v1  ;;  %944 = vmatpush.bf16.msra.mxu1 %v3901_v1  ;;  %v3890_v6 = vld [vmem:[%s5742_s1 + $0x20] sm:$0xff]  ;;  %v3889_v8 = vld [vmem:[%s5742_s1 + $0x18] sm:$0xff]  ;;  %v3888_v10 = vld [vmem:[%s5742_s1 + $0x10] sm:$0xff] }
   0x4   :  { %v3898_v7 = vld [vmem:[%s5742_s1 + $0x60] sm:$0xff]  ;;  %v3897_v9 = vld [vmem:[%s5742_s1 + $0x58] sm:$0xff]  ;;  %v3896_v11 = vld [vmem:[%s5742_s1 + $0x50] sm:$0xff] }
   0x5   :  { %v3887_v12 = vld [vmem:[%s5742_s1 + $0x8] sm:$0xff]  ;;  %v3886_v14 = vld [vmem:[%s5742_s1] sm:$0xff]  ;;  %v3848_v17 = vld [vmem:[%s5744_s0 + $0x150] sm:$0xf0] }
   0x6   :  { %4039 = vmatpush.bf16.msra.mxu2 %v3892_v2  ;;  %856 = vmatpush.bf16.msra.mxu0 %v3892_v2  ;;  %v3895_v13 = vld [vmem:[%s5742_s1 + $0x48] sm:$0xff]  ;;  %v3894_v15 = vld [vmem:[%s5742_s1 + $0x40] sm:$0xff]  ;;  %v2882_v19 = vld [vmem:[%s5744_s0 + $0x154] sm:$0xf0] }
   0x7   :  { %4047 = vmatpush.bf16.msra.mxu3 %v3900_v3  ;;  %945 = vmatpush.bf16.msra.mxu1 %v3900_v3  ;;  %v2880_v16 = vld [vmem:[%s5744_s0 + $0x140] sm:$0xf]  ;;  %v3846_v18 = vld [vmem:[%s5744_s0 + $0x144] sm:$0xf]  ;;  %v3909_v20 = vld [vmem:[%s5742_s1 + $0xb8] sm:$0xff] }
   0x8   :  { %v2720_v21 = vld [vmem:[%s5744_s0] sm:$0xf]  ;;  %v3808_v22 = vld [vmem:[%s5744_s0 + $0x10] sm:$0xf0]  ;;  %v3917_v23 = vld [vmem:[%s5742_s1 + $0xf8] sm:$0xff]  ;;  %v2881_v26 = vor.u32 %v3848_v17, %v2880_v16  ;;  %v2885_v27 = vor.u32 %v3846_v18, %v2882_v19 }
   0x9   :  { %v3806_v24 = vld [vmem:[%s5744_s0 + $0x4] sm:$0xf]  ;;  %v2722_v25 = vld [vmem:[%s5744_s0 + $0x14] sm:$0xf0]  ;;  %v2721_v28 = vor.u32 %v3808_v22, %v2720_v21  ;;  %v3908_v32 = vld [vmem:[%s5742_s1 + $0xb0] sm:$0xff] }
   0xa   :  { %4040 = vmatpush.bf16.msra.mxu2 %v3891_v4  ;;  %857 = vmatpush.bf16.msra.mxu0 %v3891_v4  ;;  %v4009_v29 = vld [vmem:[%s5742_s1 + $0x38] sm:$0xff]  ;;  %v2725_v30 = vor.u32 %v3806_v24, %v2722_v25  ;;  %v3916_v33 = vld [vmem:[%s5742_s1 + $0xf0] sm:$0xff]  ;;  %v3907_v36 = vld [vmem:[%s5742_s1 + $0xa8] sm:$0xff] }
   0xb   :  { %4048 = vmatpush.bf16.msra.mxu3 %v3899_v5  ;;  %946 = vmatpush.bf16.msra.mxu1 %v3899_v5  ;;  %v3921_v31 = vld [vmem:[%s5742_s1 + $0x118] sm:$0xff]  ;;  %v4008_v34 = vld [vmem:[%s5742_s1 + $0x30] sm:$0xff]  ;;  %v3915_v37 = vld [vmem:[%s5742_s1 + $0xe8] sm:$0xff] }
   0xc   :  { %v3920_v35 = vld [vmem:[%s5742_s1 + $0x110] sm:$0xff]  ;;  %v4007_v38 = vld [vmem:[%s5742_s1 + $0x28] sm:$0xff]  ;;  %v3853_v40 = vld [vmem:[%s5744_s0 + $0x178] sm:$0xf0] }
   0xd   :  { %v2900_v39 = vld [vmem:[%s5744_s0 + $0x168] sm:$0xf]  ;;  %v3851_v41 = vld [vmem:[%s5744_s0 + $0x16c] sm:$0xf]  ;;  %v2902_v42 = vld [vmem:[%s5744_s0 + $0x17c] sm:$0xf0] }
   0xe   :  { %4041 = vmatpush.bf16.msra.mxu2 %v3890_v6  ;;  %858 = vmatpush.bf16.msra.mxu0 %v3890_v6  ;;  %v2740_v43 = vld [vmem:[%s5744_s0 + $0x28] sm:$0xf]  ;;  %v3813_v44 = vld [vmem:[%s5744_s0 + $0x38] sm:$0xf0]  ;;  %v3811_v45 = vld [vmem:[%s5744_s0 + $0x2c] sm:$0xf]  ;;  %v2901_v47 = vor.u32 %v3853_v40, %v2900_v39  ;;  %v2905_v48 = vor.u32 %v3851_v41, %v2902_v42 }
   0xf   :  { %4049 = vmatpush.bf16.msra.mxu3 %v3898_v7  ;;  %947 = vmatpush.bf16.msra.mxu1 %v3898_v7  ;;  %v2742_v46 = vld [vmem:[%s5744_s0 + $0x3c] sm:$0xf0]  ;;  %v2741_v49 = vor.u32 %v3813_v44, %v2740_v43  ;;  %v2920_v54 = vld [vmem:[%s5744_s0 + $0x190] sm:$0xf]  ;;  %v3858_v55 = vld [vmem:[%s5744_s0 + $0x1a0] sm:$0xf0] }
  0x10   :  { %v2745_v50 = vor.u32 %v3811_v45, %v2742_v46  ;;  %v3906_v51 = vld [vmem:[%s5742_s1 + $0xa0] sm:$0xff]  ;;  %v3856_v56 = vld [vmem:[%s5744_s0 + $0x194] sm:$0xf]  ;;  %v2922_v57 = vld [vmem:[%s5744_s0 + $0x1a4] sm:$0xf0]  ;;  %v2921_v62 = vor.u32 %v3858_v55, %v2920_v54 }
  0x11   :  { %v3914_v52 = vld [vmem:[%s5742_s1 + $0xe0] sm:$0xff]  ;;  %v2760_v58 = vld [vmem:[%s5744_s0 + $0x50] sm:$0xf]  ;;  %v3816_v60 = vld [vmem:[%s5744_s0 + $0x54] sm:$0xf]  ;;  %v2925_v63 = vor.u32 %v3856_v56, %v2922_v57 }
  0x12   :  { %4042 = vmatpush.bf16.msra.mxu2 %v3889_v8  ;;  %859 = vmatpush.bf16.msra.mxu0 %v3889_v8  ;;  %v4006_v53 = vld [vmem:[%s5742_s1 + $0x20] sm:$0xff]  ;;  %v2762_v61 = vld [vmem:[%s5744_s0 + $0x64] sm:$0xf0]  ;;  %v3905_v2 = vld [vmem:[%s5742_s1 + $0x98] sm:$0xff] }
  0x13   :  { %4050 = vmatpush.bf16.msra.mxu3 %v3897_v9  ;;  %948 = vmatpush.bf16.msra.mxu1 %v3897_v9  ;;  %v3818_v59 = vld [vmem:[%s5744_s0 + $0x60] sm:$0xf0]  ;;  %v2765_v1 = vor.u32 %v3816_v60, %v2762_v61  ;;  %v3913_v3 = vld [vmem:[%s5742_s1 + $0xd8] sm:$0xff]  ;;  %v3919_v4 = vld [vmem:[%s5742_s1 + $0x108] sm:$0xff] }
  0x14   :  { %v2761_v0 = vor.u32 %v3818_v59, %v2760_v58  ;;  %v4005_v5 = vld [vmem:[%s5742_s1 + $0x18] sm:$0xff]  ;;  %v3863_v7 = vld [vmem:[%s5744_s0 + $0x1c8] sm:$0xf0]  ;;  %v2942_v9 = vld [vmem:[%s5744_s0 + $0x1cc] sm:$0xf0] }
  0x15   :  { %v2940_v6 = vld [vmem:[%s5744_s0 + $0x1b8] sm:$0xf]  ;;  %v3861_v8 = vld [vmem:[%s5744_s0 + $0x1bc] sm:$0xf]  ;;  %v3904_v18 = vld [vmem:[%s5742_s1 + $0x90] sm:$0xff] }
  0x16   :  { %4043 = vmatpush.bf16.msra.mxu2 %v3888_v10  ;;  %860 = vmatpush.bf16.msra.mxu0 %v3888_v10  ;;  %v2780_v10 = vld [vmem:[%s5744_s0 + $0x78] sm:$0xf]  ;;  %v3912_v19 = vld [vmem:[%s5742_s1 + $0xd0] sm:$0xff]  ;;  %v2960_v21 = vld [vmem:[%s5744_s0 + $0x1e0] sm:$0xf] }
  0x17   :  { %4051 = vmatpush.bf16.msra.mxu3 %v3896_v11  ;;  %949 = vmatpush.bf16.msra.mxu1 %v3896_v11  ;;  %v3823_v11 = vld [vmem:[%s5744_s0 + $0x88] sm:$0xf0]  ;;  %v3868_v22 = vld [vmem:[%s5744_s0 + $0x1f0] sm:$0xf0]  ;;  %v2962_v24 = vld [vmem:[%s5744_s0 + $0x1f4] sm:$0xf0] }
  0x18   :  { %v2781_v16 = vor.u32 %v3823_v11, %v2780_v10  ;;  %v2800_v25 = vld [vmem:[%s5744_s0 + $0xa0] sm:$0xf]  ;;  %v3871_v39 = vld [vmem:[%s5744_s0 + $0x20c] sm:$0xf]  ;;  %v2820_v41 = vld [vmem:[%s5744_s0 + $0xc8] sm:$0xf] }
  0x19   :  { %v2982_v40 = vld [vmem:[%s5744_s0 + $0x21c] sm:$0xf0]  ;;  %v3833_v42 = vld [vmem:[%s5744_s0 + $0xd8] sm:$0xf0]  ;;  %v3831_v43 = vld [vmem:[%s5744_s0 + $0xcc] sm:$0xf] }
  0x1a   :  { %4044 = vmatpush.bf16.msra.mxu2 %v3887_v12  ;;  %861 = vmatpush.bf16.msra.mxu0 %v3887_v12  ;;  %v3821_v12 = vld [vmem:[%s5744_s0 + $0x7c] sm:$0xf]  ;;  %v2822_v44 = vld [vmem:[%s5744_s0 + $0xdc] sm:$0xf0]  ;;  %v2985_v46 = vor.u32 %v3871_v39, %v2982_v40  ;;  %v3876_v54 = vld [vmem:[%s5744_s0 + $0x234] sm:$0xf] }
  0x1b   :  { %4052 = vmatpush.bf16.msra.mxu3 %v3895_v13  ;;  %950 = vmatpush.bf16.msra.mxu1 %v3895_v13  ;;  %v2782_v13 = vld [vmem:[%s5744_s0 + $0x8c] sm:$0xf0]  ;;  %v3002_v55 = vld [vmem:[%s5744_s0 + $0x244] sm:$0xf0]  ;;  %v3838_v57 = vld [vmem:[%s5744_s0 + $0x100] sm:$0xf0] }
  0x1c   :  { %v2785_v17 = vor.u32 %v3821_v12, %v2782_v13  ;;  %v2840_v56 = vld [vmem:[%s5744_s0 + $0xf0] sm:$0xf]  ;;  %v3836_v58 = vld [vmem:[%s5744_s0 + $0xf4] sm:$0xf]  ;;  %v2842_v59 = vld [vmem:[%s5744_s0 + $0x104] sm:$0xf0]  ;;  %v3005_v61 = vor.u32 %v3876_v54, %v3002_v55 }
  0x1d   :  { %v2862_v10 = vld [vmem:[%s5744_s0 + $0x12c] sm:$0xf0] }
  0x1e   :  { %4045 = vmatpush.bf16.msra.mxu2 %v3886_v14  ;;  %862 = vmatpush.bf16.msra.mxu0 %v3886_v14  ;;  %v2941_v14 = vor.u32 %v3863_v7, %v2940_v6  ;;  %v4033_v6 = vld [vmem:[%s5742_s1 + $0xf8] sm:$0xff] }
  0x1f   :  { %4053 = vmatpush.bf16.msra.mxu3 %v3894_v15  ;;  %951 = vmatpush.bf16.msra.mxu1 %v3894_v15  ;;  %v2945_v15 = vor.u32 %v3861_v8, %v2942_v9  ;;  %v2860_v7 = vld [vmem:[%s5744_s0 + $0x118] sm:$0xf]  ;;  %v3843_v8 = vld [vmem:[%s5744_s0 + $0x128] sm:$0xf0]  ;;  %v3841_v9 = vld [vmem:[%s5744_s0 + $0x11c] sm:$0xf] }
  0x20   :  { %v2861_v13 = vor.u32 %v3843_v8, %v2860_v7  ;;  %v2768_v7 = vld [vmem:[%s5744_s0 + $0x58] sm:$0xf] }
  0x21   :  { %903 = vmatmul.bf16.vlgmr.msra.gmra.mxu2 %v2881_v26  ;;  %863 = vmatmul.bf16.vlgmr.msra.gmra.mxu0 %v2721_v28  ;;  %v3828_v26 = vld [vmem:[%s5744_s0 + $0xb0] sm:$0xf0]  ;;  %v2802_v28 = vld [vmem:[%s5744_s0 + $0xb4] sm:$0xf0] }
  0x22   :  { %1033 = vmatpush.bf16.msrb.mxu2 %v3909_v20  ;;  %992 = vmatmul.bf16.vlgmr.msra.gmra.mxu3 %v2885_v27  ;;  %v4004_v20 = vld [vmem:[%s5742_s1 + $0x10] sm:$0xff]  ;;  %v3826_v27 = vld [vmem:[%s5744_s0 + $0xa4] sm:$0xf] }
  0x23   :  { %1122 = vmatpush.bf16.msrb.mxu3 %v3917_v23  ;;  %2203 = vmatpush.bf16.msrb.mxu1 %v4009_v29  ;;  %v3866_v23 = vld [vmem:[%s5744_s0 + $0x1e4] sm:$0xf]  ;;  %v2961_v29 = vor.u32 %v3868_v22, %v2960_v21  ;;  %v3296_v22 = vld [vmem:[%s5744_s0 + $0x280] sm:$0xf] }
  0x24   :  { %952 = vmatmul.bf16.vlgmr.msra.gmra.mxu1 %v2725_v30  ;;  %1215 = vmatpush.bf16.msrb.mxu0 %v3921_v31  ;;  %v2965_v30 = vor.u32 %v3866_v23, %v2962_v24  ;;  %v2801_v31 = vor.u32 %v3828_v26, %v2800_v25  ;;  %v3810_v21 = vld [vmem:[%s5744_s0 + $0x20] sm:$0xf0]  ;;  %v3924_v23 = vld [vmem:[%s5744_s0 + $0x290] sm:$0xf0]  ;;  %v4439_v26 = vld [vmem:[%s5743_s2] ss:$0 sm:$0xff] }
  0x26   :  { %1034 = vmatpush.bf16.msrb.mxu2 %v3908_v32  ;;  %v2805_v32 = vor.u32 %v3826_v27, %v2802_v28 }
  0x27   :  { %1123 = vmatpush.bf16.msrb.mxu3 %v3916_v33  ;;  %2204 = vmatpush.bf16.msrb.mxu1 %v4008_v34  ;;  %v3903_v33 = vld [vmem:[%s5742_s1 + $0x88] sm:$0xff] }
  0x28   :  { %1216 = vmatpush.bf16.msrb.mxu0 %v3920_v35  ;;  %v3911_v34 = vld [vmem:[%s5742_s1 + $0xc8] sm:$0xff]  ;;  %v3918_v35 = vld [vmem:[%s5742_s1 + $0x100] sm:$0xff] }
  0x2a   :  { %1035 = vmatpush.bf16.msrb.mxu2 %v3907_v36  ;;  %v4003_v36 = vld [vmem:[%s5742_s1 + $0x8] sm:$0xff] }
  0x2b   :  { %1124 = vmatpush.bf16.msrb.mxu3 %v3915_v37  ;;  %2205 = vmatpush.bf16.msrb.mxu1 %v4007_v38  ;;  %v2980_v37 = vld [vmem:[%s5744_s0 + $0x208] sm:$0xf]  ;;  %v3873_v38 = vld [vmem:[%s5744_s0 + $0x218] sm:$0xf0] }
  0x2c   :  { %1217 = vmatpush.bf16.msrb.mxu0 %v3919_v4  ;;  %v2981_v45 = vor.u32 %v3873_v38, %v2980_v37  ;;  %v3881_v4 = vld [vmem:[%s5744_s0 + $0x25c] sm:$0xf] }
  0x2e   :  { %1036 = vmatpush.bf16.msrb.mxu2 %v3906_v51  ;;  %v4002_v51 = vld [vmem:[%s5742_s1] sm:$0xff] }
  0x2f   :  { %1125 = vmatpush.bf16.msrb.mxu3 %v3914_v52  ;;  %2206 = vmatpush.bf16.msrb.mxu1 %v4006_v53  ;;  %v3000_v52 = vld [vmem:[%s5744_s0 + $0x230] sm:$0xf]  ;;  %v3878_v53 = vld [vmem:[%s5744_s0 + $0x240] sm:$0xf0] }
  0x30   :  { %1218 = vmatpush.bf16.msrb.mxu0 %v3918_v35  ;;  %v3001_v60 = vor.u32 %v3878_v53, %v3000_v52  ;;  %v3316_v52 = vld [vmem:[%s5744_s0 + $0x2a8] sm:$0xf]  ;;  %v3929_v53 = vld [vmem:[%s5744_s0 + $0x2b8] sm:$0xf0] }
  0x31   :  { %908 = vmatmul.bf16.gmra.mxu2 %v2901_v47  ;;  %868 = vmatmul.bf16.gmra.mxu0 %v2741_v49  ;;  %v2821_v47 = vor.u32 %v3833_v42, %v2820_v41  ;;  %v3902_v49 = vld [vmem:[%s5742_s1 + $0x80] sm:$0xff]  ;;  %v2748_v42 = vld [vmem:[%s5744_s0 + $0x30] sm:$0xf] }
  0x32   :  { %997 = vmatmul.bf16.gmra.mxu3 %v2905_v48  ;;  %1037 = vmatpush.bf16.msrb.mxu2 %v3905_v2  ;;  %v2825_v48 = vor.u32 %v3831_v43, %v2822_v44  ;;  %v3020_v2 = vld [vmem:[%s5744_s0 + $0x258] sm:$0xf]  ;;  %v3814_v43 = vld [vmem:[%s5744_s0 + $0x40] sm:$0xf0] }
  0x33   :  { %1126 = vmatpush.bf16.msrb.mxu3 %v3913_v3  ;;  %2207 = vmatpush.bf16.msrb.mxu1 %v4005_v5  ;;  %v3883_v3 = vld [vmem:[%s5744_s0 + $0x268] sm:$0xf0]  ;;  %v3022_v5 = vld [vmem:[%s5744_s0 + $0x26c] sm:$0xf0]  ;;  %v2749_v55 = vor.u32 %v3814_v43, %v2748_v42  ;;  %v3822_v43 = vld [vmem:[%s5744_s0 + $0x84] sm:$0xf] }
  0x34   :  { %957 = vmatmul.bf16.gmra.mxu1 %v2745_v50  ;;  %v3910_v50 = vld [vmem:[%s5742_s1 + $0xc0] sm:$0xff]  ;;  %2470 = vmatpush.bf16.msra.mxu0 %v4033_v6  ;;  %v3021_v11 = vor.u32 %v3883_v3, %v3020_v2  ;;  %v3025_v12 = vor.u32 %v3881_v4, %v3022_v5 }
  0x36   :  { %1038 = vmatpush.bf16.msrb.mxu2 %v3904_v18  ;;  %v3807_v18 = vld [vmem:[%s5744_s0 + $0xc] sm:$0xf] }
  0x37   :  { %1127 = vmatpush.bf16.msrb.mxu3 %v3912_v19  ;;  %2208 = vmatpush.bf16.msrb.mxu1 %v4004_v20  ;;  %v2730_v19 = vld [vmem:[%s5744_s0 + $0x1c] sm:$0xf0]  ;;  %v2736_v20 = vld [vmem:[%s5744_s0 + $0x10] sm:$0xf] }
  0x38   :  { %v2733_v25 = vor.u32 %v3807_v18, %v2730_v19  ;;  %v2737_v27 = vor.u32 %v3810_v21, %v2736_v20 }
  0x3a   :  { %1039 = vmatpush.bf16.msrb.mxu2 %v3903_v33 }
  0x3b   :  { %1128 = vmatpush.bf16.msrb.mxu3 %v3911_v34  ;;  %2209 = vmatpush.bf16.msrb.mxu1 %v4003_v36  ;;  %v4024_v34 = vld [vmem:[%s5742_s1 + $0xb0] sm:$0xff] }
  0x3e   :  { %1040 = vmatpush.bf16.msrb.mxu2 %v3902_v49  ;;  %v3815_v49 = vld [vmem:[%s5744_s0 + $0x48] sm:$0xf0] }
  0x3f   :  { %1129 = vmatpush.bf16.msrb.mxu3 %v3910_v50  ;;  %2210 = vmatpush.bf16.msrb.mxu1 %v4002_v51 }
  0x41   :  { %913 = vmatmul.bf16.gmra.mxu2 %v2921_v62  ;;  %873 = vmatmul.bf16.gmra.mxu0 %v2761_v0  ;;  %v2841_v62 = vor.u32 %v3838_v57, %v2840_v56  ;;  %v4017_v0 = vld [vmem:[%s5742_s1 + $0x78] sm:$0xff] }
  0x42   :  { %1002 = vmatmul.bf16.gmra.mxu3 %v2925_v63  ;;  %v2845_v63 = vor.u32 %v3836_v58, %v2842_v59  ;;  %2292 = vmatpush.bf16.msra.mxu2 %v4017_v0 }
  0x44   :  { %962 = vmatmul.bf16.gmra.mxu1 %v2765_v1  ;;  %v4025_v1 = vld [vmem:[%s5742_s1 + $0xb8] sm:$0xff] }
  0x45   :  { %2381 = vmatpush.bf16.msra.mxu3 %v4025_v1 }
  0x49   :  { %2382 = vmatpush.bf16.msra.mxu3 %v4024_v34 }
  0x51   :  { %918 = vmatmul.bf16.gmra.mxu2 %v2941_v14  ;;  %878 = vmatmul.bf16.gmra.mxu0 %v2781_v16  ;;  %v2865_v14 = vor.u32 %v3841_v9, %v2862_v10  ;;  %v2728_v16 = vld [vmem:[%s5744_s0 + $0x8] sm:$0xf]  ;;  %v3819_v9 = vld [vmem:[%s5744_s0 + $0x68] sm:$0xf0]  ;;  %v3817_v10 = vld [vmem:[%s5744_s0 + $0x5c] sm:$0xf] }
  0x52   :  { %1007 = vmatmul.bf16.gmra.mxu3 %v2945_v15  ;;  %v4037_v15 = vld [vmem:[%s5742_s1 + $0x118] sm:$0xff]  ;;  %v2769_v19 = vor.u32 %v3819_v9, %v2768_v7 }
  0x53   :  { %2563 = vmatpush.bf16.msra.mxu1 %v4037_v15 }
  0x54   :  { %967 = vmatmul.bf16.gmra.mxu1 %v2785_v17  ;;  %v3809_v17 = vld [vmem:[%s5744_s0 + $0x18] sm:$0xf0] }
  0x55   :  { %v2729_v24 = vor.u32 %v3809_v17, %v2728_v16  ;;  %v3336_v16 = vld [vmem:[%s5744_s0 + $0x2d0] sm:$0xf]  ;;  %v3934_v17 = vld [vmem:[%s5744_s0 + $0x2e0] sm:$0xf0] }
  0x61   :  { %923 = vmatmul.bf16.gmra.mxu2 %v2961_v29  ;;  %883 = vmatmul.bf16.gmra.mxu0 %v2801_v31  ;;  %v3297_v29 = vor.u32 %v3924_v23, %v3296_v22 }
  0x62   :  { %1012 = vmatmul.bf16.gmra.mxu3 %v2965_v30 }
  0x64   :  { %972 = vmatmul.bf16.gmra.mxu1 %v2805_v32  ;;  %v4016_v32 = vld [vmem:[%s5742_s1 + $0x70] sm:$0xff] }
  0x65   :  { %2293 = vmatpush.bf16.msra.mxu2 %v4016_v32 }
  0x71   :  { %928 = vmatmul.bf16.gmra.mxu2 %v2981_v45  ;;  %888 = vmatmul.bf16.gmra.mxu0 %v2821_v47  ;;  %v3812_v45 = vld [vmem:[%s5744_s0 + $0x34] sm:$0xf] }
  0x72   :  { %1017 = vmatmul.bf16.gmra.mxu3 %v2985_v46  ;;  %v2750_v46 = vld [vmem:[%s5744_s0 + $0x44] sm:$0xf0]  ;;  %v4032_v47 = vld [vmem:[%s5742_s1 + $0xf0] sm:$0xff] }
  0x73   :  { %2471 = vmatpush.bf16.msra.mxu0 %v4032_v47  ;;  %v2753_v56 = vor.u32 %v3812_v45, %v2750_v46  ;;  %v2790_v45 = vld [vmem:[%s5744_s0 + $0x94] sm:$0xf0]  ;;  %v4031_v46 = vld [vmem:[%s5742_s1 + $0xe8] sm:$0xff] }
  0x74   :  { %977 = vmatmul.bf16.gmra.mxu1 %v2825_v48  ;;  %v2756_v48 = vld [vmem:[%s5744_s0 + $0x38] sm:$0xf]  ;;  %v2796_v47 = vld [vmem:[%s5744_s0 + $0x88] sm:$0xf] }
  0x75   :  { %v2757_v57 = vor.u32 %v3815_v49, %v2756_v48  ;;  %v3825_v48 = vld [vmem:[%s5744_s0 + $0x98] sm:$0xf0] }
  0x77   :  { %2472 = vmatpush.bf16.msra.mxu0 %v4031_v46 }
  0x81   :  { %933 = vmatmul.bf16.gmra.mxu2 %v3001_v60  ;;  %893 = vmatmul.bf16.gmra.mxu0 %v2841_v62  ;;  %v3317_v60 = vor.u32 %v3929_v53, %v3316_v52  ;;  %v3939_v52 = vld [vmem:[%s5744_s0 + $0x308] sm:$0xf0] }
  0x82   :  { %1022 = vmatmul.bf16.gmra.mxu3 %v3005_v61 }
  0x84   :  { %982 = vmatmul.bf16.gmra.mxu1 %v2845_v63 }
  0x91   :  { %938 = vmatmul.bf16.gmra.mxu2 %v3021_v11  ;;  %898 = vmatmul.bf16.gmra.mxu0 %v2861_v13  ;;  %v2770_v11 = vld [vmem:[%s5744_s0 + $0x6c] sm:$0xf0]  ;;  %v3820_v13 = vld [vmem:[%s5744_s0 + $0x70] sm:$0xf0] }
  0x92   :  { %1027 = vmatmul.bf16.gmra.mxu3 %v3025_v12  ;;  %v2776_v12 = vld [vmem:[%s5744_s0 + $0x60] sm:$0xf]  ;;  %v2773_v20 = vor.u32 %v3817_v10, %v2770_v11  ;;  %v2808_v11 = vld [vmem:[%s5744_s0 + $0xa8] sm:$0xf] }
  0x93   :  { %v2777_v21 = vor.u32 %v3820_v13, %v2776_v12  ;;  %v3829_v13 = vld [vmem:[%s5744_s0 + $0xb8] sm:$0xf0] }
  0x94   :  { %987 = vmatmul.bf16.gmra.mxu1 %v2865_v14 }
  0x9e   :  { %v864_v28 = vpop.f32.mrf.mxu0 }
  0x9f   :  { %v865_v30 = vadd.f32 %v4439_v26, %v864_v28  ;;  %v4015_v28 = vld [vmem:[%s5742_s1 + $0x68] sm:$0xff] }
  0xa0   :  { %2294 = vmatpush.bf16.msra.mxu2 %v4015_v28 }
  0xa1   :  { %v953_v31 = vpop.f32.mrf.mxu1  ;;  %1041 = vmatmul.bf16.vlgmr.msrb.gmra.mxu2 %v2729_v24  ;;  %3182 = vmatmul.msk.bf16.vlgmr.msrb.gmra.mxu0 %vm806_vm0, %v2737_v27  ;;  %v3337_v24 = vor.u32 %v3934_v17, %v3336_v16  ;;  %v2816_v16 = vld [vmem:[%s5744_s0 + $0xb0] sm:$0xf]  ;;  %v3830_v17 = vld [vmem:[%s5744_s0 + $0xc0] sm:$0xf0] }
  0xa2   :  { %1130 = vmatmul.bf16.vlgmr.msrb.gmra.mxu3 %v2733_v25  ;;  %v4445_v33 = vadd.f32 %v953_v31, %v865_v30  ;;  %v4023_v30 = vld [vmem:[%s5742_s1 + $0xa8] sm:$0xff] }
  0xa3   :  { %2383 = vmatpush.bf16.msra.mxu3 %v4023_v30 }
  0xa4   :  { %2211 = vmatmul.bf16.vlgmr.msrb.gmra.mxu1 %v3297_v29  ;;  %v904_v35 = vpop.f32.mrf.mxu2 }
  0xa5   :  { %v993_v36 = vpop.f32.mrf.mxu3  ;;  %v905_v37 = vadd.f32 %v4439_v26, %v904_v35 }
  0xa6   :  { %v866_v39 = vpop.f32.mrf.mxu0 }
  0xa7   :  { %v4452_v38 = vadd.f32 %v993_v36, %v905_v37  ;;  %v867_v40 = vadd.f32 %v4439_v26, %v866_v39 }
  0xa9   :  { %v955_v41 = vpop.f32.mrf.mxu1 }
  0xaa   :  { %v4461_v44 = vadd.f32 %v955_v41, %v867_v40  ;;  %v2788_v40 = vld [vmem:[%s5744_s0 + $0x80] sm:$0xf]  ;;  %v3824_v41 = vld [vmem:[%s5744_s0 + $0x90] sm:$0xf0] }
  0xac   :  { %v906_v50 = vpop.f32.mrf.mxu2 }
  0xad   :  { %v995_v51 = vpop.f32.mrf.mxu3  ;;  %v907_v54 = vadd.f32 %v4439_v26, %v906_v50 }
  0xae   :  { %v869_v59 = vpop.f32.mrf.mxu0 }
  0xaf   :  { %v4485_v58 = vadd.f32 %v995_v51, %v907_v54  ;;  %v870_v61 = vadd.f32 %v4439_v26, %v869_v59  ;;  %v3356_v51 = vld [vmem:[%s5744_s0 + $0x2f8] sm:$0xf]  ;;  %v2789_v54 = vor.u32 %v3824_v41, %v2788_v40 }
  0xb1   :  { %v958_v62 = vpop.f32.mrf.mxu1  ;;  %1046 = vmatmul.bf16.gmra.mxu2 %v2749_v55  ;;  %3183 = vmatmul.msk.bf16.gmra.mxu0 %vm806_vm0, %v2757_v57  ;;  %v2793_v55 = vor.u32 %v3822_v43, %v2790_v45 }
  0xb2   :  { %1135 = vmatmul.bf16.gmra.mxu3 %v2753_v56  ;;  %v4488_v63 = vadd.f32 %v958_v62, %v870_v61  ;;  %v2797_v56 = vor.u32 %v3825_v48, %v2796_v47  ;;  %v4036_v61 = vld [vmem:[%s5742_s1 + $0x110] sm:$0xff] }
  0xb3   :  { %2564 = vmatpush.bf16.msra.mxu1 %v4036_v61  ;;  %v3396_v61 = vld [vmem:[%s5744_s0 + $0x348] sm:$0xf] }
  0xb4   :  { %2216 = vmatmul.bf16.gmra.mxu1 %v3317_v60  ;;  %v909_v0 = vpop.f32.mrf.mxu2  ;;  %v3357_v60 = vor.u32 %v3939_v52, %v3356_v51  ;;  %v3832_v52 = vld [vmem:[%s5744_s0 + $0xd4] sm:$0xf] }
  0xb5   :  { %v998_v1 = vpop.f32.mrf.mxu3  ;;  %v910_v2 = vadd.f32 %v4439_v26, %v909_v0 }
  0xb6   :  { %v871_v4 = vpop.f32.mrf.mxu0 }
  0xb7   :  { %v4492_v3 = vadd.f32 %v998_v1, %v910_v2  ;;  %v872_v5 = vadd.f32 %v4439_v26, %v871_v4 }
  0xb9   :  { %v960_v6 = vpop.f32.mrf.mxu1 }
  0xba   :  { %v4498_v8 = vadd.f32 %v960_v6, %v872_v5 }
  0xbc   :  { %v911_v14 = vpop.f32.mrf.mxu2 }
  0xbd   :  { %v1000_v15 = vpop.f32.mrf.mxu3  ;;  %v912_v18 = vadd.f32 %v4439_v26, %v911_v14  ;;  %v3827_v14 = vld [vmem:[%s5744_s0 + $0xac] sm:$0xf] }
  0xbe   :  { %v874_v23 = vpop.f32.mrf.mxu0 }
  0xbf   :  { %v4522_v22 = vadd.f32 %v1000_v15, %v912_v18  ;;  %v875_v25 = vadd.f32 %v4439_v26, %v874_v23  ;;  %v2810_v15 = vld [vmem:[%s5744_s0 + $0xbc] sm:$0xf0] }
  0xc1   :  { %v963_v27 = vpop.f32.mrf.mxu1  ;;  %1051 = vmatmul.bf16.gmra.mxu2 %v2769_v19  ;;  %3184 = vmatmul.msk.bf16.gmra.mxu0 %vm806_vm0, %v2777_v21  ;;  %v3944_v21 = vld [vmem:[%s5744_s0 + $0x330] sm:$0xf0] }
  0xc2   :  { %1140 = vmatmul.bf16.gmra.mxu3 %v2773_v20  ;;  %v4528_v29 = vadd.f32 %v963_v27, %v875_v25  ;;  %v3376_v20 = vld [vmem:[%s5744_s0 + $0x320] sm:$0xf]  ;;  %v2813_v25 = vor.u32 %v3827_v14, %v2810_v15  ;;  %v2817_v27 = vor.u32 %v3830_v17, %v2816_v16 }
  0xc4   :  { %2221 = vmatmul.bf16.gmra.mxu1 %v3337_v24  ;;  %v914_v31 = vpop.f32.mrf.mxu2  ;;  %v2809_v24 = vor.u32 %v3829_v13, %v2808_v11 }
  0xc5   :  { %v1003_v32 = vpop.f32.mrf.mxu3  ;;  %v915_v34 = vadd.f32 %v4439_v26, %v914_v31  ;;  %v3377_v31 = vor.u32 %v3944_v21, %v3376_v20 }
  0xc6   :  { %v876_v36 = vpop.f32.mrf.mxu0 }
  0xc7   :  { %v4535_v35 = vadd.f32 %v1003_v32, %v915_v34  ;;  %v877_v37 = vadd.f32 %v4439_v26, %v876_v36  ;;  %v4014_v36 = vld [vmem:[%s5742_s1 + $0x60] sm:$0xff] }
  0xc8   :  { %2295 = vmatpush.bf16.msra.mxu2 %v4014_v36 }
  0xc9   :  { %v965_v39 = vpop.f32.mrf.mxu1 }
  0xca   :  { %v4544_v42 = vadd.f32 %v965_v39, %v877_v37  ;;  %v4022_v39 = vld [vmem:[%s5742_s1 + $0xa0] sm:$0xff] }
  0xcb   :  { %2384 = vmatpush.bf16.msra.mxu3 %v4022_v39  ;;  %v3416_v39 = vld [vmem:[%s5744_s0 + $0x370] sm:$0xf] }
  0xcc   :  { %v916_v49 = vpop.f32.mrf.mxu2 }
  0xcd   :  { %v1005_v50 = vpop.f32.mrf.mxu3  ;;  %v917_v53 = vadd.f32 %v4439_v26, %v916_v49  ;;  %v2828_v49 = vld [vmem:[%s5744_s0 + $0xd0] sm:$0xf] }
  0xce   :  { %v879_v59 = vpop.f32.mrf.mxu0 }
  0xcf   :  { %v4568_v57 = vadd.f32 %v1005_v50, %v917_v53  ;;  %v880_v62 = vadd.f32 %v4439_v26, %v879_v59  ;;  %v3834_v50 = vld [vmem:[%s5744_s0 + $0xe0] sm:$0xf0]  ;;  %v2830_v53 = vld [vmem:[%s5744_s0 + $0xe4] sm:$0xf0] }
  0xd1   :  { %v968_v0 = vpop.f32.mrf.mxu1  ;;  %1056 = vmatmul.bf16.gmra.mxu2 %v2789_v54  ;;  %3185 = vmatmul.msk.bf16.gmra.mxu0 %vm806_vm0, %v2797_v56  ;;  %v4030_v54 = vld [vmem:[%s5742_s1 + $0xe0] sm:$0xff]  ;;  %v3835_v56 = vld [vmem:[%s5744_s0 + $0xe8] sm:$0xf0] }
  0xd2   :  { %1145 = vmatmul.bf16.gmra.mxu3 %v2793_v55  ;;  %v4574_v1 = vadd.f32 %v968_v0, %v880_v62  ;;  %v2836_v55 = vld [vmem:[%s5744_s0 + $0xd8] sm:$0xf]  ;;  %v3949_v62 = vld [vmem:[%s5744_s0 + $0x358] sm:$0xf0]  ;;  %2473 = vmatpush.bf16.msra.mxu0 %v4030_v54 }
  0xd3   :  { %v4013_v54 = vld [vmem:[%s5742_s1 + $0x58] sm:$0xff] }
  0xd4   :  { %2226 = vmatmul.bf16.gmra.mxu1 %v3357_v60  ;;  %v919_v2 = vpop.f32.mrf.mxu2  ;;  %2296 = vmatpush.bf16.msra.mxu2 %v4013_v54 }
  0xd5   :  { %v1008_v4 = vpop.f32.mrf.mxu3  ;;  %v920_v5 = vadd.f32 %v4439_v26, %v919_v2  ;;  %v2829_v2 = vor.u32 %v3834_v50, %v2828_v49 }
  0xd6   :  { %v881_v7 = vpop.f32.mrf.mxu0 }
  0xd7   :  { %v4578_v6 = vadd.f32 %v1008_v4, %v920_v5  ;;  %v882_v9 = vadd.f32 %v4439_v26, %v881_v7  ;;  %v2833_v4 = vor.u32 %v3832_v52, %v2830_v53  ;;  %v2837_v5 = vor.u32 %v3835_v56, %v2836_v55  ;;  %v4021_v56 = vld [vmem:[%s5742_s1 + $0x98] sm:$0xff] }
  0xd8   :  { %2385 = vmatpush.bf16.msra.mxu3 %v4021_v56  ;;  %v2888_v56 = vld [vmem:[%s5744_s0 + $0x148] sm:$0xf] }
  0xd9   :  { %v970_v10 = vpop.f32.mrf.mxu1 }
  0xda   :  { %v4584_v12 = vadd.f32 %v970_v10, %v882_v9  ;;  %v3397_v10 = vor.u32 %v3949_v62, %v3396_v61 }
  0xdc   :  { %v921_v18 = vpop.f32.mrf.mxu2 }
  0xdd   :  { %v1010_v19 = vpop.f32.mrf.mxu3  ;;  %v922_v23 = vadd.f32 %v4439_v26, %v921_v18 }
  0xde   :  { %v884_v30 = vpop.f32.mrf.mxu0 }
  0xdf   :  { %v4608_v28 = vadd.f32 %v1010_v19, %v922_v23  ;;  %v885_v32 = vadd.f32 %v4439_v26, %v884_v30  ;;  %v2848_v23 = vld [vmem:[%s5744_s0 + $0xf8] sm:$0xf]  ;;  %v2850_v30 = vld [vmem:[%s5744_s0 + $0x10c] sm:$0xf0] }
  0xe1   :  { %v973_v34 = vpop.f32.mrf.mxu1  ;;  %1061 = vmatmul.bf16.gmra.mxu2 %v2809_v24  ;;  %3186 = vmatmul.msk.bf16.gmra.mxu0 %vm806_vm0, %v2817_v27  ;;  %v3837_v27 = vld [vmem:[%s5744_s0 + $0xfc] sm:$0xf] }
  0xe2   :  { %1150 = vmatmul.bf16.gmra.mxu3 %v2813_v25  ;;  %v4614_v37 = vadd.f32 %v973_v34, %v885_v32  ;;  %v3839_v25 = vld [vmem:[%s5744_s0 + $0x108] sm:$0xf0]  ;;  %v3840_v32 = vld [vmem:[%s5744_s0 + $0x110] sm:$0xf0] }
  0xe4   :  { %2231 = vmatmul.bf16.gmra.mxu1 %v3377_v31  ;;  %v924_v40 = vpop.f32.mrf.mxu2  ;;  %v2856_v31 = vld [vmem:[%s5744_s0 + $0x100] sm:$0xf] }
  0xe5   :  { %v1013_v41 = vpop.f32.mrf.mxu3  ;;  %v925_v43 = vadd.f32 %v4439_v26, %v924_v40  ;;  %v3954_v40 = vld [vmem:[%s5744_s0 + $0x380] sm:$0xf0] }
  0xe6   :  { %v886_v46 = vpop.f32.mrf.mxu0  ;;  %v3417_v50 = vor.u32 %v3954_v40, %v3416_v39 }
  0xe7   :  { %v4621_v45 = vadd.f32 %v1013_v41, %v925_v43  ;;  %v887_v47 = vadd.f32 %v4439_v26, %v886_v46  ;;  %v2849_v43 = vor.u32 %v3839_v25, %v2848_v23  ;;  %v2853_v46 = vor.u32 %v3837_v27, %v2850_v30  ;;  %v4029_v30 = vld [vmem:[%s5742_s1 + $0xd8] sm:$0xff] }
  0xe8   :  { %2474 = vmatpush.bf16.msra.mxu0 %v4029_v30 }
  0xe9   :  { %v975_v48 = vpop.f32.mrf.mxu1 }
  0xea   :  { %v4630_v51 = vadd.f32 %v975_v48, %v887_v47  ;;  %v2857_v47 = vor.u32 %v3840_v32, %v2856_v31 }
  0xec   :  { %v926_v59 = vpop.f32.mrf.mxu2 }
  0xed   :  { %v1015_v60 = vpop.f32.mrf.mxu3  ;;  %v927_v0 = vadd.f32 %v4439_v26, %v926_v59 }
  0xee   :  { %v889_v9 = vpop.f32.mrf.mxu0 }
  0xef   :  { %v4654_v7 = vadd.f32 %v1015_v60, %v927_v0  ;;  %v890_v11 = vadd.f32 %v4439_v26, %v889_v9 }
  0xf1   :  { %v978_v13 = vpop.f32.mrf.mxu1  ;;  %1066 = vmatmul.bf16.gmra.mxu2 %v2829_v2  ;;  %3187 = vmatmul.msk.bf16.gmra.mxu0 %vm806_vm0, %v2837_v5  ;;  %v2868_v5 = vld [vmem:[%s5744_s0 + $0x120] sm:$0xf] }
  0xf2   :  { %1155 = vmatmul.bf16.gmra.mxu3 %v2833_v4  ;;  %v4657_v14 = vadd.f32 %v978_v13, %v890_v11  ;;  %v3842_v11 = vld [vmem:[%s5744_s0 + $0x124] sm:$0xf]  ;;  %v2870_v13 = vld [vmem:[%s5744_s0 + $0x134] sm:$0xf0] }
  0xf3   :  { %v2873_v27 = vor.u32 %v3842_v11, %v2870_v13  ;;  %v3456_v11 = vld [vmem:[%s5744_s0 + $0x3c0] sm:$0xf]  ;;  %v3964_v13 = vld [vmem:[%s5744_s0 + $0x3d0] sm:$0xf0] }
  0xf4   :  { %2236 = vmatmul.bf16.gmra.mxu1 %v3397_v10  ;;  %v929_v15 = vpop.f32.mrf.mxu2  ;;  %v3844_v10 = vld [vmem:[%s5744_s0 + $0x130] sm:$0xf0] }
  0xf5   :  { %v1018_v16 = vpop.f32.mrf.mxu3  ;;  %v930_v17 = vadd.f32 %v4439_v26, %v929_v15  ;;  %v2876_v15 = vld [vmem:[%s5744_s0 + $0x128] sm:$0xf]  ;;  %v2869_v25 = vor.u32 %v3844_v10, %v2868_v5 }
  0xf6   :  { %v891_v19 = vpop.f32.mrf.mxu0 }
  0xf7   :  { %v4661_v18 = vadd.f32 %v1018_v16, %v930_v17  ;;  %v892_v20 = vadd.f32 %v4439_v26, %v891_v19  ;;  %v3845_v16 = vld [vmem:[%s5744_s0 + $0x138] sm:$0xf0] }
  0xf8   :  { %v2877_v31 = vor.u32 %v3845_v16, %v2876_v15 }
  0xf9   :  { %v980_v21 = vpop.f32.mrf.mxu1 }
  0xfa   :  { %v4667_v24 = vadd.f32 %v980_v21, %v892_v20  ;;  %v3436_v20 = vld [vmem:[%s5744_s0 + $0x398] sm:$0xf]  ;;  %v3959_v21 = vld [vmem:[%s5744_s0 + $0x3a8] sm:$0xf0] }
  0xfc   :  { %v931_v34 = vpop.f32.mrf.mxu2 }
  0xfd   :  { %v1020_v36 = vpop.f32.mrf.mxu3  ;;  %v932_v41 = vadd.f32 %v4439_v26, %v931_v34 }
  0xfe   :  { %v894_v49 = vpop.f32.mrf.mxu0 }
  0xff   :  { %v4691_v48 = vadd.f32 %v1020_v36, %v932_v41  ;;  %v895_v52 = vadd.f32 %v4439_v26, %v894_v49  ;;  %v3437_v36 = vor.u32 %v3959_v21, %v3436_v20  ;;  %v4035_v49 = vld [vmem:[%s5742_s1 + $0x108] sm:$0xff] }
 0x100   :  { %2565 = vmatpush.bf16.msra.mxu1 %v4035_v49  ;;  %v2910_v49 = vld [vmem:[%s5744_s0 + $0x184] sm:$0xf0] }
 0x101   :  { %v983_v53 = vpop.f32.mrf.mxu1  ;;  %1071 = vmatmul.bf16.gmra.mxu2 %v2849_v43  ;;  %3188 = vmatmul.msk.bf16.gmra.mxu0 %vm806_vm0, %v2857_v47 }
 0x102   :  { %1160 = vmatmul.bf16.gmra.mxu3 %v2853_v46  ;;  %v4697_v55 = vadd.f32 %v983_v53, %v895_v52 }
 0x104   :  { %2241 = vmatmul.bf16.gmra.mxu1 %v3417_v50  ;;  %v934_v59 = vpop.f32.mrf.mxu2 }
 0x105   :  { %v1023_v60 = vpop.f32.mrf.mxu3  ;;  %v935_v61 = vadd.f32 %v4439_v26, %v934_v59 }
 0x106   :  { %v896_v0 = vpop.f32.mrf.mxu0 }
 0x107   :  { %v4704_v62 = vadd.f32 %v1023_v60, %v935_v61  ;;  %v897_v2 = vadd.f32 %v4439_v26, %v896_v0  ;;  %v3849_v60 = vld [vmem:[%s5744_s0 + $0x158] sm:$0xf0]  ;;  %v3847_v61 = vld [vmem:[%s5744_s0 + $0x14c] sm:$0xf]  ;;  %v2890_v0 = vld [vmem:[%s5744_s0 + $0x15c] sm:$0xf0] }
 0x108   :  { %v2889_v16 = vor.u32 %v3849_v60, %v2888_v56 }
 0x109   :  { %v985_v4 = vpop.f32.mrf.mxu1 }
 0x10a   :  { %v4710_v9 = vadd.f32 %v985_v4, %v897_v2  ;;  %v2896_v2 = vld [vmem:[%s5744_s0 + $0x150] sm:$0xf]  ;;  %v3850_v4 = vld [vmem:[%s5744_s0 + $0x160] sm:$0xf0] }
 0x10c   :  { %v936_v17 = vpop.f32.mrf.mxu2 }
 0x10d   :  { %v1025_v19 = vpop.f32.mrf.mxu3  ;;  %v937_v23 = vadd.f32 %v4439_v26, %v936_v17  ;;  %v2893_v17 = vor.u32 %v3847_v61, %v2890_v0  ;;  %v3476_v61 = vld [vmem:[%s5744_s0 + $0x3e8] sm:$0xf]  ;;  %v3969_v0 = vld [vmem:[%s5744_s0 + $0x3f8] sm:$0xf0] }
 0x10e   :  { %v899_v34 = vpop.f32.mrf.mxu0 }
 0x10f   :  { %v4737_v32 = vadd.f32 %v1025_v19, %v937_v23  ;;  %v900_v39 = vadd.f32 %v4439_v26, %v899_v34  ;;  %v2897_v19 = vor.u32 %v3850_v4, %v2896_v2  ;;  %v3457_v23 = vor.u32 %v3964_v13, %v3456_v11  ;;  %v4020_v34 = vld [vmem:[%s5742_s1 + $0x90] sm:$0xff] }
 0x110   :  { %2386 = vmatpush.bf16.msra.mxu3 %v4020_v34 }
 0x111   :  { %v988_v40 = vpop.f32.mrf.mxu1  ;;  %1076 = vmatmul.bf16.gmra.mxu2 %v2869_v25  ;;  %3189 = vmatmul.msk.bf16.gmra.mxu0 %vm806_vm0, %v2877_v31 }
 0x112   :  { %1165 = vmatmul.bf16.gmra.mxu3 %v2873_v27  ;;  %v4740_v41 = vadd.f32 %v988_v40, %v900_v39 }
 0x114   :  { %2246 = vmatmul.bf16.gmra.mxu1 %v3437_v36  ;;  %v939_v43 = vpop.f32.mrf.mxu2 }
 0x115   :  { %v1028_v46 = vpop.f32.mrf.mxu3  ;;  %v940_v47 = vadd.f32 %v4439_v26, %v939_v43 }
 0x116   :  { %v901_v52 = vpop.f32.mrf.mxu0 }
 0x117   :  { %v4747_v50 = vadd.f32 %v1028_v46, %v940_v47  ;;  %v902_v53 = vadd.f32 %v4439_v26, %v901_v52  ;;  %v2908_v46 = vld [vmem:[%s5744_s0 + $0x170] sm:$0xf]  ;;  %v3852_v47 = vld [vmem:[%s5744_s0 + $0x174] sm:$0xf] }
 0x119   :  { %v990_v54 = vpop.f32.mrf.mxu1 }
 0x11a   :  { %v4753_v59 = vadd.f32 %v990_v54, %v902_v53  ;;  %v2916_v53 = vld [vmem:[%s5744_s0 + $0x178] sm:$0xf]  ;;  %v3855_v54 = vld [vmem:[%s5744_s0 + $0x188] sm:$0xf0] }
 0x11b   :  { %v2917_v11 = vor.u32 %v3855_v54, %v2916_v53  ;;  %v3496_v53 = vld [vmem:[%s5744_s0 + $0x410] sm:$0xf]  ;;  %v3974_v54 = vld [vmem:[%s5744_s0 + $0x420] sm:$0xf0] }
 0x11c   :  { %v941_v5 = vpop.f32.mrf.mxu2 }
 0x11d   :  { %v1030_v10 = vpop.f32.mrf.mxu3  ;;  %v942_v15 = vadd.f32 %v4439_v26, %v941_v5  ;;  %v4012_v26 = vld [vmem:[%s5742_s1 + $0x50] sm:$0xff]  ;;  %v2913_v5 = vor.u32 %v3852_v47, %v2910_v49 }
 0x11e   :  { %v1220_v21 = vpop.f32.mrf.mxu0  ;;  %2297 = vmatpush.bf16.msra.mxu2 %v4012_v26  ;;  %v3860_v47 = vld [vmem:[%s5744_s0 + $0x1b0] sm:$0xf0] }
 0x11f   :  { %v4777_v20 = vadd.f32 %v1030_v10, %v942_v15  ;;  %v4028_v10 = vld [vmem:[%s5742_s1 + $0xd0] sm:$0xff] }
 0x120   :  { %2475 = vmatpush.bf16.msra.mxu0 %v4028_v10 }
 0x121   :  { %v4779_v25 = vpop.f32.mrf.mxu1  ;;  %1081 = vmatmul.bf16.gmra.mxu2 %v2889_v16  ;;  %3190 = vmatmul.msk.bf16.gmra.mxu0 %vm806_vm0, %v2897_v19  ;;  %v3477_v16 = vor.u32 %v3969_v0, %v3476_v61 }
 0x122   :  { %1170 = vmatmul.bf16.gmra.mxu3 %v2893_v17 }
 0x124   :  { %2251 = vmatmul.bf16.gmra.mxu1 %v3457_v23  ;;  %v1042_v27 = vpop.f32.mrf.mxu2 }
 0x125   :  { %v1131_v30 = vpop.f32.mrf.mxu3  ;;  %v1043_v31 = vadd.f32 %v1042_v27, %v4445_v33  ;;  %v3854_v33 = vld [vmem:[%s5744_s0 + $0x180] sm:$0xf0] }
 0x126   :  { %v1222_v39 = vpop.f32.mrf.mxu0  ;;  %v2909_v4 = vor.u32 %v3854_v33, %v2908_v46  ;;  %v2936_v33 = vld [vmem:[%s5744_s0 + $0x1a0] sm:$0xf] }
 0x127   :  { %v1132_v36 = vadd.f32 %v1131_v30, %v1043_v31  ;;  %v2937_v0 = vor.u32 %v3860_v47, %v2936_v33  ;;  %v3516_v47 = vld [vmem:[%s5744_s0 + $0x438] sm:$0xf] }
 0x129   :  { %v4789_v40 = vpop.f32.mrf.mxu1  ;;  %v1221_v43 = vadd.f32 %v1220_v21, %v1132_v36  ;;  %v2928_v36 = vld [vmem:[%s5744_s0 + $0x198] sm:$0xf] }
 0x12b   :  { %v1300_v52 = vmax.f32 %v1221_v43, 0.0  ;;  %v3857_v43 = vld [vmem:[%s5744_s0 + $0x19c] sm:$0xf] }
 0x12c   :  { %v1044_v56 = vpop.f32.mrf.mxu2 }
 0x12d   :  { %v1133_v60 = vpop.f32.mrf.mxu3  ;;  %1332 = vst [vmem:[%s5745_s3] sm:$0xff] %v1300_v52  ;;  %v1045_v2 = vadd.f32 %v1044_v56, %v4461_v44 }
 0x12e   :  { %v1225_v15 = vpop.f32.mrf.mxu0 }
 0x12f   :  { %v1134_v13 = vadd.f32 %v1133_v60, %v1045_v2 }
 0x131   :  { %v4822_v17 = vpop.f32.mrf.mxu1  ;;  %v1223_v19 = vadd.f32 %v1222_v39, %v1134_v13  ;;  %1086 = vmatmul.bf16.gmra.mxu2 %v2909_v4  ;;  %3191 = vmatmul.msk.bf16.gmra.mxu0 %vm806_vm0, %v2917_v11  ;;  %v3859_v39 = vld [vmem:[%s5744_s0 + $0x1a8] sm:$0xf0] }
 0x132   :  { %1175 = vmatmul.bf16.gmra.mxu3 %v2913_v5  ;;  %v2929_v60 = vor.u32 %v3859_v39, %v2928_v36  ;;  %v3497_v5 = vor.u32 %v3974_v54, %v3496_v53  ;;  %v2950_v36 = vld [vmem:[%s5744_s0 + $0x1d4] sm:$0xf0] }
 0x133   :  { %v1301_v21 = vmax.f32 %v1223_v19, 0.0  ;;  %v4011_v19 = vld [vmem:[%s5742_s1 + $0x48] sm:$0xff] }
 0x134   :  { %2256 = vmatmul.bf16.gmra.mxu1 %v3477_v16  ;;  %v1047_v44 = vpop.f32.mrf.mxu2  ;;  %2298 = vmatpush.bf16.msra.mxu2 %v4011_v19 }
 0x135   :  { %v1136_v23 = vpop.f32.mrf.mxu3  ;;  %1333 = vst [vmem:[%s5745_s3 + $0x8] sm:$0xff] %v1301_v21  ;;  %v1048_v27 = vadd.f32 %v1047_v44, %v4488_v63  ;;  %v2930_v63 = vld [vmem:[%s5744_s0 + $0x1ac] sm:$0xf0]  ;;  %v4019_v21 = vld [vmem:[%s5742_s1 + $0x88] sm:$0xff] }
 0x136   :  { %v1227_v31 = vpop.f32.mrf.mxu0  ;;  %v2933_v61 = vor.u32 %v3857_v43, %v2930_v63  ;;  %2387 = vmatpush.bf16.msra.mxu3 %v4019_v21  ;;  %v2956_v43 = vld [vmem:[%s5744_s0 + $0x1c8] sm:$0xf]  ;;  %v3865_v63 = vld [vmem:[%s5744_s0 + $0x1d8] sm:$0xf0] }
 0x137   :  { %v1137_v30 = vadd.f32 %v1136_v23, %v1048_v27 }
 0x139   :  { %v4829_v26 = vpop.f32.mrf.mxu1  ;;  %v1226_v34 = vadd.f32 %v1225_v15, %v1137_v30 }
 0x13b   :  { %v1302_v46 = vmax.f32 %v1226_v34, 0.0  ;;  %v3862_v34 = vld [vmem:[%s5744_s0 + $0x1c4] sm:$0xf] }
 0x13c   :  { %v1049_v49 = vpop.f32.mrf.mxu2  ;;  %v2953_v54 = vor.u32 %v3862_v34, %v2950_v36  ;;  %v2976_v34 = vld [vmem:[%s5744_s0 + $0x1f0] sm:$0xf]  ;;  %v3870_v36 = vld [vmem:[%s5744_s0 + $0x200] sm:$0xf0] }
 0x13d   :  { %v1138_v52 = vpop.f32.mrf.mxu3  ;;  %1334 = vst [vmem:[%s5745_s3 + $0x10] sm:$0xff] %v1302_v46  ;;  %v1050_v56 = vadd.f32 %v1049_v49, %v4498_v8  ;;  %v3979_v49 = vld [vmem:[%s5744_s0 + $0x448] sm:$0xf0] }
 0x13e   :  { %v1230_v4 = vpop.f32.mrf.mxu0 }
 0x13f   :  { %v1139_v2 = vadd.f32 %v1138_v52, %v1050_v56  ;;  %v4027_v56 = vld [vmem:[%s5742_s1 + $0xc8] sm:$0xff] }
 0x140   :  { %2476 = vmatpush.bf16.msra.mxu0 %v4027_v56 }
 0x141   :  { %v4859_v10 = vpop.f32.mrf.mxu1  ;;  %v1228_v11 = vadd.f32 %v1227_v31, %v1139_v2  ;;  %1091 = vmatmul.bf16.gmra.mxu2 %v2929_v60  ;;  %3192 = vmatmul.msk.bf16.gmra.mxu0 %vm806_vm0, %v2937_v0  ;;  %v2948_v31 = vld [vmem:[%s5744_s0 + $0x1c0] sm:$0xf]  ;;  %v2957_v60 = vor.u32 %v3865_v63, %v2956_v43  ;;  %v3517_v2 = vor.u32 %v3979_v49, %v3516_v47 }
 0x142   :  { %1180 = vmatmul.bf16.gmra.mxu3 %v2933_v61  ;;  %v3536_v63 = vld [vmem:[%s5744_s0 + $0x460] sm:$0xf] }
 0x143   :  { %v1303_v13 = vmax.f32 %v1228_v11, 0.0 }
 0x144   :  { %2261 = vmatmul.bf16.gmra.mxu1 %v3497_v5  ;;  %v1052_v15 = vpop.f32.mrf.mxu2 }
 0x145   :  { %v1141_v16 = vpop.f32.mrf.mxu3  ;;  %1335 = vst [vmem:[%s5745_s3 + $0x18] sm:$0xff] %v1303_v13  ;;  %v1053_v8 = vadd.f32 %v1052_v15, %v4528_v29  ;;  %v3864_v29 = vld [vmem:[%s5744_s0 + $0x1d0] sm:$0xf0] }
 0x146   :  { %v1232_v23 = vpop.f32.mrf.mxu0  ;;  %v2949_v53 = vor.u32 %v3864_v29, %v2948_v31  ;;  %v2970_v31 = vld [vmem:[%s5744_s0 + $0x1fc] sm:$0xf0] }
 0x147   :  { %v1142_v44 = vadd.f32 %v1141_v16, %v1053_v8  ;;  %v4034_v16 = vld [vmem:[%s5742_s1 + $0x100] sm:$0xff] }
 0x148   :  { %2566 = vmatpush.bf16.msra.mxu1 %v4034_v16 }
 0x149   :  { %v4872_v27 = vpop.f32.mrf.mxu1  ;;  %v1231_v30 = vadd.f32 %v1230_v4, %v1142_v44 }
 0x14b   :  { %v1304_v39 = vmax.f32 %v1231_v30, 0.0  ;;  %v3869_v30 = vld [vmem:[%s5744_s0 + $0x1f8] sm:$0xf0] }
 0x14c   :  { %v1054_v46 = vpop.f32.mrf.mxu2 }
 0x14d   :  { %v1143_v33 = vpop.f32.mrf.mxu3  ;;  %1336 = vst [vmem:[%s5745_s3 + $0x20] sm:$0xff] %v1304_v39  ;;  %v1055_v52 = vadd.f32 %v1054_v46, %v4544_v42  ;;  %v3984_v46 = vld [vmem:[%s5744_s0 + $0x470] sm:$0xf0] }
 0x14e   :  { %v1235_v0 = vpop.f32.mrf.mxu0  ;;  %v3537_v56 = vor.u32 %v3984_v46, %v3536_v63 }
 0x14f   :  { %v1144_v61 = vadd.f32 %v1143_v33, %v1055_v52  ;;  %v2977_v52 = vor.u32 %v3870_v36, %v2976_v34  ;;  %v3556_v36 = vld [vmem:[%s5744_s0 + $0x488] sm:$0xf] }
 0x151   :  { %v4905_v4 = vpop.f32.mrf.mxu1  ;;  %v1233_v5 = vadd.f32 %v1232_v23, %v1144_v61  ;;  %1096 = vmatmul.bf16.gmra.mxu2 %v2949_v53  ;;  %3193 = vmatmul.msk.bf16.gmra.mxu0 %vm806_vm0, %v2957_v60  ;;  %v2968_v23 = vld [vmem:[%s5744_s0 + $0x1e8] sm:$0xf] }
 0x152   :  { %1185 = vmatmul.bf16.gmra.mxu3 %v2953_v54  ;;  %v2969_v47 = vor.u32 %v3869_v30, %v2968_v23  ;;  %v2990_v23 = vld [vmem:[%s5744_s0 + $0x224] sm:$0xf0] }
 0x153   :  { %v1305_v11 = vmax.f32 %v1233_v5, 0.0 }
 0x154   :  { %2266 = vmatmul.bf16.gmra.mxu1 %v3517_v2  ;;  %v1057_v42 = vpop.f32.mrf.mxu2 }
 0x155   :  { %v1146_v13 = vpop.f32.mrf.mxu3  ;;  %1337 = vst [vmem:[%s5745_s3 + $0x28] sm:$0xff] %v1305_v11  ;;  %v1058_v15 = vadd.f32 %v1057_v42, %v4574_v1  ;;  %v3867_v1 = vld [vmem:[%s5744_s0 + $0x1ec] sm:$0xf]  ;;  %v4010_v11 = vld [vmem:[%s5742_s1 + $0x40] sm:$0xff] }
 0x156   :  { %v1237_v19 = vpop.f32.mrf.mxu0  ;;  %v2973_v49 = vor.u32 %v3867_v1, %v2970_v31  ;;  %v4018_v42 = vld [vmem:[%s5742_s1 + $0x80] sm:$0xff]  ;;  %2299 = vmatpush.bf16.msra.mxu2 %v4010_v11  ;;  %v2996_v1 = vld [vmem:[%s5744_s0 + $0x218] sm:$0xf]  ;;  %v3875_v31 = vld [vmem:[%s5744_s0 + $0x228] sm:$0xf0] }
 0x157   :  { %v1147_v8 = vadd.f32 %v1146_v13, %v1058_v15  ;;  %2388 = vmatpush.bf16.msra.mxu3 %v4018_v42 }
 0x159   :  { %v4915_v21 = vpop.f32.mrf.mxu1  ;;  %v1236_v44 = vadd.f32 %v1235_v0, %v1147_v8 }
 0x15b   :  { %v1306_v29 = vmax.f32 %v1236_v44, 0.0  ;;  %v3872_v44 = vld [vmem:[%s5744_s0 + $0x214] sm:$0xf] }
 0x15c   :  { %v1059_v39 = vpop.f32.mrf.mxu2  ;;  %v2993_v46 = vor.u32 %v3872_v44, %v2990_v23  ;;  %v3880_v44 = vld [vmem:[%s5744_s0 + $0x250] sm:$0xf0] }
 0x15d   :  { %v1148_v43 = vpop.f32.mrf.mxu3  ;;  %1338 = vst [vmem:[%s5745_s3 + $0x30] sm:$0xff] %v1306_v29  ;;  %v1060_v33 = vadd.f32 %v1059_v39, %v4584_v12  ;;  %v3989_v39 = vld [vmem:[%s5744_s0 + $0x498] sm:$0xf0] }
 0x15e   :  { %v1240_v54 = vpop.f32.mrf.mxu0 }
 0x15f   :  { %v1149_v53 = vadd.f32 %v1148_v43, %v1060_v33  ;;  %v4026_v33 = vld [vmem:[%s5742_s1 + $0xc0] sm:$0xff] }
 0x160   :  { %2477 = vmatpush.bf16.msra.mxu0 %v4026_v33 }
 0x161   :  { %v4945_v60 = vpop.f32.mrf.mxu1  ;;  %v1238_v61 = vadd.f32 %v1237_v19, %v1149_v53  ;;  %1101 = vmatmul.bf16.gmra.mxu2 %v2969_v47  ;;  %3194 = vmatmul.msk.bf16.gmra.mxu0 %vm806_vm0, %v2977_v52  ;;  %v2988_v19 = vld [vmem:[%s5744_s0 + $0x210] sm:$0xf]  ;;  %v2997_v47 = vor.u32 %v3875_v31, %v2996_v1  ;;  %v3557_v53 = vor.u32 %v3989_v39, %v3556_v36  ;;  %v3994_v31 = vld [vmem:[%s5744_s0 + $0x4c0] sm:$0xf0] }
 0x162   :  { %1190 = vmatmul.bf16.gmra.mxu3 %v2973_v49  ;;  %v3576_v1 = vld [vmem:[%s5744_s0 + $0x4b0] sm:$0xf] }
 0x163   :  { %v1307_v0 = vmax.f32 %v1238_v61, 0.0 }
 0x164   :  { %2271 = vmatmul.bf16.gmra.mxu1 %v3537_v56  ;;  %v1062_v2 = vpop.f32.mrf.mxu2 }
 0x165   :  { %v1151_v5 = vpop.f32.mrf.mxu3  ;;  %1339 = vst [vmem:[%s5745_s3 + $0x38] sm:$0xff] %v1307_v0  ;;  %v1063_v12 = vadd.f32 %v1062_v2, %v4614_v37  ;;  %v3874_v37 = vld [vmem:[%s5744_s0 + $0x220] sm:$0xf0] }
 0x166   :  { %v1242_v15 = vpop.f32.mrf.mxu0  ;;  %v2989_v63 = vor.u32 %v3874_v37, %v2988_v19  ;;  %v3016_v37 = vld [vmem:[%s5744_s0 + $0x240] sm:$0xf] }
 0x167   :  { %v1152_v13 = vadd.f32 %v1151_v5, %v1063_v12  ;;  %v3017_v39 = vor.u32 %v3880_v44, %v3016_v37  ;;  %v3999_v37 = vld [vmem:[%s5744_s0 + $0x4e8] sm:$0xf0] }
 0x169   :  { %v4958_v16 = vpop.f32.mrf.mxu1  ;;  %v1241_v8 = vadd.f32 %v1240_v54, %v1152_v13  ;;  %v3008_v13 = vld [vmem:[%s5744_s0 + $0x238] sm:$0xf] }
 0x16b   :  { %v1308_v30 = vmax.f32 %v1241_v8, 0.0  ;;  %v3877_v8 = vld [vmem:[%s5744_s0 + $0x23c] sm:$0xf] }
 0x16c   :  { %v1064_v29 = vpop.f32.mrf.mxu2 }
 0x16d   :  { %v1153_v34 = vpop.f32.mrf.mxu3  ;;  %1340 = vst [vmem:[%s5745_s3 + $0x40] sm:$0xff] %v1308_v30  ;;  %v1065_v43 = vadd.f32 %v1064_v29, %v4630_v51 }
 0x16e   :  { %v1245_v52 = vpop.f32.mrf.mxu0 }
 0x16f   :  { %v1154_v49 = vadd.f32 %v1153_v34, %v1065_v43 }
 0x171   :  { %v4991_v54 = vpop.f32.mrf.mxu1  ;;  %v1243_v56 = vadd.f32 %v1242_v15, %v1154_v49  ;;  %1106 = vmatmul.bf16.gmra.mxu2 %v2989_v63  ;;  %3195 = vmatmul.msk.bf16.gmra.mxu0 %vm806_vm0, %v2997_v47  ;;  %v3879_v15 = vld [vmem:[%s5744_s0 + $0x248] sm:$0xf0] }
 0x172   :  { %1195 = vmatmul.bf16.gmra.mxu3 %v2993_v46  ;;  %v3009_v34 = vor.u32 %v3879_v15, %v3008_v13  ;;  %v3577_v46 = vor.u32 %v3994_v31, %v3576_v1  ;;  %v3036_v13 = vld [vmem:[%s5744_s0 + $0x268] sm:$0xf]  ;;  %v3885_v15 = vld [vmem:[%s5744_s0 + $0x278] sm:$0xf0] }
 0x173   :  { %v1309_v61 = vmax.f32 %v1243_v56, 0.0  ;;  %v3037_v1 = vor.u32 %v3885_v15, %v3036_v13  ;;  %v3926_v13 = vld [vmem:[%s5744_s0 + $0x2a0] sm:$0xf0] }
 0x174   :  { %2276 = vmatmul.bf16.gmra.mxu1 %v3557_v53  ;;  %v1067_v51 = vpop.f32.mrf.mxu2 }
 0x175   :  { %v1156_v0 = vpop.f32.mrf.mxu3  ;;  %1341 = vst [vmem:[%s5745_s3 + $0x48] sm:$0xff] %v1309_v61  ;;  %v1068_v2 = vadd.f32 %v1067_v51, %v4657_v14  ;;  %v3010_v14 = vld [vmem:[%s5744_s0 + $0x24c] sm:$0xf0] }
 0x176   :  { %v1247_v12 = vpop.f32.mrf.mxu0  ;;  %v3013_v36 = vor.u32 %v3877_v8, %v3010_v14 }
 0x177   :  { %v1157_v5 = vadd.f32 %v1156_v0, %v1068_v2  ;;  %v3028_v2 = vld [vmem:[%s5744_s0 + $0x260] sm:$0xf] }
 0x179   :  { %v4998_v11 = vpop.f32.mrf.mxu1  ;;  %v1246_v42 = vadd.f32 %v1245_v52, %v1157_v5  ;;  %v3884_v5 = vld [vmem:[%s5744_s0 + $0x270] sm:$0xf0] }
 0x17b   :  { %v1310_v19 = vmax.f32 %v1246_v42, 0.0 }
 0x17c   :  { %v1069_v23 = vpop.f32.mrf.mxu2 }
 0x17d   :  { %v1158_v30 = vpop.f32.mrf.mxu3  ;;  %1342 = vst [vmem:[%s5745_s3 + $0x50] sm:$0xff] %v1310_v19  ;;  %v1070_v29 = vadd.f32 %v1069_v23, %v4667_v24  ;;  %v3596_v19 = vld [vmem:[%s5744_s0 + $0x4d8] sm:$0xf]  ;;  %v3029_v23 = vor.u32 %v3884_v5, %v3028_v2  ;;  %v3923_v2 = vld [vmem:[%s5744_s0 + $0x28c] sm:$0xf] }
 0x17e   :  { %v1250_v63 = vpop.f32.mrf.mxu0  ;;  %v3306_v5 = vld [vmem:[%s5744_s0 + $0x29c] sm:$0xf0] }
 0x17f   :  { %v1159_v43 = vadd.f32 %v1158_v30, %v1070_v29 }
 0x181   :  { %v5028_v33 = vpop.f32.mrf.mxu1  ;;  %v1248_v47 = vadd.f32 %v1247_v12, %v1159_v43  ;;  %1111 = vmatmul.bf16.gmra.mxu2 %v3009_v34  ;;  %3196 = vmatmul.msk.bf16.gmra.mxu0 %vm806_vm0, %v3017_v39  ;;  %v3882_v12 = vld [vmem:[%s5744_s0 + $0x264] sm:$0xf]  ;;  %v3597_v34 = vor.u32 %v3999_v37, %v3596_v19  ;;  %v3309_v19 = vor.u32 %v3923_v2, %v3306_v5  ;;  %v3931_v2 = vld [vmem:[%s5744_s0 + $0x2c8] sm:$0xf0] }
 0x182   :  { %1200 = vmatmul.bf16.gmra.mxu3 %v3013_v36 }
 0x183   :  { %v1311_v49 = vmax.f32 %v1248_v47, 0.0 }
 0x184   :  { %2281 = vmatmul.bf16.gmra.mxu1 %v3577_v46  ;;  %v1072_v52 = vpop.f32.mrf.mxu2 }
 0x185   :  { %v1161_v53 = vpop.f32.mrf.mxu3  ;;  %1343 = vst [vmem:[%s5745_s3 + $0x58] sm:$0xff] %v1311_v49  ;;  %v1073_v24 = vadd.f32 %v1072_v52, %v4697_v55  ;;  %v3030_v55 = vld [vmem:[%s5744_s0 + $0x274] sm:$0xf0] }
 0x186   :  { %v1252_v61 = vpop.f32.mrf.mxu0  ;;  %v3033_v30 = vor.u32 %v3882_v12, %v3030_v55 }
 0x187   :  { %v1162_v56 = vadd.f32 %v1161_v53, %v1073_v24  ;;  %v3922_v24 = vld [vmem:[%s5744_s0 + $0x284] sm:$0xf] }
 0x189   :  { %v5035_v51 = vpop.f32.mrf.mxu1  ;;  %v1251_v0 = vadd.f32 %v1250_v63, %v1162_v56  ;;  %v3298_v56 = vld [vmem:[%s5744_s0 + $0x294] sm:$0xf0] }
 0x18b   :  { %v1312_v42 = vmax.f32 %v1251_v0, 0.0 }
 0x18c   :  { %v1074_v8 = vpop.f32.mrf.mxu2 }
 0x18d   :  { %v1163_v14 = vpop.f32.mrf.mxu3  ;;  %1344 = vst [vmem:[%s5745_s3 + $0x60] sm:$0xff] %v1312_v42  ;;  %v1075_v44 = vadd.f32 %v1074_v8, %v4710_v9  ;;  %v3312_v42 = vld [vmem:[%s5744_s0 + $0x290] sm:$0xf]  ;;  %v3301_v8 = vor.u32 %v3922_v24, %v3298_v56  ;;  %v3928_v24 = vld [vmem:[%s5744_s0 + $0x2b4] sm:$0xf] }
 0x18e   :  { %v1255_v29 = vpop.f32.mrf.mxu0  ;;  %v3326_v56 = vld [vmem:[%s5744_s0 + $0x2c4] sm:$0xf0] }
 0x18f   :  { %v1164_v31 = vadd.f32 %v1163_v14, %v1075_v44 }
 0x191   :  { %v5065_v36 = vpop.f32.mrf.mxu1  ;;  %v1253_v39 = vadd.f32 %v1252_v61, %v1164_v31  ;;  %1116 = vmatmul.bf16.gmra.mxu2 %v3029_v23  ;;  %3197 = vmatmul.msk.bf16.gmra.mxu0 %vm806_vm0, %v3037_v1  ;;  %v3304_v61 = vld [vmem:[%s5744_s0 + $0x288] sm:$0xf]  ;;  %v3313_v23 = vor.u32 %v3926_v13, %v3312_v42  ;;  %v3329_v42 = vor.u32 %v3928_v24, %v3326_v56  ;;  %v3936_v24 = vld [vmem:[%s5744_s0 + $0x2f0] sm:$0xf0] }
 0x192   :  { %1205 = vmatmul.bf16.gmra.mxu3 %v3033_v30 }
 0x193   :  { %v1313_v43 = vmax.f32 %v1253_v39, 0.0 }
 0x194   :  { %2286 = vmatmul.bf16.gmra.mxu1 %v3597_v34  ;;  %v1077_v63 = vpop.f32.mrf.mxu2 }
 0x195   :  { %v1166_v46 = vpop.f32.mrf.mxu3  ;;  %1345 = vst [vmem:[%s5745_s3 + $0x68] sm:$0xff] %v1313_v43  ;;  %v1078_v9 = vadd.f32 %v1077_v63, %v4740_v41  ;;  %v3925_v41 = vld [vmem:[%s5744_s0 + $0x298] sm:$0xf0] }
 0x196   :  { %v1257_v49 = vpop.f32.mrf.mxu0  ;;  %v3305_v14 = vor.u32 %v3925_v41, %v3304_v61 }
 0x197   :  { %v1167_v47 = vadd.f32 %v1166_v46, %v1078_v9  ;;  %v3927_v9 = vld [vmem:[%s5744_s0 + $0x2ac] sm:$0xf] }
 0x199   :  { %v5072_v52 = vpop.f32.mrf.mxu1  ;;  %v1256_v53 = vadd.f32 %v1255_v29, %v1167_v47  ;;  %v3318_v47 = vld [vmem:[%s5744_s0 + $0x2bc] sm:$0xf0] }
 0x19b   :  { %v1314_v0 = vmax.f32 %v1256_v53, 0.0 }
 0x19c   :  { %v1079_v12 = vpop.f32.mrf.mxu2 }
 0x19d   :  { %v1168_v55 = vpop.f32.mrf.mxu3  ;;  %1346 = vst [vmem:[%s5745_s3 + $0x70] sm:$0xff] %v1314_v0  ;;  %v1080_v15 = vadd.f32 %v1079_v12, %v4753_v59  ;;  %v3332_v0 = vld [vmem:[%s5744_s0 + $0x2b8] sm:$0xf]  ;;  %v3321_v12 = vor.u32 %v3927_v9, %v3318_v47  ;;  %v3933_v9 = vld [vmem:[%s5744_s0 + $0x2dc] sm:$0xf] }
 0x19e   :  { %v1260_v44 = vpop.f32.mrf.mxu0  ;;  %v3346_v47 = vld [vmem:[%s5744_s0 + $0x2ec] sm:$0xf0] }
 0x19f   :  { %v1169_v37 = vadd.f32 %v1168_v55, %v1080_v15 }
 0x1a1   :  { %v5102_v30 = vpop.f32.mrf.mxu1  ;;  %v1258_v1 = vadd.f32 %v1257_v49, %v1169_v37  ;;  %2300 = vmatmul.bf16.vlgmr.msra.gmra.mxu2 %v3301_v8  ;;  %2478 = vmatmul.bf16.vlgmr.msra.gmra.mxu0 %v3309_v19  ;;  %v3324_v49 = vld [vmem:[%s5744_s0 + $0x2b0] sm:$0xf]  ;;  %v3333_v8 = vor.u32 %v3931_v2, %v3332_v0  ;;  %v3349_v0 = vor.u32 %v3933_v9, %v3346_v47  ;;  %v3941_v9 = vld [vmem:[%s5744_s0 + $0x318] sm:$0xf0] }
 0x1a2   :  { %2389 = vmatmul.bf16.vlgmr.msra.gmra.mxu3 %v3305_v14 }
 0x1a3   :  { %v1315_v31 = vmax.f32 %v1258_v1, 0.0 }
 0x1a4   :  { %3758 = vmatmul.msk.bf16.vlgmr.msra.gmra.mxu1 %vm806_vm0, %v3313_v23  ;;  %v1082_v29 = vpop.f32.mrf.mxu2 }
 0x1a5   :  { %v1171_v34 = vpop.f32.mrf.mxu3  ;;  %1347 = vst [vmem:[%s5745_s3 + $0x78] sm:$0xff] %v1315_v31  ;;  %v1083_v59 = vadd.f32 %v1082_v29, %v4452_v38  ;;  %v3930_v38 = vld [vmem:[%s5744_s0 + $0x2c0] sm:$0xf0] }
 0x1a6   :  { %v1262_v43 = vpop.f32.mrf.mxu0  ;;  %v3325_v55 = vor.u32 %v3930_v38, %v3324_v49 }
 0x1a7   :  { %v1172_v39 = vadd.f32 %v1171_v34, %v1083_v59  ;;  %v3932_v59 = vld [vmem:[%s5744_s0 + $0x2d4] sm:$0xf] }
 0x1a9   :  { %v5109_v63 = vpop.f32.mrf.mxu1  ;;  %v1261_v46 = vadd.f32 %v1260_v44, %v1172_v39  ;;  %v3338_v39 = vld [vmem:[%s5744_s0 + $0x2e4] sm:$0xf0] }
 0x1ab   :  { %v1316_v53 = vmax.f32 %v1261_v46, 0.0 }
 0x1ac   :  { %v1084_v61 = vpop.f32.mrf.mxu2 }
 0x1ad   :  { %v1173_v41 = vpop.f32.mrf.mxu3  ;;  %1348 = vst [vmem:[%s5745_s3 + $0x80] sm:$0xff] %v1316_v53  ;;  %v1085_v5 = vadd.f32 %v1084_v61, %v4485_v58  ;;  %v3352_v53 = vld [vmem:[%s5744_s0 + $0x2e0] sm:$0xf]  ;;  %v3341_v61 = vor.u32 %v3932_v59, %v3338_v39  ;;  %v3938_v59 = vld [vmem:[%s5744_s0 + $0x304] sm:$0xf] }
 0x1ae   :  { %v1265_v15 = vpop.f32.mrf.mxu0  ;;  %v3366_v39 = vld [vmem:[%s5744_s0 + $0x314] sm:$0xf0] }
 0x1af   :  { %v1174_v13 = vadd.f32 %v1173_v41, %v1085_v5 }
 0x1b1   :  { %v5139_v14 = vpop.f32.mrf.mxu1  ;;  %v1263_v19 = vadd.f32 %v1262_v43, %v1174_v13  ;;  %2305 = vmatmul.bf16.gmra.mxu2 %v3321_v12  ;;  %2483 = vmatmul.bf16.gmra.mxu0 %v3329_v42  ;;  %v3344_v43 = vld [vmem:[%s5744_s0 + $0x2d8] sm:$0xf]  ;;  %v3353_v12 = vor.u32 %v3936_v24, %v3352_v53  ;;  %v3369_v53 = vor.u32 %v3938_v59, %v3366_v39  ;;  %v3946_v59 = vld [vmem:[%s5744_s0 + $0x340] sm:$0xf0] }
 0x1b2   :  { %2394 = vmatmul.bf16.gmra.mxu3 %v3325_v55 }
 0x1b3   :  { %v1317_v37 = vmax.f32 %v1263_v19, 0.0 }
 0x1b4   :  { %3759 = vmatmul.msk.bf16.gmra.mxu1 %vm806_vm0, %v3333_v8  ;;  %v1087_v44 = vpop.f32.mrf.mxu2 }
 0x1b5   :  { %v1176_v23 = vpop.f32.mrf.mxu3  ;;  %1349 = vst [vmem:[%s5745_s3 + $0x88] sm:$0xff] %v1317_v37  ;;  %v1088_v58 = vadd.f32 %v1087_v44, %v4492_v3  ;;  %v3935_v3 = vld [vmem:[%s5744_s0 + $0x2e8] sm:$0xf0] }
 0x1b6   :  { %v1267_v31 = vpop.f32.mrf.mxu0  ;;  %v3345_v41 = vor.u32 %v3935_v3, %v3344_v43 }
 0x1b7   :  { %v1177_v1 = vadd.f32 %v1176_v23, %v1088_v58  ;;  %v3937_v58 = vld [vmem:[%s5744_s0 + $0x2fc] sm:$0xf] }
 0x1b9   :  { %v5146_v29 = vpop.f32.mrf.mxu1  ;;  %v1266_v34 = vadd.f32 %v1265_v15, %v1177_v1  ;;  %v3358_v1 = vld [vmem:[%s5744_s0 + $0x30c] sm:$0xf0] }
 0x1bb   :  { %v1318_v46 = vmax.f32 %v1266_v34, 0.0 }
 0x1bc   :  { %v1089_v49 = vpop.f32.mrf.mxu2 }
 0x1bd   :  { %v1178_v38 = vpop.f32.mrf.mxu3  ;;  %1350 = vst [vmem:[%s5745_s3 + $0x90] sm:$0xff] %v1318_v46  ;;  %v1090_v56 = vadd.f32 %v1089_v49, %v4522_v22  ;;  %v3372_v46 = vld [vmem:[%s5744_s0 + $0x308] sm:$0xf]  ;;  %v3361_v49 = vor.u32 %v3937_v58, %v3358_v1  ;;  %v3943_v58 = vld [vmem:[%s5744_s0 + $0x32c] sm:$0xf] }
 0x1be   :  { %v1270_v5 = vpop.f32.mrf.mxu0  ;;  %v3386_v1 = vld [vmem:[%s5744_s0 + $0x33c] sm:$0xf0] }
 0x1bf   :  { %v1179_v2 = vadd.f32 %v1178_v38, %v1090_v56 }
 0x1c1   :  { %v5176_v55 = vpop.f32.mrf.mxu1  ;;  %v1268_v42 = vadd.f32 %v1267_v31, %v1179_v2  ;;  %2310 = vmatmul.bf16.gmra.mxu2 %v3341_v61  ;;  %2488 = vmatmul.bf16.gmra.mxu0 %v3349_v0  ;;  %v3364_v31 = vld [vmem:[%s5744_s0 + $0x300] sm:$0xf]  ;;  %v3373_v61 = vor.u32 %v3941_v9, %v3372_v46  ;;  %v3389_v46 = vor.u32 %v3943_v58, %v3386_v1  ;;  %v3951_v58 = vld [vmem:[%s5744_s0 + $0x368] sm:$0xf0] }
 0x1c2   :  { %2399 = vmatmul.bf16.gmra.mxu3 %v3345_v41 }
 0x1c3   :  { %v1319_v13 = vmax.f32 %v1268_v42, 0.0 }
 0x1c4   :  { %3760 = vmatmul.msk.bf16.gmra.mxu1 %vm806_vm0, %v3353_v12  ;;  %v1092_v15 = vpop.f32.mrf.mxu2 }
 0x1c5   :  { %v1181_v8 = vpop.f32.mrf.mxu3  ;;  %1351 = vst [vmem:[%s5745_s3 + $0x98] sm:$0xff] %v1319_v13  ;;  %v1093_v22 = vadd.f32 %v1092_v15, %v4535_v35  ;;  %v3940_v35 = vld [vmem:[%s5744_s0 + $0x310] sm:$0xf0] }
 0x1c6   :  { %v1272_v37 = vpop.f32.mrf.mxu0  ;;  %v3365_v38 = vor.u32 %v3940_v35, %v3364_v31 }
 0x1c7   :  { %v1182_v19 = vadd.f32 %v1181_v8, %v1093_v22  ;;  %v3942_v22 = vld [vmem:[%s5744_s0 + $0x324] sm:$0xf] }
 0x1c9   :  { %v5183_v44 = vpop.f32.mrf.mxu1  ;;  %v1271_v23 = vadd.f32 %v1270_v5, %v1182_v19  ;;  %v3378_v19 = vld [vmem:[%s5744_s0 + $0x334] sm:$0xf0] }
 0x1cb   :  { %v1320_v34 = vmax.f32 %v1271_v23, 0.0 }
 0x1cc   :  { %v1094_v43 = vpop.f32.mrf.mxu2 }
 0x1cd   :  { %v1183_v3 = vpop.f32.mrf.mxu3  ;;  %1352 = vst [vmem:[%s5745_s3 + $0xa0] sm:$0xff] %v1320_v34  ;;  %v1095_v47 = vadd.f32 %v1094_v43, %v4568_v57  ;;  %v3392_v34 = vld [vmem:[%s5744_s0 + $0x330] sm:$0xf]  ;;  %v3381_v43 = vor.u32 %v3942_v22, %v3378_v19  ;;  %v3948_v22 = vld [vmem:[%s5744_s0 + $0x354] sm:$0xf] }
 0x1ce   :  { %v1275_v56 = vpop.f32.mrf.mxu0  ;;  %v3406_v19 = vld [vmem:[%s5744_s0 + $0x364] sm:$0xf0] }
 0x1cf   :  { %v1184_v24 = vadd.f32 %v1183_v3, %v1095_v47 }
 0x1d1   :  { %v5213_v41 = vpop.f32.mrf.mxu1  ;;  %v1273_v0 = vadd.f32 %v1272_v37, %v1184_v24  ;;  %2315 = vmatmul.bf16.gmra.mxu2 %v3361_v49  ;;  %2493 = vmatmul.bf16.gmra.mxu0 %v3369_v53  ;;  %v3384_v37 = vld [vmem:[%s5744_s0 + $0x328] sm:$0xf]  ;;  %v3393_v49 = vor.u32 %v3946_v59, %v3392_v34  ;;  %v3409_v34 = vor.u32 %v3948_v22, %v3406_v19  ;;  %v3956_v22 = vld [vmem:[%s5744_s0 + $0x390] sm:$0xf0] }
 0x1d2   :  { %2404 = vmatmul.bf16.gmra.mxu3 %v3365_v38 }
 0x1d3   :  { %v1321_v2 = vmax.f32 %v1273_v0, 0.0 }
 0x1d4   :  { %3761 = vmatmul.msk.bf16.gmra.mxu1 %vm806_vm0, %v3373_v61  ;;  %v1097_v5 = vpop.f32.mrf.mxu2 }
 0x1d5   :  { %v1186_v12 = vpop.f32.mrf.mxu3  ;;  %1353 = vst [vmem:[%s5745_s3 + $0xa8] sm:$0xff] %v1321_v2  ;;  %v1098_v57 = vadd.f32 %v1097_v5, %v4578_v6  ;;  %v3945_v6 = vld [vmem:[%s5744_s0 + $0x338] sm:$0xf0] }
 0x1d6   :  { %v1277_v13 = vpop.f32.mrf.mxu0  ;;  %v3385_v3 = vor.u32 %v3945_v6, %v3384_v37 }
 0x1d7   :  { %v1187_v42 = vadd.f32 %v1186_v12, %v1098_v57  ;;  %v3947_v57 = vld [vmem:[%s5744_s0 + $0x34c] sm:$0xf] }
 0x1d9   :  { %v5220_v15 = vpop.f32.mrf.mxu1  ;;  %v1276_v8 = vadd.f32 %v1275_v56, %v1187_v42  ;;  %v3398_v42 = vld [vmem:[%s5744_s0 + $0x35c] sm:$0xf0] }
 0x1db   :  { %v1322_v23 = vmax.f32 %v1276_v8, 0.0 }
 0x1dc   :  { %v1099_v31 = vpop.f32.mrf.mxu2 }
 0x1dd   :  { %v1188_v35 = vpop.f32.mrf.mxu3  ;;  %1354 = vst [vmem:[%s5745_s3 + $0xb0] sm:$0xff] %v1322_v23  ;;  %v1100_v39 = vadd.f32 %v1099_v31, %v4608_v28  ;;  %v3412_v23 = vld [vmem:[%s5744_s0 + $0x358] sm:$0xf]  ;;  %v3401_v31 = vor.u32 %v3947_v57, %v3398_v42  ;;  %v3953_v57 = vld [vmem:[%s5744_s0 + $0x37c] sm:$0xf] }
 0x1de   :  { %v1280_v47 = vpop.f32.mrf.mxu0  ;;  %v3426_v42 = vld [vmem:[%s5744_s0 + $0x38c] sm:$0xf0] }
 0x1df   :  { %v1189_v9 = vadd.f32 %v1188_v35, %v1100_v39 }
 0x1e1   :  { %v5250_v38 = vpop.f32.mrf.mxu1  ;;  %v1278_v53 = vadd.f32 %v1277_v13, %v1189_v9  ;;  %2320 = vmatmul.bf16.gmra.mxu2 %v3381_v43  ;;  %2498 = vmatmul.bf16.gmra.mxu0 %v3389_v46  ;;  %v3404_v13 = vld [vmem:[%s5744_s0 + $0x350] sm:$0xf]  ;;  %v3413_v43 = vor.u32 %v3951_v58, %v3412_v23  ;;  %v3429_v23 = vor.u32 %v3953_v57, %v3426_v42  ;;  %v3961_v57 = vld [vmem:[%s5744_s0 + $0x3b8] sm:$0xf0] }
 0x1e2   :  { %2409 = vmatmul.bf16.gmra.mxu3 %v3385_v3 }
 0x1e3   :  { %v1323_v24 = vmax.f32 %v1278_v53, 0.0 }
 0x1e4   :  { %3762 = vmatmul.msk.bf16.gmra.mxu1 %vm806_vm0, %v3393_v49  ;;  %v1102_v56 = vpop.f32.mrf.mxu2 }
 0x1e5   :  { %v1191_v61 = vpop.f32.mrf.mxu3  ;;  %1355 = vst [vmem:[%s5745_s3 + $0xb8] sm:$0xff] %v1323_v24  ;;  %v1103_v28 = vadd.f32 %v1102_v56, %v4621_v45  ;;  %v3950_v45 = vld [vmem:[%s5744_s0 + $0x360] sm:$0xf0] }
 0x1e6   :  { %v1282_v2 = vpop.f32.mrf.mxu0  ;;  %v3405_v35 = vor.u32 %v3950_v45, %v3404_v13 }
 0x1e7   :  { %v1192_v0 = vadd.f32 %v1191_v61, %v1103_v28  ;;  %v3952_v28 = vld [vmem:[%s5744_s0 + $0x374] sm:$0xf] }
 0x1e9   :  { %v5257_v5 = vpop.f32.mrf.mxu1  ;;  %v1281_v12 = vadd.f32 %v1280_v47, %v1192_v0  ;;  %v3418_v0 = vld [vmem:[%s5744_s0 + $0x384] sm:$0xf0] }
 0x1eb   :  { %v1324_v8 = vmax.f32 %v1281_v12, 0.0 }
 0x1ec   :  { %v1104_v37 = vpop.f32.mrf.mxu2 }
 0x1ed   :  { %v1193_v6 = vpop.f32.mrf.mxu3  ;;  %1356 = vst [vmem:[%s5745_s3 + $0xc0] sm:$0xff] %v1324_v8  ;;  %v1105_v1 = vadd.f32 %v1104_v37, %v4654_v7  ;;  %v3432_v8 = vld [vmem:[%s5744_s0 + $0x380] sm:$0xf]  ;;  %v3421_v37 = vor.u32 %v3952_v28, %v3418_v0  ;;  %v3958_v28 = vld [vmem:[%s5744_s0 + $0x3a4] sm:$0xf] }
 0x1ee   :  { %v1285_v39 = vpop.f32.mrf.mxu0  ;;  %v3446_v0 = vld [vmem:[%s5744_s0 + $0x3b4] sm:$0xf0] }
 0x1ef   :  { %v1194_v59 = vadd.f32 %v1193_v6, %v1105_v1 }
 0x1f1   :  { %v5287_v3 = vpop.f32.mrf.mxu1  ;;  %v1283_v46 = vadd.f32 %v1282_v2, %v1194_v59  ;;  %2325 = vmatmul.bf16.gmra.mxu2 %v3401_v31  ;;  %2503 = vmatmul.bf16.gmra.mxu0 %v3409_v34  ;;  %v3424_v2 = vld [vmem:[%s5744_s0 + $0x378] sm:$0xf]  ;;  %v3433_v31 = vor.u32 %v3956_v22, %v3432_v8  ;;  %v3449_v8 = vor.u32 %v3958_v28, %v3446_v0  ;;  %v3966_v28 = vld [vmem:[%s5744_s0 + $0x3e0] sm:$0xf0] }
 0x1f2   :  { %2414 = vmatmul.bf16.gmra.mxu3 %v3405_v35 }
 0x1f3   :  { %v1325_v9 = vmax.f32 %v1283_v46, 0.0 }
 0x1f4   :  { %3763 = vmatmul.msk.bf16.gmra.mxu1 %vm806_vm0, %v3413_v43  ;;  %v1107_v47 = vpop.f32.mrf.mxu2 }
 0x1f5   :  { %v1196_v49 = vpop.f32.mrf.mxu3  ;;  %1357 = vst [vmem:[%s5745_s3 + $0xc8] sm:$0xff] %v1325_v9  ;;  %v1108_v7 = vadd.f32 %v1107_v47, %v4661_v18  ;;  %v3955_v18 = vld [vmem:[%s5744_s0 + $0x388] sm:$0xf0] }
 0x1f6   :  { %v1287_v24 = vpop.f32.mrf.mxu0  ;;  %v3425_v6 = vor.u32 %v3955_v18, %v3424_v2 }
 0x1f7   :  { %v1197_v53 = vadd.f32 %v1196_v49, %v1108_v7  ;;  %v3957_v7 = vld [vmem:[%s5744_s0 + $0x39c] sm:$0xf] }
 0x1f9   :  { %v5294_v56 = vpop.f32.mrf.mxu1  ;;  %v1286_v61 = vadd.f32 %v1285_v39, %v1197_v53  ;;  %v3438_v53 = vld [vmem:[%s5744_s0 + $0x3ac] sm:$0xf0] }
 0x1fb   :  { %v1326_v12 = vmax.f32 %v1286_v61, 0.0 }
 0x1fc   :  { %v1109_v13 = vpop.f32.mrf.mxu2 }
 0x1fd   :  { %v1198_v45 = vpop.f32.mrf.mxu3  ;;  %1358 = vst [vmem:[%s5745_s3 + $0xd0] sm:$0xff] %v1326_v12  ;;  %v1110_v19 = vadd.f32 %v1109_v13, %v4691_v48  ;;  %v3452_v12 = vld [vmem:[%s5744_s0 + $0x3a8] sm:$0xf]  ;;  %v3441_v13 = vor.u32 %v3957_v7, %v3438_v53  ;;  %v3963_v7 = vld [vmem:[%s5744_s0 + $0x3cc] sm:$0xf] }
 0x1fe   :  { %v1290_v1 = vpop.f32.mrf.mxu0  ;;  %v3466_v53 = vld [vmem:[%s5744_s0 + $0x3dc] sm:$0xf0] }
 0x1ff   :  { %v1199_v58 = vadd.f32 %v1198_v45, %v1110_v19 }
 0x201   :  { %v5324_v35 = vpop.f32.mrf.mxu1  ;;  %v1288_v34 = vadd.f32 %v1287_v24, %v1199_v58  ;;  %2330 = vmatmul.bf16.gmra.mxu2 %v3421_v37  ;;  %2508 = vmatmul.bf16.gmra.mxu0 %v3429_v23  ;;  %v3444_v24 = vld [vmem:[%s5744_s0 + $0x3a0] sm:$0xf]  ;;  %v3453_v37 = vor.u32 %v3961_v57, %v3452_v12  ;;  %v3469_v12 = vor.u32 %v3963_v7, %v3466_v53 }
 0x202   :  { %2419 = vmatmul.bf16.gmra.mxu3 %v3425_v6  ;;  %v5401_v57 = vld [vmem:[%s5743_s2] ss:$0 sm:$0xff] }
 0x203   :  { %v1327_v59 = vmax.f32 %v1288_v34, 0.0 }
 0x204   :  { %3764 = vmatmul.msk.bf16.gmra.mxu1 %vm806_vm0, %v3433_v31  ;;  %v1112_v39 = vpop.f32.mrf.mxu2 }
 0x205   :  { %v1201_v43 = vpop.f32.mrf.mxu3  ;;  %1359 = vst [vmem:[%s5745_s3 + $0xd8] sm:$0xff] %v1327_v59  ;;  %v1113_v48 = vadd.f32 %v1112_v39, %v4704_v62  ;;  %v3960_v62 = vld [vmem:[%s5744_s0 + $0x3b0] sm:$0xf0] }
 0x206   :  { %v1292_v9 = vpop.f32.mrf.mxu0  ;;  %v3445_v45 = vor.u32 %v3960_v62, %v3444_v24 }
 0x207   :  { %v1202_v46 = vadd.f32 %v1201_v43, %v1113_v48  ;;  %v3962_v48 = vld [vmem:[%s5744_s0 + $0x3c4] sm:$0xf] }
 0x209   :  { %v5331_v47 = vpop.f32.mrf.mxu1  ;;  %v1291_v49 = vadd.f32 %v1290_v1, %v1202_v46  ;;  %v3458_v46 = vld [vmem:[%s5744_s0 + $0x3d4] sm:$0xf0] }
 0x20b   :  { %v1328_v61 = vmax.f32 %v1291_v49, 0.0 }
 0x20c   :  { %v1114_v2 = vpop.f32.mrf.mxu2 }
 0x20d   :  { %v1203_v18 = vpop.f32.mrf.mxu3  ;;  %1360 = vst [vmem:[%s5745_s3 + $0xe0] sm:$0xff] %v1328_v61  ;;  %v1115_v42 = vadd.f32 %v1114_v2, %v4737_v32  ;;  %v3472_v61 = vld [vmem:[%s5744_s0 + $0x3d0] sm:$0xf]  ;;  %v3461_v2 = vor.u32 %v3962_v48, %v3458_v46  ;;  %v3970_v48 = vld [vmem:[%s5744_s0 + $0x400] sm:$0xf0]  ;;  %v2215_v46 = vadd.f32 %v5401_v57, %v4789_v40 }
 0x20e   :  { %v1295_v19 = vpop.f32.mrf.mxu0 }
 0x20f   :  { %v1204_v22 = vadd.f32 %v1203_v18, %v1115_v42 }
 0x211   :  { %v5361_v6 = vpop.f32.mrf.mxu1  ;;  %v1293_v23 = vadd.f32 %v1292_v9, %v1204_v22  ;;  %2335 = vmatmul.bf16.gmra.mxu2 %v3441_v13  ;;  %2513 = vmatmul.bf16.gmra.mxu0 %v3449_v8  ;;  %v3464_v9 = vld [vmem:[%s5744_s0 + $0x3c8] sm:$0xf] }
 0x212   :  { %2424 = vmatmul.bf16.gmra.mxu3 %v3445_v45  ;;  %v3473_v45 = vor.u32 %v3966_v28, %v3472_v61 }
 0x213   :  { %v1329_v58 = vmax.f32 %v1293_v23, 0.0 }
 0x214   :  { %3765 = vmatmul.msk.bf16.gmra.mxu1 %vm806_vm0, %v3453_v37  ;;  %v1117_v1 = vpop.f32.mrf.mxu2 }
 0x215   :  { %v1206_v31 = vpop.f32.mrf.mxu3  ;;  %1361 = vst [vmem:[%s5745_s3 + $0xe8] sm:$0xff] %v1329_v58  ;;  %v1118_v32 = vadd.f32 %v1117_v1, %v4747_v50  ;;  %v3965_v50 = vld [vmem:[%s5744_s0 + $0x3d8] sm:$0xf0] }
 0x216   :  { %v1297_v59 = vpop.f32.mrf.mxu0  ;;  %v3465_v18 = vor.u32 %v3965_v50, %v3464_v9  ;;  %v3968_v50 = vld [vmem:[%s5744_s0 + $0x3f4] sm:$0xf] }
 0x217   :  { %v1207_v34 = vadd.f32 %v1206_v31, %v1118_v32 }
 0x219   :  { %v5368_v39 = vpop.f32.mrf.mxu1  ;;  %v1296_v43 = vadd.f32 %v1295_v19, %v1207_v34  ;;  %v2213_v19 = vadd.f32 %v5401_v57, %v4779_v25  ;;  %v3478_v25 = vld [vmem:[%s5744_s0 + $0x3fc] sm:$0xf0] }
 0x21b   :  { %v1330_v49 = vmax.f32 %v1296_v43, 0.0  ;;  %v3484_v43 = vld [vmem:[%s5744_s0 + $0x3f0] sm:$0xf] }
 0x21c   :  { %v1119_v24 = vpop.f32.mrf.mxu2 }
 0x21d   :  { %v1208_v62 = vpop.f32.mrf.mxu3  ;;  %1362 = vst [vmem:[%s5745_s3 + $0xf0] sm:$0xff] %v1330_v49  ;;  %v1120_v0 = vadd.f32 %v1119_v24, %v4777_v20  ;;  %v3486_v49 = vld [vmem:[%s5744_s0 + $0x404] sm:$0xf0]  ;;  %v3492_v24 = vld [vmem:[%s5744_s0 + $0x3f8] sm:$0xf] }
 0x21e   :  { %v2479_v13 = vpop.f32.mrf.mxu0 }
 0x21f   :  { %v1209_v42 = vadd.f32 %v1208_v62, %v1120_v0  ;;  %v3971_v62 = vld [vmem:[%s5744_s0 + $0x408] sm:$0xf0]  ;;  %v3485_v0 = vor.u32 %v3970_v48, %v3484_v43  ;;  %v2220_v43 = vadd.f32 %v5401_v57, %v4829_v26 }
 0x221   :  { %v2568_v8 = vpop.f32.mrf.mxu1  ;;  %v1298_v22 = vadd.f32 %v1297_v59, %v1209_v42  ;;  %2340 = vmatmul.bf16.gmra.mxu2 %v3461_v2  ;;  %2518 = vmatmul.bf16.gmra.mxu0 %v3469_v12  ;;  %v3967_v59 = vld [vmem:[%s5744_s0 + $0x3ec] sm:$0xf]  ;;  %v3489_v2 = vor.u32 %v3968_v50, %v3486_v49  ;;  %v3493_v42 = vor.u32 %v3971_v62, %v3492_v24 }
 0x222   :  { %2429 = vmatmul.bf16.gmra.mxu3 %v3465_v18  ;;  %v3481_v28 = vor.u32 %v3967_v59, %v3478_v25  ;;  %v3972_v59 = vld [vmem:[%s5744_s0 + $0x414] sm:$0xf]  ;;  %v3975_v25 = vld [vmem:[%s5744_s0 + $0x428] sm:$0xf0] }
 0x223   :  { %v1331_v20 = vmax.f32 %v1298_v22, 0.0 }
 0x224   :  { %3766 = vmatmul.msk.bf16.gmra.mxu1 %vm806_vm0, %v3473_v45  ;;  %v2301_v37 = vpop.f32.mrf.mxu2 }
 0x225   :  { %v2390_v23 = vpop.f32.mrf.mxu3  ;;  %1363 = vst [vmem:[%s5745_s3 + $0xf8] sm:$0xff] %v1331_v20  ;;  %v2302_v58 = vadd.f32 %v2301_v37, %v2213_v19 }
 0x226   :  { %v2481_v31 = vpop.f32.mrf.mxu0 }
 0x227   :  { %v2391_v1 = vadd.f32 %v2390_v23, %v2302_v58 }
 0x229   :  { %v2570_v32 = vpop.f32.mrf.mxu1  ;;  %v2480_v34 = vadd.f32 %v2479_v13, %v2391_v1 }
 0x22b   :  { %v2569_v9 = vadd.f32 %v2568_v8, %v2480_v34  ;;  %v2218_v8 = vadd.f32 %v5401_v57, %v4822_v17  ;;  %v3498_v17 = vld [vmem:[%s5744_s0 + $0x424] sm:$0xf0] }
 0x22c   :  { %v2303_v7 = vpop.f32.mrf.mxu2  ;;  %v3501_v62 = vor.u32 %v3972_v59, %v3498_v17  ;;  %v2225_v59 = vadd.f32 %v5401_v57, %v4872_v27 }
 0x22d   :  { %v2392_v53 = vpop.f32.mrf.mxu3  ;;  %v2648_v40 = vmax.f32 %v2569_v9, 0.0  ;;  %v2304_v61 = vadd.f32 %v2303_v7, %v2215_v46  ;;  %v3973_v46 = vld [vmem:[%s5744_s0 + $0x41c] sm:$0xf]  ;;  %v3506_v9 = vld [vmem:[%s5744_s0 + $0x42c] sm:$0xf0] }
 0x22e   :  { %v2484_v12 = vpop.f32.mrf.mxu0  ;;  %v3512_v7 = vld [vmem:[%s5744_s0 + $0x420] sm:$0xf] }
 0x22f   :  { %3774 = vst [vmem:[%s5745_s3 + $0x100] sm:$0xff] %v2648_v40  ;;  %v2393_v18 = vadd.f32 %v2392_v53, %v2304_v61  ;;  %v3976_v53 = vld [vmem:[%s5744_s0 + $0x430] sm:$0xf0]  ;;  %v3509_v61 = vor.u32 %v3973_v46, %v3506_v9  ;;  %v3532_v46 = vld [vmem:[%s5744_s0 + $0x448] sm:$0xf] }
 0x230   :  { %v3981_v9 = vld [vmem:[%s5744_s0 + $0x458] sm:$0xf0] }
 0x231   :  { %v2573_v13 = vpop.f32.mrf.mxu1  ;;  %v2482_v45 = vadd.f32 %v2481_v31, %v2393_v18  ;;  %2345 = vmatmul.bf16.gmra.mxu2 %v3481_v28  ;;  %2523 = vmatmul.bf16.gmra.mxu0 %v3489_v2  ;;  %v3513_v2 = vor.u32 %v3976_v53, %v3512_v7 }
 0x232   :  { %2434 = vmatmul.bf16.gmra.mxu3 %v3485_v0 }
 0x233   :  { %v2571_v22 = vadd.f32 %v2570_v32, %v2482_v45  ;;  %v3504_v32 = vld [vmem:[%s5744_s0 + $0x418] sm:$0xf] }
 0x234   :  { %3767 = vmatmul.msk.bf16.gmra.mxu1 %vm806_vm0, %v3493_v42  ;;  %v2306_v19 = vpop.f32.mrf.mxu2  ;;  %v3505_v40 = vor.u32 %v3975_v25, %v3504_v32  ;;  %v2223_v42 = vadd.f32 %v5401_v57, %v4859_v10  ;;  %v3518_v10 = vld [vmem:[%s5744_s0 + $0x44c] sm:$0xf0]  ;;  %v3978_v32 = vld [vmem:[%s5744_s0 + $0x444] sm:$0xf]  ;;  %v3526_v25 = vld [vmem:[%s5744_s0 + $0x454] sm:$0xf0] }
 0x235   :  { %v2395_v20 = vpop.f32.mrf.mxu3  ;;  %v2649_v37 = vmax.f32 %v2571_v22, 0.0  ;;  %v2307_v23 = vadd.f32 %v2306_v19, %v2218_v8  ;;  %v3529_v53 = vor.u32 %v3978_v32, %v3526_v25 }
 0x236   :  { %v2486_v1 = vpop.f32.mrf.mxu0 }
 0x237   :  { %3775 = vst [vmem:[%s5745_s3 + $0x108] sm:$0xff] %v2649_v37  ;;  %v2396_v58 = vadd.f32 %v2395_v20, %v2307_v23 }
 0x239   :  { %v2575_v31 = vpop.f32.mrf.mxu1  ;;  %v2485_v34 = vadd.f32 %v2484_v12, %v2396_v58 }
 0x23b   :  { %v2574_v48 = vadd.f32 %v2573_v13, %v2485_v34  ;;  %v3980_v34 = vld [vmem:[%s5744_s0 + $0x450] sm:$0xf0] }
 0x23c   :  { %v2308_v50 = vpop.f32.mrf.mxu2 }
 0x23d   :  { %v2397_v49 = vpop.f32.mrf.mxu3  ;;  %v2650_v26 = vmax.f32 %v2574_v48, 0.0  ;;  %v2309_v24 = vadd.f32 %v2308_v50, %v2220_v43 }
 0x23e   :  { %v2489_v0 = vpop.f32.mrf.mxu0 }
 0x23f   :  { %3776 = vst [vmem:[%s5745_s3 + $0x110] sm:$0xff] %v2650_v26  ;;  %v2398_v28 = vadd.f32 %v2397_v49, %v2309_v24 }
 0x241   :  { %v2578_v18 = vpop.f32.mrf.mxu1  ;;  %v2487_v12 = vadd.f32 %v2486_v1, %v2398_v28  ;;  %2350 = vmatmul.bf16.gmra.mxu2 %v3501_v62  ;;  %2528 = vmatmul.bf16.gmra.mxu0 %v3509_v61  ;;  %v3977_v1 = vld [vmem:[%s5744_s0 + $0x43c] sm:$0xf]  ;;  %v3533_v62 = vor.u32 %v3981_v9, %v3532_v46  ;;  %v2228_v28 = vadd.f32 %v5401_v57, %v4905_v4  ;;  %v3538_v4 = vld [vmem:[%s5744_s0 + $0x474] sm:$0xf0] }
 0x242   :  { %2439 = vmatmul.bf16.gmra.mxu3 %v3505_v40  ;;  %v3521_v49 = vor.u32 %v3977_v1, %v3518_v10  ;;  %v3983_v1 = vld [vmem:[%s5744_s0 + $0x46c] sm:$0xf]  ;;  %v3546_v10 = vld [vmem:[%s5744_s0 + $0x47c] sm:$0xf0] }
 0x243   :  { %v2576_v13 = vadd.f32 %v2575_v31, %v2487_v12  ;;  %v3524_v31 = vld [vmem:[%s5744_s0 + $0x440] sm:$0xf] }
 0x244   :  { %3768 = vmatmul.msk.bf16.gmra.mxu1 %vm806_vm0, %v3513_v2  ;;  %v2311_v45 = vpop.f32.mrf.mxu2  ;;  %v3525_v7 = vor.u32 %v3980_v34, %v3524_v31 }
 0x245   :  { %v2400_v8 = vpop.f32.mrf.mxu3  ;;  %v2651_v22 = vmax.f32 %v2576_v13, 0.0  ;;  %v2312_v19 = vadd.f32 %v2311_v45, %v2223_v42 }
 0x246   :  { %v2491_v37 = vpop.f32.mrf.mxu0 }
 0x247   :  { %3777 = vst [vmem:[%s5745_s3 + $0x118] sm:$0xff] %v2651_v22  ;;  %v2401_v20 = vadd.f32 %v2400_v8, %v2312_v19  ;;  %v3982_v19 = vld [vmem:[%s5744_s0 + $0x464] sm:$0xf] }
 0x248   :  { %v3541_v25 = vor.u32 %v3982_v19, %v3538_v4 }
 0x249   :  { %v2580_v23 = vpop.f32.mrf.mxu1  ;;  %v2490_v58 = vadd.f32 %v2489_v0, %v2401_v20  ;;  %v3544_v20 = vld [vmem:[%s5744_s0 + $0x468] sm:$0xf] }
 0x24b   :  { %v2579_v17 = vadd.f32 %v2578_v18, %v2490_v58 }
 0x24c   :  { %v2313_v43 = vpop.f32.mrf.mxu2 }
 0x24d   :  { %v2402_v48 = vpop.f32.mrf.mxu3  ;;  %v2652_v27 = vmax.f32 %v2579_v17, 0.0  ;;  %v2314_v50 = vadd.f32 %v2313_v43, %v2225_v59  ;;  %v3552_v59 = vld [vmem:[%s5744_s0 + $0x470] sm:$0xf]  ;;  %v3986_v17 = vld [vmem:[%s5744_s0 + $0x480] sm:$0xf0] }
 0x24e   :  { %v2494_v24 = vpop.f32.mrf.mxu0 }
 0x24f   :  { %3778 = vst [vmem:[%s5745_s3 + $0x120] sm:$0xff] %v2652_v27  ;;  %v2403_v26 = vadd.f32 %v2402_v48, %v2314_v50  ;;  %v3549_v48 = vor.u32 %v3983_v1, %v3546_v10  ;;  %v3553_v27 = vor.u32 %v3986_v17, %v3552_v59 }
 0x251   :  { %v2583_v40 = vpop.f32.mrf.mxu1  ;;  %v2492_v61 = vadd.f32 %v2491_v37, %v2403_v26  ;;  %2355 = vmatmul.bf16.gmra.mxu2 %v3521_v49  ;;  %2533 = vmatmul.bf16.gmra.mxu0 %v3529_v53  ;;  %v3985_v37 = vld [vmem:[%s5744_s0 + $0x478] sm:$0xf0] }
 0x252   :  { %2444 = vmatmul.bf16.gmra.mxu3 %v3525_v7  ;;  %v3545_v43 = vor.u32 %v3985_v37, %v3544_v20  ;;  %v2233_v7 = vadd.f32 %v5401_v57, %v4945_v60  ;;  %v3558_v60 = vld [vmem:[%s5744_s0 + $0x49c] sm:$0xf0]  ;;  %v3572_v20 = vld [vmem:[%s5744_s0 + $0x498] sm:$0xf]  ;;  %v3991_v37 = vld [vmem:[%s5744_s0 + $0x4a8] sm:$0xf0] }
 0x253   :  { %v2581_v0 = vadd.f32 %v2580_v23, %v2492_v61  ;;  %v2230_v23 = vadd.f32 %v5401_v57, %v4915_v21  ;;  %v3573_v59 = vor.u32 %v3991_v37, %v3572_v20  ;;  %v2243_v37 = vadd.f32 %v5401_v57, %v5028_v33  ;;  %v3598_v33 = vld [vmem:[%s5744_s0 + $0x4ec] sm:$0xf0] }
 0x254   :  { %3769 = vmatmul.msk.bf16.gmra.mxu1 %vm806_vm0, %v3533_v62  ;;  %v2316_v2 = vpop.f32.mrf.mxu2 }
 0x255   :  { %v2405_v18 = vpop.f32.mrf.mxu3  ;;  %v2653_v12 = vmax.f32 %v2581_v0, 0.0  ;;  %v2317_v42 = vadd.f32 %v2316_v2, %v2228_v28 }
 0x256   :  { %v2496_v45 = vpop.f32.mrf.mxu0 }
 0x257   :  { %3779 = vst [vmem:[%s5745_s3 + $0x128] sm:$0xff] %v2653_v12  ;;  %v2406_v13 = vadd.f32 %v2405_v18, %v2317_v42  ;;  %v3987_v18 = vld [vmem:[%s5744_s0 + $0x48c] sm:$0xf]  ;;  %v3564_v12 = vld [vmem:[%s5744_s0 + $0x490] sm:$0xf] }
 0x258   :  { %v3990_v42 = vld [vmem:[%s5744_s0 + $0x4a0] sm:$0xf0] }
 0x259   :  { %v2585_v8 = vpop.f32.mrf.mxu1  ;;  %v2495_v22 = vadd.f32 %v2494_v24, %v2406_v13  ;;  %v2235_v13 = vadd.f32 %v5401_v57, %v4958_v16  ;;  %v3565_v1 = vor.u32 %v3990_v42, %v3564_v12 }
 0x25b   :  { %v2584_v58 = vadd.f32 %v2583_v40, %v2495_v22  ;;  %v3566_v22 = vld [vmem:[%s5744_s0 + $0x4a4] sm:$0xf0] }
 0x25c   :  { %v2318_v31 = vpop.f32.mrf.mxu2 }
 0x25d   :  { %v2407_v34 = vpop.f32.mrf.mxu3  ;;  %v2654_v21 = vmax.f32 %v2584_v58, 0.0  ;;  %v2319_v32 = vadd.f32 %v2318_v31, %v2230_v23  ;;  %v3561_v58 = vor.u32 %v3987_v18, %v3558_v60  ;;  %v3592_v18 = vld [vmem:[%s5744_s0 + $0x4c0] sm:$0xf]  ;;  %v3996_v60 = vld [vmem:[%s5744_s0 + $0x4d0] sm:$0xf0] }
 0x25e   :  { %v2499_v9 = vpop.f32.mrf.mxu0 }
 0x25f   :  { %3780 = vst [vmem:[%s5745_s3 + $0x130] sm:$0xff] %v2654_v21  ;;  %v2408_v46 = vadd.f32 %v2407_v34, %v2319_v32  ;;  %v2238_v32 = vadd.f32 %v5401_v57, %v4991_v54  ;;  %v3578_v54 = vld [vmem:[%s5744_s0 + $0x4c4] sm:$0xf0] }
 0x261   :  { %v2588_v50 = vpop.f32.mrf.mxu1  ;;  %v2497_v49 = vadd.f32 %v2496_v45, %v2408_v46  ;;  %2360 = vmatmul.bf16.gmra.mxu2 %v3541_v25  ;;  %2538 = vmatmul.bf16.gmra.mxu0 %v3549_v48 }
 0x262   :  { %2449 = vmatmul.bf16.gmra.mxu3 %v3545_v43 }
 0x263   :  { %v2586_v53 = vadd.f32 %v2585_v8, %v2497_v49  ;;  %v3988_v8 = vld [vmem:[%s5744_s0 + $0x494] sm:$0xf] }
 0x264   :  { %3770 = vmatmul.msk.bf16.gmra.mxu1 %vm806_vm0, %v3553_v27  ;;  %v2321_v26 = vpop.f32.mrf.mxu2  ;;  %v3569_v10 = vor.u32 %v3988_v8, %v3566_v22 }
 0x265   :  { %v2410_v24 = vpop.f32.mrf.mxu3  ;;  %v2655_v62 = vmax.f32 %v2586_v53, 0.0  ;;  %v2322_v40 = vadd.f32 %v2321_v26, %v2233_v7  ;;  %v3992_v53 = vld [vmem:[%s5744_s0 + $0x4b4] sm:$0xf]  ;;  %v3584_v26 = vld [vmem:[%s5744_s0 + $0x4b8] sm:$0xf] }
 0x266   :  { %v2501_v28 = vpop.f32.mrf.mxu0  ;;  %v3581_v42 = vor.u32 %v3992_v53, %v3578_v54 }
 0x267   :  { %3781 = vst [vmem:[%s5745_s3 + $0x138] sm:$0xff] %v2655_v62  ;;  %v2411_v61 = vadd.f32 %v2410_v24, %v2322_v40  ;;  %v3995_v24 = vld [vmem:[%s5744_s0 + $0x4c8] sm:$0xf0]  ;;  %v2240_v62 = vadd.f32 %v5401_v57, %v4998_v11 }
 0x269   :  { %v2590_v0 = vpop.f32.mrf.mxu1  ;;  %v2500_v2 = vadd.f32 %v2499_v9, %v2411_v61  ;;  %v3993_v61 = vld [vmem:[%s5744_s0 + $0x4bc] sm:$0xf] }
 0x26b   :  { %v2589_v45 = vadd.f32 %v2588_v50, %v2500_v2 }
 0x26c   :  { %v2323_v19 = vpop.f32.mrf.mxu2 }
 0x26d   :  { %v2412_v4 = vpop.f32.mrf.mxu3  ;;  %v2656_v16 = vmax.f32 %v2589_v45, 0.0  ;;  %v2324_v23 = vadd.f32 %v2323_v19, %v2235_v13  ;;  %v3585_v13 = vor.u32 %v3995_v24, %v3584_v26  ;;  %v3593_v19 = vor.u32 %v3996_v60, %v3592_v18 }
 0x26e   :  { %v2504_v34 = vpop.f32.mrf.mxu0 }
 0x26f   :  { %3782 = vst [vmem:[%s5745_s3 + $0x140] sm:$0xff] %v2656_v16  ;;  %v2413_v31 = vadd.f32 %v2412_v4, %v2324_v23 }
 0x271   :  { %v2593_v17 = vpop.f32.mrf.mxu1  ;;  %v2502_v21 = vadd.f32 %v2501_v28, %v2413_v31  ;;  %2365 = vmatmul.bf16.gmra.mxu2 %v3561_v58  ;;  %2543 = vmatmul.bf16.gmra.mxu0 %v3569_v10  ;;  %v3586_v28 = vld [vmem:[%s5744_s0 + $0x4cc] sm:$0xf0] }
 0x272   :  { %2454 = vmatmul.bf16.gmra.mxu3 %v3565_v1  ;;  %v3589_v45 = vor.u32 %v3993_v61, %v3586_v28 }
 0x273   :  { %v2591_v25 = vadd.f32 %v2590_v0, %v2502_v21  ;;  %v3997_v21 = vld [vmem:[%s5744_s0 + $0x4dc] sm:$0xf] }
 0x274   :  { %3771 = vmatmul.msk.bf16.gmra.mxu1 %vm806_vm0, %v3573_v59  ;;  %v2326_v43 = vpop.f32.mrf.mxu2  ;;  %v3601_v54 = vor.u32 %v3997_v21, %v3598_v33 }
 0x275   :  { %v2415_v48 = vpop.f32.mrf.mxu3  ;;  %v2657_v46 = vmax.f32 %v2591_v25, 0.0  ;;  %v2327_v9 = vadd.f32 %v2326_v43, %v2238_v32  ;;  %v3604_v32 = vld [vmem:[%s5744_s0 + $0x4e0] sm:$0xf]  ;;  %v4000_v25 = vld [vmem:[%s5744_s0 + $0x4f0] sm:$0xf0]  ;;  %v2245_v43 = vadd.f32 %v5401_v57, %v5035_v51 }
 0x276   :  { %v2506_v50 = vpop.f32.mrf.mxu0  ;;  %v3605_v26 = vor.u32 %v4000_v25, %v3604_v32 }
 0x277   :  { %3783 = vst [vmem:[%s5745_s3 + $0x148] sm:$0xff] %v2657_v46  ;;  %v2416_v27 = vadd.f32 %v2415_v48, %v2327_v9  ;;  %v3998_v46 = vld [vmem:[%s5744_s0 + $0x4e4] sm:$0xf]  ;;  %v3606_v9 = vld [vmem:[%s5744_s0 + $0x4f4] sm:$0xf0] }
 0x278   :  { %v3609_v24 = vor.u32 %v3998_v46, %v3606_v9 }
 0x279   :  { %v2595_v49 = vpop.f32.mrf.mxu1  ;;  %v2505_v7 = vadd.f32 %v2504_v34, %v2416_v27 }
 0x27b   :  { %v2594_v40 = vadd.f32 %v2593_v17, %v2505_v7  ;;  %v4001_v7 = vld [vmem:[%s5744_s0 + $0x4f8] sm:$0xf0] }
 0x27c   :  { %v2328_v0 = vpop.f32.mrf.mxu2 }
 0x27d   :  { %v2417_v2 = vpop.f32.mrf.mxu3  ;;  %v2658_v11 = vmax.f32 %v2594_v40, 0.0  ;;  %v2329_v12 = vadd.f32 %v2328_v0, %v2240_v62 }
 0x27e   :  { %v2509_v22 = vpop.f32.mrf.mxu0 }
 0x27f   :  { %3784 = vst [vmem:[%s5745_s3 + $0x150] sm:$0xff] %v2658_v11  ;;  %v2418_v8 = vadd.f32 %v2417_v2, %v2329_v12  ;;  %v2248_v2 = vadd.f32 %v5401_v57, %v5065_v36 }
 0x281   :  { %v2598_v4 = vpop.f32.mrf.mxu1  ;;  %v2507_v20 = vadd.f32 %v2506_v50, %v2418_v8  ;;  %2370 = vmatmul.bf16.gmra.mxu2 %v3581_v42  ;;  %2548 = vmatmul.bf16.gmra.mxu0 %v3589_v45 }
 0x282   :  { %2459 = vmatmul.bf16.gmra.mxu3 %v3585_v13 }
 0x283   :  { %v2596_v16 = vadd.f32 %v2595_v49, %v2507_v20  ;;  %v3612_v49 = vld [vmem:[%s5744_s0 + $0x4e8] sm:$0xf] }
 0x284   :  { %3772 = vmatmul.msk.bf16.gmra.mxu1 %vm806_vm0, %v3593_v19  ;;  %v2331_v23 = vpop.f32.mrf.mxu2  ;;  %v3613_v61 = vor.u32 %v4001_v7, %v3612_v49  ;;  %v2250_v19 = vadd.f32 %v5401_v57, %v5072_v52 }
 0x285   :  { %v2420_v58 = vpop.f32.mrf.mxu3  ;;  %v2659_v1 = vmax.f32 %v2596_v16, 0.0  ;;  %v2332_v10 = vadd.f32 %v2331_v23, %v2243_v37 }
 0x286   :  { %v2511_v34 = vpop.f32.mrf.mxu0 }
 0x287   :  { %3785 = vst [vmem:[%s5745_s3 + $0x158] sm:$0xff] %v2659_v1  ;;  %v2421_v31 = vadd.f32 %v2420_v58, %v2332_v10 }
 0x289   :  { %v2600_v59 = vpop.f32.mrf.mxu1  ;;  %v2510_v17 = vadd.f32 %v2509_v22, %v2421_v31  ;;  %v2253_v31 = vadd.f32 %v5401_v57, %v5102_v30 }
 0x28b   :  { %v2599_v48 = vadd.f32 %v2598_v4, %v2510_v17 }
 0x28c   :  { %v2333_v27 = vpop.f32.mrf.mxu2 }
 0x28d   :  { %v2422_v50 = vpop.f32.mrf.mxu3  ;;  %v2660_v51 = vmax.f32 %v2599_v48, 0.0  ;;  %v2334_v53 = vadd.f32 %v2333_v27, %v2245_v43  ;;  %v2255_v48 = vadd.f32 %v5401_v57, %v5109_v63 }
 0x28e   :  { %v2514_v40 = vpop.f32.mrf.mxu0 }
 0x28f   :  { %3786 = vst [vmem:[%s5745_s3 + $0x160] sm:$0xff] %v2660_v51  ;;  %v2423_v62 = vadd.f32 %v2422_v50, %v2334_v53 }
 0x291   :  { %v2603_v28 = vpop.f32.mrf.mxu1  ;;  %v2512_v0 = vadd.f32 %v2511_v34, %v2423_v62  ;;  %2375 = vmatmul.bf16.gmra.mxu2 %v3601_v54  ;;  %2553 = vmatmul.bf16.gmra.mxu0 %v3609_v24  ;;  %v2258_v54 = vadd.f32 %v5401_v57, %v5139_v14 }
 0x292   :  { %2464 = vmatmul.bf16.gmra.mxu3 %v3605_v26 }
 0x293   :  { %v2601_v18 = vadd.f32 %v2600_v59, %v2512_v0 }
 0x294   :  { %3773 = vmatmul.msk.bf16.gmra.mxu1 %vm806_vm0, %v3613_v61  ;;  %v2336_v60 = vpop.f32.mrf.mxu2 }
 0x295   :  { %v2425_v11 = vpop.f32.mrf.mxu3  ;;  %v2661_v12 = vmax.f32 %v2601_v18, 0.0  ;;  %v2337_v42 = vadd.f32 %v2336_v60, %v2248_v2  ;;  %v2260_v18 = vadd.f32 %v5401_v57, %v5146_v29 }
 0x296   :  { %v2516_v45 = vpop.f32.mrf.mxu0 }
 0x297   :  { %3787 = vst [vmem:[%s5745_s3 + $0x168] sm:$0xff] %v2661_v12  ;;  %v2426_v13 = vadd.f32 %v2425_v11, %v2337_v42 }
 0x299   :  { %v2605_v8 = vpop.f32.mrf.mxu1  ;;  %v2515_v22 = vadd.f32 %v2514_v40, %v2426_v13 }
 0x29b   :  { %v2604_v4 = vadd.f32 %v2603_v28, %v2515_v22 }
 0x29c   :  { %v2338_v36 = vpop.f32.mrf.mxu2 }
 0x29d   :  { %v2427_v20 = vpop.f32.mrf.mxu3  ;;  %v2662_v37 = vmax.f32 %v2604_v4, 0.0  ;;  %v2339_v16 = vadd.f32 %v2338_v36, %v2250_v19  ;;  %v2263_v19 = vadd.f32 %v5401_v57, %v5176_v55 }
 0x29e   :  { %v2519_v58 = vpop.f32.mrf.mxu0 }
 0x29f   :  { %3788 = vst [vmem:[%s5745_s3 + $0x170] sm:$0xff] %v2662_v37  ;;  %v2428_v23 = vadd.f32 %v2427_v20, %v2339_v16 }
 0x2a1   :  { %v2608_v1 = vpop.f32.mrf.mxu1  ;;  %v2517_v10 = vadd.f32 %v2516_v45, %v2428_v23 }
 0x2a3   :  { %v2606_v34 = vadd.f32 %v2605_v8, %v2517_v10  ;;  %v2265_v10 = vadd.f32 %v5401_v57, %v5183_v44 }
 0x2a4   :  { %v2341_v59 = vpop.f32.mrf.mxu2 }
 0x2a5   :  { %v2430_v17 = vpop.f32.mrf.mxu3  ;;  %v2663_v52 = vmax.f32 %v2606_v34, 0.0  ;;  %v2342_v21 = vadd.f32 %v2341_v59, %v2253_v31 }
 0x2a6   :  { %v2521_v32 = vpop.f32.mrf.mxu0 }
 0x2a7   :  { %3789 = vst [vmem:[%s5745_s3 + $0x178] sm:$0xff] %v2663_v52  ;;  %v2431_v33 = vadd.f32 %v2430_v17, %v2342_v21 }
 0x2a9   :  { %v2610_v25 = vpop.f32.mrf.mxu1  ;;  %v2520_v43 = vadd.f32 %v2519_v58, %v2431_v33 }
 0x2ab   :  { %v2609_v46 = vadd.f32 %v2608_v1, %v2520_v43 }
 0x2ac   :  { %v2343_v9 = vpop.f32.mrf.mxu2 }
 0x2ad   :  { %v2432_v27 = vpop.f32.mrf.mxu3  ;;  %v2664_v30 = vmax.f32 %v2609_v46, 0.0  ;;  %v2344_v50 = vadd.f32 %v2343_v9, %v2255_v48 }
 0x2ae   :  { %v2524_v7 = vpop.f32.mrf.mxu0 }
 0x2af   :  { %3790 = vst [vmem:[%s5745_s3 + $0x180] sm:$0xff] %v2664_v30  ;;  %v2433_v49 = vadd.f32 %v2432_v27, %v2344_v50 }
 0x2b1   :  { %v2613_v51 = vpop.f32.mrf.mxu1  ;;  %v2522_v53 = vadd.f32 %v2521_v32, %v2433_v49 }
 0x2b3   :  { %v2611_v26 = vadd.f32 %v2610_v25, %v2522_v53  ;;  %v2268_v25 = vadd.f32 %v5401_v57, %v5213_v41 }
 0x2b4   :  { %v2346_v24 = vpop.f32.mrf.mxu2 }
 0x2b5   :  { %v2435_v62 = vpop.f32.mrf.mxu3  ;;  %v2665_v63 = vmax.f32 %v2611_v26, 0.0  ;;  %v2347_v40 = vadd.f32 %v2346_v24, %v2258_v54 }
 0x2b6   :  { %v2526_v28 = vpop.f32.mrf.mxu0 }
 0x2b7   :  { %3791 = vst [vmem:[%s5745_s3 + $0x188] sm:$0xff] %v2665_v63  ;;  %v2436_v61 = vadd.f32 %v2435_v62, %v2347_v40 }
 0x2b9   :  { %v2615_v0 = vpop.f32.mrf.mxu1  ;;  %v2525_v2 = vadd.f32 %v2524_v7, %v2436_v61  ;;  %v2270_v7 = vadd.f32 %v5401_v57, %v5220_v15  ;;  %v2273_v61 = vadd.f32 %v5401_v57, %v5250_v38 }
 0x2bb   :  { %v2614_v60 = vadd.f32 %v2613_v51, %v2525_v2 }
 0x2bc   :  { %v2348_v11 = vpop.f32.mrf.mxu2 }
 0x2bd   :  { %v2437_v12 = vpop.f32.mrf.mxu3  ;;  %v2666_v14 = vmax.f32 %v2614_v60, 0.0  ;;  %v2349_v42 = vadd.f32 %v2348_v11, %v2260_v18 }
 0x2be   :  { %v2529_v45 = vpop.f32.mrf.mxu0 }
 0x2bf   :  { %3792 = vst [vmem:[%s5745_s3 + $0x190] sm:$0xff] %v2666_v14  ;;  %v2438_v13 = vadd.f32 %v2437_v12, %v2349_v42  ;;  %v2275_v42 = vadd.f32 %v5401_v57, %v5257_v5 }
 0x2c1   :  { %v2618_v8 = vpop.f32.mrf.mxu1  ;;  %v2527_v22 = vadd.f32 %v2526_v28, %v2438_v13 }
 0x2c3   :  { %v2616_v4 = vadd.f32 %v2615_v0, %v2527_v22 }
 0x2c4   :  { %v2351_v36 = vpop.f32.mrf.mxu2 }
 0x2c5   :  { %v2440_v20 = vpop.f32.mrf.mxu3  ;;  %v2667_v29 = vmax.f32 %v2616_v4, 0.0  ;;  %v2352_v37 = vadd.f32 %v2351_v36, %v2263_v19 }
 0x2c6   :  { %v2531_v23 = vpop.f32.mrf.mxu0 }
 0x2c7   :  { %3793 = vst [vmem:[%s5745_s3 + $0x198] sm:$0xff] %v2667_v29  ;;  %v2441_v16 = vadd.f32 %v2440_v20, %v2352_v37  ;;  %v2278_v29 = vadd.f32 %v5401_v57, %v5287_v3 }
 0x2c9   :  { %v2620_v58 = vpop.f32.mrf.mxu1  ;;  %v2530_v1 = vadd.f32 %v2529_v45, %v2441_v16 }
 0x2cb   :  { %v2619_v31 = vadd.f32 %v2618_v8, %v2530_v1 }
 0x2cc   :  { %v2353_v34 = vpop.f32.mrf.mxu2 }
 0x2cd   :  { %v2442_v59 = vpop.f32.mrf.mxu3  ;;  %v2668_v55 = vmax.f32 %v2619_v31, 0.0  ;;  %v2354_v17 = vadd.f32 %v2353_v34, %v2265_v10 }
 0x2ce   :  { %v2534_v21 = vpop.f32.mrf.mxu0 }
 0x2cf   :  { %3794 = vst [vmem:[%s5745_s3 + $0x1a0] sm:$0xff] %v2668_v55  ;;  %v2443_v52 = vadd.f32 %v2442_v59, %v2354_v17  ;;  %v2280_v59 = vadd.f32 %v5401_v57, %v5294_v56 }
 0x2d1   :  { %v2623_v33 = vpop.f32.mrf.mxu1  ;;  %v2532_v32 = vadd.f32 %v2531_v23, %v2443_v52 }
 0x2d3   :  { %v2621_v43 = vadd.f32 %v2620_v58, %v2532_v32 }
 0x2d4   :  { %v2356_v48 = vpop.f32.mrf.mxu2 }
 0x2d5   :  { %v2445_v46 = vpop.f32.mrf.mxu3  ;;  %v2669_v44 = vmax.f32 %v2621_v43, 0.0  ;;  %v2357_v9 = vadd.f32 %v2356_v48, %v2268_v25  ;;  %v2283_v43 = vadd.f32 %v5401_v57, %v5324_v35 }
 0x2d6   :  { %v2536_v30 = vpop.f32.mrf.mxu0 }
 0x2d7   :  { %3795 = vst [vmem:[%s5745_s3 + $0x1a8] sm:$0xff] %v2669_v44  ;;  %v2446_v27 = vadd.f32 %v2445_v46, %v2357_v9 }
 0x2d9   :  { %v2625_v50 = vpop.f32.mrf.mxu1  ;;  %v2535_v49 = vadd.f32 %v2534_v21, %v2446_v27 }
 0x2db   :  { %v2624_v51 = vadd.f32 %v2623_v33, %v2535_v49  ;;  %v2285_v49 = vadd.f32 %v5401_v57, %v5331_v47 }
 0x2dc   :  { %v2358_v53 = vpop.f32.mrf.mxu2 }
 0x2dd   :  { %v2447_v54 = vpop.f32.mrf.mxu3  ;;  %v2670_v41 = vmax.f32 %v2624_v51, 0.0  ;;  %v2359_v26 = vadd.f32 %v2358_v53, %v2270_v7 }
 0x2de   :  { %v2539_v62 = vpop.f32.mrf.mxu0 }
 0x2df   :  { %3796 = vst [vmem:[%s5745_s3 + $0x1b0] sm:$0xff] %v2670_v41  ;;  %v2448_v24 = vadd.f32 %v2447_v54, %v2359_v26 }
 0x2e1   :  { %v2628_v63 = vpop.f32.mrf.mxu1  ;;  %v2537_v40 = vadd.f32 %v2536_v30, %v2448_v24 }
 0x2e3   :  { %v2626_v28 = vadd.f32 %v2625_v50, %v2537_v40 }
 0x2e4   :  { %v2361_v0 = vpop.f32.mrf.mxu2 }
 0x2e5   :  { %v2450_v2 = vpop.f32.mrf.mxu3  ;;  %v2671_v15 = vmax.f32 %v2626_v28, 0.0  ;;  %v2362_v18 = vadd.f32 %v2361_v0, %v2273_v61 }
 0x2e6   :  { %v2541_v11 = vpop.f32.mrf.mxu0 }
 0x2e7   :  { %3797 = vst [vmem:[%s5745_s3 + $0x1b8] sm:$0xff] %v2671_v15  ;;  %v2451_v60 = vadd.f32 %v2450_v2, %v2362_v18 }
 0x2e9   :  { %v2630_v12 = vpop.f32.mrf.mxu1  ;;  %v2540_v14 = vadd.f32 %v2539_v62, %v2451_v60 }
 0x2eb   :  { %v2629_v13 = vadd.f32 %v2628_v63, %v2540_v14  ;;  %v2288_v63 = vadd.f32 %v5401_v57, %v5361_v6 }
 0x2ec   :  { %v2363_v45 = vpop.f32.mrf.mxu2 }
 0x2ed   :  { %v2452_v8 = vpop.f32.mrf.mxu3  ;;  %v2672_v38 = vmax.f32 %v2629_v13, 0.0  ;;  %v2364_v22 = vadd.f32 %v2363_v45, %v2275_v42 }
 0x2ee   :  { %v2544_v4 = vpop.f32.mrf.mxu0 }
 0x2ef   :  { %3798 = vst [vmem:[%s5745_s3 + $0x1c0] sm:$0xff] %v2672_v38  ;;  %v2453_v19 = vadd.f32 %v2452_v8, %v2364_v22 }
 0x2f1   :  { %v2633_v36 = vpop.f32.mrf.mxu1  ;;  %v2542_v20 = vadd.f32 %v2541_v11, %v2453_v19  ;;  %v2290_v11 = vadd.f32 %v5401_v57, %v5368_v39 }
 0x2f3   :  { %v2631_v37 = vadd.f32 %v2630_v12, %v2542_v20 }
 0x2f4   :  { %v2366_v16 = vpop.f32.mrf.mxu2 }
 0x2f5   :  { %v2455_v23 = vpop.f32.mrf.mxu3  ;;  %v2673_v5 = vmax.f32 %v2631_v37, 0.0  ;;  %v2367_v58 = vadd.f32 %v2366_v16, %v2278_v29 }
 0x2f6   :  { %v2546_v10 = vpop.f32.mrf.mxu0 }
 0x2f7   :  { %3799 = vst [vmem:[%s5745_s3 + $0x1c8] sm:$0xff] %v2673_v5  ;;  %v2456_v1 = vadd.f32 %v2455_v23, %v2367_v58 }
 0x2f9   :  { %v2545_v31 = vadd.f32 %v2544_v4, %v2456_v1  ;;  %v2635_v34 = vpop.f32.mrf.mxu1 }
 0x2fb   :  { %v2634_v55 = vadd.f32 %v2633_v36, %v2545_v31 }
 0x2fc   :  { %v2368_v17 = vpop.f32.mrf.mxu2 }
 0x2fd   :  { %v2457_v52 = vpop.f32.mrf.mxu3  ;;  %v2674_v3 = vmax.f32 %v2634_v55, 0.0  ;;  %v2369_v21 = vadd.f32 %v2368_v17, %v2280_v59 }
 0x2fe   :  { %v2549_v25 = vpop.f32.mrf.mxu0 }
 0x2ff   :  { %3800 = vst [vmem:[%s5745_s3 + $0x1d0] sm:$0xff] %v2674_v3  ;;  %v2458_v33 = vadd.f32 %v2457_v52, %v2369_v21 }
 0x301   :  { %v2547_v32 = vadd.f32 %v2546_v10, %v2458_v33  ;;  %v2638_v46 = vpop.f32.mrf.mxu1 }
 0x303   :  { %v2636_v48 = vadd.f32 %v2635_v34, %v2547_v32 }
 0x304   :  { %v2371_v44 = vpop.f32.mrf.mxu2 }
 0x305   :  { %v2460_v9 = vpop.f32.mrf.mxu3  ;;  %v2675_v56 = vmax.f32 %v2636_v48, 0.0  ;;  %v2372_v27 = vadd.f32 %v2371_v44, %v2283_v43 }
 0x306   :  { %v2551_v51 = vpop.f32.mrf.mxu0 }
 0x307   :  { %3801 = vst [vmem:[%s5745_s3 + $0x1d8] sm:$0xff] %v2675_v56  ;;  %v2461_v30 = vadd.f32 %v2460_v9, %v2372_v27 }
 0x309   :  { %v2550_v50 = vadd.f32 %v2549_v25, %v2461_v30  ;;  %v2640_v26 = vpop.f32.mrf.mxu1 }
 0x30b   :  { %v2639_v7 = vadd.f32 %v2638_v46, %v2550_v50 }
 0x30c   :  { %v2373_v53 = vpop.f32.mrf.mxu2 }
 0x30d   :  { %v2462_v54 = vpop.f32.mrf.mxu3  ;;  %v2676_v35 = vmax.f32 %v2639_v7, 0.0  ;;  %v2374_v41 = vadd.f32 %v2373_v53, %v2285_v49 }
 0x30e   :  { %v2554_v2 = vpop.f32.mrf.mxu0 }
 0x30f   :  { %3802 = vst [vmem:[%s5745_s3 + $0x1e0] sm:$0xff] %v2676_v35  ;;  %v2463_v24 = vadd.f32 %v2462_v54, %v2374_v41 }
 0x311   :  { %v2552_v62 = vadd.f32 %v2551_v51, %v2463_v24  ;;  %v2643_v18 = vpop.f32.mrf.mxu1 }
 0x313   :  { %v2641_v40 = vadd.f32 %v2640_v26, %v2552_v62 }
 0x314   :  { %v2376_v61 = vpop.f32.mrf.mxu2 }
 0x315   :  { %v2465_v28 = vpop.f32.mrf.mxu3  ;;  %v2677_v47 = vmax.f32 %v2641_v40, 0.0  ;;  %v2377_v0 = vadd.f32 %v2376_v61, %v2288_v63 }
 0x316   :  { %v2556_v8 = vpop.f32.mrf.mxu0 }
 0x317   :  { %3803 = vst [vmem:[%s5745_s3 + $0x1e8] sm:$0xff] %v2677_v47  ;;  %v2466_v15 = vadd.f32 %v2465_v28, %v2377_v0 }
 0x319   :  { %v2555_v60 = vadd.f32 %v2554_v2, %v2466_v15  ;;  %v2645_v22 = vpop.f32.mrf.mxu1 }
 0x31b   :  { %v2644_v12 = vadd.f32 %v2643_v18, %v2555_v60 }
 0x31c   :  { %v2378_v14 = vpop.f32.mrf.mxu2 }
 0x31d   :  { %v2678_v42 = vmax.f32 %v2644_v12, 0.0  ;;  %v2379_v6 = vadd.f32 %v2378_v14, %v2290_v11  ;;  %v2467_v13 = vpop.f32.mrf.mxu3 }
 0x31f   :  { %3804 = vst [vmem:[%s5745_s3 + $0x1f0] sm:$0xff] %v2678_v42  ;;  %v2468_v45 = vadd.f32 %v2467_v13, %v2379_v6 }
 0x321   :  { %v2557_v38 = vadd.f32 %v2556_v8, %v2468_v45 }
 0x323   :  { %v2646_v19 = vadd.f32 %v2645_v22, %v2557_v38 }
 0x325   :  { %v2679_v4 = vmax.f32 %v2646_v19, 0.0 }
 0x327   :  { %3805 = vst [vmem:[%s5745_s3 + $0x1f8] sm:$0xff] %v2679_v4 }

// kernel: perceptual_loss.19
= control target key start
LH: loop header
LB: loop body
LE: loop exit
PB: predicated region body
PF: predicated region fallthrough
CT: control target
= control target key end

     0   :  { %vm555_vm0 = vcmask 523264   ;;  %s1755_s1 = inlined_call_operand.vmem [shape: bf16[576,128], index: 1, kind: input, shape index: {}]   ;;  %s1756_s2 = inlined_call_operand.vmem [shape: f32[1,128], index: 2, kind: input, shape index: {}]   ;;  %s1757_s0 = inlined_call_operand.vmem [shape: bf16[128,576], index: 0, kind: input, shape index: {}]   ;;  %s1758_s3 = inlined_call_operand.vmem [shape: f32[128,128], index: 3, kind: output, shape index: {}]  }
   0x1   :  { %v1220_v0 = vld [vmem:[%s1755_s1 + $0x38] sm:$0xff]  ;;  %v1219_v1 = vld [vmem:[%s1755_s1 + $0x30] sm:$0xff]  ;;  %v1218_v2 = vld [vmem:[%s1755_s1 + $0x28] sm:$0xff] }
   0x2   :  { %1249 = vmatpush.bf16.msra.mxu1 %v1220_v0  ;;  %1250 = vmatpush.bf16.msra.mxu2 %v1220_v0  ;;  %v1217_v3 = vld [vmem:[%s1755_s1 + $0x20] sm:$0xff]  ;;  %v1216_v4 = vld [vmem:[%s1755_s1 + $0x18] sm:$0xff]  ;;  %v1215_v5 = vld [vmem:[%s1755_s1 + $0x10] sm:$0xff] }
   0x3   :  { %1251 = vmatpush.bf16.msra.mxu3 %v1220_v0  ;;  %580 = vmatpush.bf16.msra.mxu0 %v1220_v0  ;;  %v1214_v6 = vld [vmem:[%s1755_s1 + $0x8] sm:$0xff]  ;;  %v1213_v7 = vld [vmem:[%s1755_s1] sm:$0xff]  ;;  %v903_v8 = vld [vmem:[%s1757_s0 + $0x50] sm:$0xf] }
   0x4   :  { %v1185_v9 = vld [vmem:[%s1757_s0 + $0x60] sm:$0xf0]  ;;  %v943_v10 = vld [vmem:[%s1757_s0 + $0xa0] sm:$0xf]  ;;  %v1195_v11 = vld [vmem:[%s1757_s0 + $0xb0] sm:$0xf0] }
   0x5   :  { %v983_v12 = vld [vmem:[%s1757_s0 + $0xf0] sm:$0xf]  ;;  %v1205_v13 = vld [vmem:[%s1757_s0 + $0x100] sm:$0xf0]  ;;  %v863_v14 = vld [vmem:[%s1757_s0] sm:$0xf]  ;;  %v904_v18 = vor.u32 %v1185_v9, %v903_v8  ;;  %v944_v19 = vor.u32 %v1195_v11, %v943_v10 }
   0x6   :  { %1252 = vmatpush.bf16.msra.mxu1 %v1219_v1  ;;  %1253 = vmatpush.bf16.msra.mxu2 %v1219_v1  ;;  %v1175_v15 = vld [vmem:[%s1757_s0 + $0x10] sm:$0xf0]  ;;  %v1236_v16 = vld [vmem:[%s1755_s1 + $0xb8] sm:$0xff]  ;;  %v984_v20 = vor.u32 %v1205_v13, %v983_v12  ;;  %v1234_v28 = vld [vmem:[%s1755_s1 + $0xa8] sm:$0xff] }
   0x7   :  { %1254 = vmatpush.bf16.msra.mxu3 %v1219_v1  ;;  %581 = vmatpush.bf16.msra.mxu0 %v1219_v1  ;;  %v1228_v17 = vld [vmem:[%s1755_s1 + $0x78] sm:$0xff]  ;;  %v864_v21 = vor.u32 %v1175_v15, %v863_v14  ;;  %v1235_v24 = vld [vmem:[%s1755_s1 + $0xb0] sm:$0xff]  ;;  %v1226_v29 = vld [vmem:[%s1755_s1 + $0x68] sm:$0xff] }
   0x8   :  { %v1244_v22 = vld [vmem:[%s1755_s1 + $0xf8] sm:$0xff]  ;;  %v1227_v25 = vld [vmem:[%s1755_s1 + $0x70] sm:$0xff]  ;;  %v1242_v30 = vld [vmem:[%s1755_s1 + $0xe8] sm:$0xff] }
   0x9   :  { %v1248_v23 = vld [vmem:[%s1755_s1 + $0x118] sm:$0xff]  ;;  %v1243_v26 = vld [vmem:[%s1755_s1 + $0xf0] sm:$0xff]  ;;  %v1246_v31 = vld [vmem:[%s1755_s1 + $0x108] sm:$0xff] }
   0xa   :  { %1255 = vmatpush.bf16.msra.mxu1 %v1218_v2  ;;  %1256 = vmatpush.bf16.msra.mxu2 %v1218_v2  ;;  %v1247_v27 = vld [vmem:[%s1755_s1 + $0x110] sm:$0xff]  ;;  %v1233_v32 = vld [vmem:[%s1755_s1 + $0xa0] sm:$0xff]  ;;  %v923_v35 = vld [vmem:[%s1757_s0 + $0x78] sm:$0xf] }
   0xb   :  { %1257 = vmatpush.bf16.msra.mxu3 %v1218_v2  ;;  %582 = vmatpush.bf16.msra.mxu0 %v1218_v2  ;;  %v1225_v33 = vld [vmem:[%s1755_s1 + $0x60] sm:$0xff]  ;;  %v1190_v36 = vld [vmem:[%s1757_s0 + $0x88] sm:$0xf0]  ;;  %v963_v37 = vld [vmem:[%s1757_s0 + $0xc8] sm:$0xf] }
   0xc   :  { %v1241_v34 = vld [vmem:[%s1755_s1 + $0xe0] sm:$0xff]  ;;  %v1200_v38 = vld [vmem:[%s1757_s0 + $0xd8] sm:$0xf0]  ;;  %v1003_v39 = vld [vmem:[%s1757_s0 + $0x118] sm:$0xf]  ;;  %v924_v46 = vor.u32 %v1190_v36, %v923_v35 }
   0xd   :  { %v1210_v40 = vld [vmem:[%s1757_s0 + $0x128] sm:$0xf0]  ;;  %v883_v41 = vld [vmem:[%s1757_s0 + $0x28] sm:$0xf]  ;;  %v1180_v42 = vld [vmem:[%s1757_s0 + $0x38] sm:$0xf0]  ;;  %v964_v47 = vor.u32 %v1200_v38, %v963_v37 }
   0xe   :  { %1258 = vmatpush.bf16.msra.mxu1 %v1217_v3  ;;  %1259 = vmatpush.bf16.msra.mxu2 %v1217_v3  ;;  %v1245_v43 = vld [vmem:[%s1755_s1 + $0x100] sm:$0xff]  ;;  %v1232_v44 = vld [vmem:[%s1755_s1 + $0x98] sm:$0xff]  ;;  %v1004_v48 = vor.u32 %v1210_v40, %v1003_v39  ;;  %v884_v49 = vor.u32 %v1180_v42, %v883_v41  ;;  %v1231_v51 = vld [vmem:[%s1755_s1 + $0x90] sm:$0xff] }
   0xf   :  { %1260 = vmatpush.bf16.msra.mxu3 %v1217_v3  ;;  %583 = vmatpush.bf16.msra.mxu0 %v1217_v3  ;;  %v1224_v45 = vld [vmem:[%s1755_s1 + $0x58] sm:$0xff]  ;;  %v1223_v52 = vld [vmem:[%s1755_s1 + $0x50] sm:$0xff]  ;;  %v1230_v54 = vld [vmem:[%s1755_s1 + $0x88] sm:$0xff] }
  0x10   :  { %v1240_v50 = vld [vmem:[%s1755_s1 + $0xd8] sm:$0xff]  ;;  %v1239_v53 = vld [vmem:[%s1755_s1 + $0xd0] sm:$0xff]  ;;  %v1222_v55 = vld [vmem:[%s1755_s1 + $0x48] sm:$0xff] }
  0x11   :  { %v1238_v56 = vld [vmem:[%s1755_s1 + $0xc8] sm:$0xff]  ;;  %v1229_v57 = vld [vmem:[%s1755_s1 + $0x80] sm:$0xff]  ;;  %v865_v61 = vld [vmem:[%s1757_s0 + $0x14] sm:$0xf0] }
  0x12   :  { %1261 = vmatpush.bf16.msra.mxu1 %v1216_v4  ;;  %1262 = vmatpush.bf16.msra.mxu2 %v1216_v4  ;;  %v1221_v58 = vld [vmem:[%s1755_s1 + $0x40] sm:$0xff]  ;;  %v871_v62 = vld [vmem:[%s1757_s0 + $0x8] sm:$0xf]  ;;  %v1176_v63 = vld [vmem:[%s1757_s0 + $0x18] sm:$0xf0] }
  0x13   :  { %1263 = vmatpush.bf16.msra.mxu3 %v1216_v4  ;;  %584 = vmatpush.bf16.msra.mxu0 %v1216_v4  ;;  %v1237_v59 = vld [vmem:[%s1755_s1 + $0xc0] sm:$0xff]  ;;  %v1174_v0 = vld [vmem:[%s1757_s0 + $0xc] sm:$0xf]  ;;  %v879_v2 = vld [vmem:[%s1757_s0 + $0x10] sm:$0xf] }
  0x14   :  { %v1173_v60 = vld [vmem:[%s1757_s0 + $0x4] sm:$0xf]  ;;  %v873_v1 = vld [vmem:[%s1757_s0 + $0x1c] sm:$0xf0]  ;;  %v1178_v8 = vld [vmem:[%s1757_s0 + $0x2c] sm:$0xf] }
  0x15   :  { %v1177_v3 = vld [vmem:[%s1757_s0 + $0x20] sm:$0xf0]  ;;  %v868_v4 = vor.u32 %v1173_v60, %v865_v61  ;;  %v885_v9 = vld [vmem:[%s1757_s0 + $0x3c] sm:$0xf0]  ;;  %v891_v10 = vld [vmem:[%s1757_s0 + $0x30] sm:$0xf] }
  0x16   :  { %1264 = vmatpush.bf16.msra.mxu1 %v1215_v5  ;;  %1265 = vmatpush.bf16.msra.mxu2 %v1215_v5  ;;  %v1181_v11 = vld [vmem:[%s1757_s0 + $0x40] sm:$0xf0]  ;;  %v1179_v12 = vld [vmem:[%s1757_s0 + $0x34] sm:$0xf]  ;;  %v893_v13 = vld [vmem:[%s1757_s0 + $0x44] sm:$0xf0] }
  0x17   :  { %1266 = vmatpush.bf16.msra.mxu3 %v1215_v5  ;;  %585 = vmatpush.bf16.msra.mxu0 %v1215_v5  ;;  %v872_v5 = vor.u32 %v1176_v63, %v871_v62  ;;  %v899_v14 = vld [vmem:[%s1757_s0 + $0x38] sm:$0xf]  ;;  %v1182_v15 = vld [vmem:[%s1757_s0 + $0x48] sm:$0xf0]  ;;  %v1191_v35 = vld [vmem:[%s1757_s0 + $0x90] sm:$0xf0] }
  0x18   :  { %v1189_v36 = vld [vmem:[%s1757_s0 + $0x84] sm:$0xf]  ;;  %v933_v37 = vld [vmem:[%s1757_s0 + $0x94] sm:$0xf0]  ;;  %v939_v38 = vld [vmem:[%s1757_s0 + $0x88] sm:$0xf] }
  0x19   :  { %v1192_v39 = vld [vmem:[%s1757_s0 + $0x98] sm:$0xf0]  ;;  %v936_v42 = vor.u32 %v1189_v36, %v933_v37  ;;  %v1199_v60 = vld [vmem:[%s1757_s0 + $0xd4] sm:$0xf]  ;;  %v973_v61 = vld [vmem:[%s1757_s0 + $0xe4] sm:$0xf0] }
  0x1a   :  { %1267 = vmatpush.bf16.msra.mxu1 %v1214_v6  ;;  %1268 = vmatpush.bf16.msra.mxu2 %v1214_v6  ;;  %v979_v62 = vld [vmem:[%s1757_s0 + $0xd8] sm:$0xf]  ;;  %v1202_v63 = vld [vmem:[%s1757_s0 + $0xe8] sm:$0xf0] }
  0x1b   :  { %1269 = vmatpush.bf16.msra.mxu3 %v1214_v6  ;;  %586 = vmatpush.bf16.msra.mxu0 %v1214_v6  ;;  %v876_v6 = vor.u32 %v1174_v0, %v873_v1 }
  0x1e   :  { %1270 = vmatpush.bf16.msra.mxu1 %v1213_v7  ;;  %1271 = vmatpush.bf16.msra.mxu2 %v1213_v7 }
  0x1f   :  { %1272 = vmatpush.bf16.msra.mxu3 %v1213_v7  ;;  %587 = vmatpush.bf16.msra.mxu0 %v1213_v7  ;;  %v880_v7 = vor.u32 %v1177_v3, %v879_v2  ;;  %v976_v2 = vor.u32 %v1199_v60, %v973_v61  ;;  %v980_v3 = vor.u32 %v1202_v63, %v979_v62 }
  0x21   :  { %598 = vmatmul.bf16.vlgmr.msra.gmra.mxu1 %v904_v18  ;;  %608 = vmatmul.bf16.vlgmr.msra.gmra.mxu2 %v944_v19  ;;  %v896_v18 = vor.u32 %v1179_v12, %v893_v13  ;;  %v900_v19 = vor.u32 %v1182_v15, %v899_v14 }
  0x22   :  { %678 = vmatpush.bf16.msrb.mxu2 %v1236_v16  ;;  %629 = vmatpush.bf16.msrb.mxu1 %v1228_v17  ;;  %v888_v16 = vor.u32 %v1178_v8, %v885_v9  ;;  %v892_v17 = vor.u32 %v1181_v11, %v891_v10  ;;  %v1204_v8 = vld [vmem:[%s1757_s0 + $0xfc] sm:$0xf]  ;;  %v993_v9 = vld [vmem:[%s1757_s0 + $0x10c] sm:$0xf0]  ;;  %v999_v10 = vld [vmem:[%s1757_s0 + $0x100] sm:$0xf] }
  0x23   :  { %618 = vmatmul.bf16.vlgmr.msra.gmra.mxu3 %v984_v20  ;;  %588 = vmatmul.bf16.vlgmr.msra.gmra.mxu0 %v864_v21  ;;  %v1183_v20 = vld [vmem:[%s1757_s0 + $0x54] sm:$0xf]  ;;  %v905_v21 = vld [vmem:[%s1757_s0 + $0x64] sm:$0xf0]  ;;  %v996_v15 = vor.u32 %v1204_v8, %v993_v9 }
  0x24   :  { %727 = vmatpush.bf16.msrb.mxu3 %v1244_v22  ;;  %780 = vmatpush.bf16.msrb.mxu0 %v1248_v23  ;;  %v911_v22 = vld [vmem:[%s1757_s0 + $0x58] sm:$0xf]  ;;  %v1186_v23 = vld [vmem:[%s1757_s0 + $0x68] sm:$0xf0]  ;;  %v1207_v11 = vld [vmem:[%s1757_s0 + $0x110] sm:$0xf0] }
  0x26   :  { %679 = vmatpush.bf16.msrb.mxu2 %v1235_v24  ;;  %630 = vmatpush.bf16.msrb.mxu1 %v1227_v25  ;;  %v1184_v24 = vld [vmem:[%s1757_s0 + $0x5c] sm:$0xf]  ;;  %v913_v25 = vld [vmem:[%s1757_s0 + $0x6c] sm:$0xf0] }
  0x28   :  { %728 = vmatpush.bf16.msrb.mxu3 %v1243_v26  ;;  %781 = vmatpush.bf16.msrb.mxu0 %v1247_v27  ;;  %v919_v26 = vld [vmem:[%s1757_s0 + $0x60] sm:$0xf]  ;;  %v1187_v27 = vld [vmem:[%s1757_s0 + $0x70] sm:$0xf0] }
  0x2a   :  { %680 = vmatpush.bf16.msrb.mxu2 %v1234_v28  ;;  %631 = vmatpush.bf16.msrb.mxu1 %v1226_v29  ;;  %v908_v28 = vor.u32 %v1183_v20, %v905_v21  ;;  %v912_v29 = vor.u32 %v1186_v23, %v911_v22 }
  0x2c   :  { %729 = vmatpush.bf16.msrb.mxu3 %v1242_v30  ;;  %782 = vmatpush.bf16.msrb.mxu0 %v1246_v31  ;;  %v916_v30 = vor.u32 %v1184_v24, %v913_v25  ;;  %v920_v31 = vor.u32 %v1187_v27, %v919_v26  ;;  %v1208_v25 = vld [vmem:[%s1757_s0 + $0x11c] sm:$0xf]  ;;  %v1005_v26 = vld [vmem:[%s1757_s0 + $0x12c] sm:$0xf0]  ;;  %v1011_v27 = vld [vmem:[%s1757_s0 + $0x120] sm:$0xf] }
  0x2d   :  { %v1008_v36 = vor.u32 %v1208_v25, %v1005_v26 }
  0x2e   :  { %681 = vmatpush.bf16.msrb.mxu2 %v1233_v32  ;;  %632 = vmatpush.bf16.msrb.mxu1 %v1225_v33  ;;  %v1188_v32 = vld [vmem:[%s1757_s0 + $0x7c] sm:$0xf]  ;;  %v925_v33 = vld [vmem:[%s1757_s0 + $0x8c] sm:$0xf0] }
  0x2f   :  { %v928_v40 = vor.u32 %v1188_v32, %v925_v33  ;;  %v1212_v32 = vld [vmem:[%s1757_s0 + $0x138] sm:$0xf0] }
  0x30   :  { %730 = vmatpush.bf16.msrb.mxu3 %v1241_v34  ;;  %783 = vmatpush.bf16.msrb.mxu0 %v1245_v43  ;;  %v931_v34 = vld [vmem:[%s1757_s0 + $0x80] sm:$0xf]  ;;  %v940_v43 = vor.u32 %v1192_v39, %v939_v38 }
  0x31   :  { %603 = vmatmul.bf16.gmra.mxu1 %v924_v46  ;;  %613 = vmatmul.bf16.gmra.mxu2 %v964_v47  ;;  %v932_v41 = vor.u32 %v1191_v35, %v931_v34  ;;  %v951_v46 = vld [vmem:[%s1757_s0 + $0xa8] sm:$0xf]  ;;  %v1196_v47 = vld [vmem:[%s1757_s0 + $0xb8] sm:$0xf0] }
  0x32   :  { %682 = vmatpush.bf16.msrb.mxu2 %v1232_v44  ;;  %633 = vmatpush.bf16.msrb.mxu1 %v1224_v45  ;;  %v1193_v44 = vld [vmem:[%s1757_s0 + $0xa4] sm:$0xf]  ;;  %v945_v45 = vld [vmem:[%s1757_s0 + $0xb4] sm:$0xf0] }
  0x33   :  { %623 = vmatmul.bf16.gmra.mxu3 %v1004_v48  ;;  %593 = vmatmul.bf16.gmra.mxu0 %v884_v49  ;;  %v1194_v48 = vld [vmem:[%s1757_s0 + $0xac] sm:$0xf]  ;;  %v953_v49 = vld [vmem:[%s1757_s0 + $0xbc] sm:$0xf0] }
  0x34   :  { %731 = vmatpush.bf16.msrb.mxu3 %v1240_v50  ;;  %v959_v50 = vld [vmem:[%s1757_s0 + $0xb0] sm:$0xf] }
  0x36   :  { %683 = vmatpush.bf16.msrb.mxu2 %v1231_v51  ;;  %634 = vmatpush.bf16.msrb.mxu1 %v1223_v52  ;;  %v1197_v51 = vld [vmem:[%s1757_s0 + $0xc0] sm:$0xf0]  ;;  %v948_v52 = vor.u32 %v1193_v44, %v945_v45 }
  0x38   :  { %732 = vmatpush.bf16.msrb.mxu3 %v1239_v53  ;;  %v952_v53 = vor.u32 %v1196_v47, %v951_v46 }
  0x3a   :  { %684 = vmatpush.bf16.msrb.mxu2 %v1230_v54  ;;  %635 = vmatpush.bf16.msrb.mxu1 %v1222_v55  ;;  %v956_v54 = vor.u32 %v1194_v48, %v953_v49  ;;  %v960_v55 = vor.u32 %v1197_v51, %v959_v50 }
  0x3c   :  { %733 = vmatpush.bf16.msrb.mxu3 %v1238_v56  ;;  %v1198_v56 = vld [vmem:[%s1757_s0 + $0xcc] sm:$0xf] }
  0x3e   :  { %685 = vmatpush.bf16.msrb.mxu2 %v1229_v57  ;;  %636 = vmatpush.bf16.msrb.mxu1 %v1221_v58  ;;  %v965_v57 = vld [vmem:[%s1757_s0 + $0xdc] sm:$0xf0]  ;;  %v971_v58 = vld [vmem:[%s1757_s0 + $0xd0] sm:$0xf] }
  0x3f   :  { %v968_v0 = vor.u32 %v1198_v56, %v965_v57 }
  0x40   :  { %734 = vmatpush.bf16.msrb.mxu3 %v1237_v59  ;;  %v1201_v59 = vld [vmem:[%s1757_s0 + $0xe0] sm:$0xf0] }
  0x41   :  { %637 = vmatmul.bf16.vlgmr.msrb.gmra.mxu1 %v868_v4  ;;  %686 = vmatmul.bf16.vlgmr.msrb.gmra.mxu2 %v872_v5  ;;  %v972_v1 = vor.u32 %v1201_v59, %v971_v58  ;;  %v1203_v4 = vld [vmem:[%s1757_s0 + $0xf4] sm:$0xf]  ;;  %v985_v5 = vld [vmem:[%s1757_s0 + $0x104] sm:$0xf0] }
  0x42   :  { %v988_v12 = vor.u32 %v1203_v4, %v985_v5 }
  0x43   :  { %735 = vmatmul.bf16.vlgmr.msrb.gmra.mxu3 %v876_v6  ;;  %1165 = vmatmul.msk.bf16.vlgmr.msrb.gmra.mxu0 %vm555_vm0, %v880_v7  ;;  %v991_v6 = vld [vmem:[%s1757_s0 + $0xf8] sm:$0xf]  ;;  %v1206_v7 = vld [vmem:[%s1757_s0 + $0x108] sm:$0xf0] }
  0x44   :  { %v992_v13 = vor.u32 %v1206_v7, %v991_v6 }
  0x51   :  { %642 = vmatmul.bf16.gmra.mxu1 %v888_v16  ;;  %691 = vmatmul.bf16.gmra.mxu2 %v892_v17  ;;  %v1000_v16 = vor.u32 %v1207_v11, %v999_v10 }
  0x53   :  { %740 = vmatmul.bf16.gmra.mxu3 %v896_v18  ;;  %1166 = vmatmul.msk.bf16.gmra.mxu0 %vm555_vm0, %v900_v19  ;;  %v1630_v18 = vld [vmem:[%s1756_s2] ss:$0 sm:$0xff] }
  0x61   :  { %647 = vmatmul.bf16.gmra.mxu1 %v908_v28  ;;  %696 = vmatmul.bf16.gmra.mxu2 %v912_v29  ;;  %v1211_v28 = vld [vmem:[%s1757_s0 + $0x130] sm:$0xf0]  ;;  %v1209_v29 = vld [vmem:[%s1757_s0 + $0x124] sm:$0xf] }
  0x62   :  { %v1012_v37 = vor.u32 %v1211_v28, %v1011_v27 }
  0x63   :  { %745 = vmatmul.bf16.gmra.mxu3 %v916_v30  ;;  %1167 = vmatmul.msk.bf16.gmra.mxu0 %vm555_vm0, %v920_v31  ;;  %v1013_v30 = vld [vmem:[%s1757_s0 + $0x134] sm:$0xf0]  ;;  %v1019_v31 = vld [vmem:[%s1757_s0 + $0x128] sm:$0xf] }
  0x71   :  { %652 = vmatmul.bf16.gmra.mxu1 %v928_v40  ;;  %701 = vmatmul.bf16.gmra.mxu2 %v932_v41  ;;  %v1016_v40 = vor.u32 %v1209_v29, %v1013_v30  ;;  %v1020_v41 = vor.u32 %v1212_v32, %v1019_v31 }
  0x73   :  { %750 = vmatmul.bf16.gmra.mxu3 %v936_v42  ;;  %1168 = vmatmul.msk.bf16.gmra.mxu0 %vm555_vm0, %v940_v43 }
  0x81   :  { %657 = vmatmul.bf16.gmra.mxu1 %v948_v52  ;;  %706 = vmatmul.bf16.gmra.mxu2 %v952_v53 }
  0x83   :  { %755 = vmatmul.bf16.gmra.mxu3 %v956_v54  ;;  %1169 = vmatmul.msk.bf16.gmra.mxu0 %vm555_vm0, %v960_v55 }
  0x91   :  { %662 = vmatmul.bf16.gmra.mxu1 %v968_v0  ;;  %711 = vmatmul.bf16.gmra.mxu2 %v972_v1 }
  0x93   :  { %760 = vmatmul.bf16.gmra.mxu3 %v976_v2  ;;  %1170 = vmatmul.msk.bf16.gmra.mxu0 %vm555_vm0, %v980_v3 }
  0x9e   :  { %v1624_v14 = vpop.f32.mrf.mxu1 }
  0xa0   :  { %v589_v17 = vpop.f32.mrf.mxu0 }
  0xa1   :  { %667 = vmatmul.bf16.gmra.mxu1 %v988_v12  ;;  %716 = vmatmul.bf16.gmra.mxu2 %v992_v13  ;;  %v590_v55 = vadd.f32 %v1630_v18, %v589_v17 }
  0xa3   :  { %765 = vmatmul.bf16.gmra.mxu3 %v996_v15  ;;  %1171 = vmatmul.msk.bf16.gmra.mxu0 %vm555_vm0, %v1000_v16 }
  0xa4   :  { %v609_v19 = vpop.f32.mrf.mxu2 }
  0xa5   :  { %v1633_v20 = vadd.f32 %v1630_v18, %v609_v19 }
  0xa6   :  { %v619_v21 = vpop.f32.mrf.mxu3  ;;  %v1638_v23 = vpop.f32.mrf.mxu1 }
  0xa7   :  { %v1636_v22 = vadd.f32 %v1630_v18, %v619_v21 }
  0xa8   :  { %v591_v24 = vpop.f32.mrf.mxu0 }
  0xa9   :  { %v592_v63 = vadd.f32 %v1630_v18, %v591_v24 }
  0xac   :  { %v611_v33 = vpop.f32.mrf.mxu2 }
  0xad   :  { %v1665_v34 = vadd.f32 %v1630_v18, %v611_v33 }
  0xae   :  { %v621_v35 = vpop.f32.mrf.mxu3  ;;  %v1670_v39 = vpop.f32.mrf.mxu1 }
  0xaf   :  { %v1668_v38 = vadd.f32 %v1630_v18, %v621_v35  ;;  %v600_v35 = vadd.f32 %v1630_v18, %v1624_v14 }
  0xb0   :  { %v594_v42 = vpop.f32.mrf.mxu0 }
  0xb1   :  { %672 = vmatmul.bf16.gmra.mxu1 %v1008_v36  ;;  %721 = vmatmul.bf16.gmra.mxu2 %v1012_v37  ;;  %v595_v9 = vadd.f32 %v1630_v18, %v594_v42 }
  0xb3   :  { %770 = vmatmul.bf16.gmra.mxu3 %v1016_v40  ;;  %1172 = vmatmul.msk.bf16.gmra.mxu0 %vm555_vm0, %v1020_v41 }
  0xb4   :  { %v614_v43 = vpop.f32.mrf.mxu2 }
  0xb5   :  { %v1674_v44 = vadd.f32 %v1630_v18, %v614_v43 }
  0xb6   :  { %v624_v45 = vpop.f32.mrf.mxu3  ;;  %v1679_v47 = vpop.f32.mrf.mxu1 }
  0xb7   :  { %v1677_v46 = vadd.f32 %v1630_v18, %v624_v45 }
  0xb8   :  { %v596_v48 = vpop.f32.mrf.mxu0 }
  0xb9   :  { %v597_v24 = vadd.f32 %v1630_v18, %v596_v48 }
  0xbc   :  { %v616_v49 = vpop.f32.mrf.mxu2 }
  0xbd   :  { %v1682_v50 = vadd.f32 %v1630_v18, %v616_v49 }
  0xbe   :  { %v626_v51 = vpop.f32.mrf.mxu3  ;;  %v638_v53 = vpop.f32.mrf.mxu1 }
  0xbf   :  { %v1685_v52 = vadd.f32 %v1630_v18, %v626_v51  ;;  %v639_v56 = vadd.f32 %v638_v53, %v590_v55  ;;  %v602_v51 = vadd.f32 %v1630_v18, %v1638_v23 }
  0xc0   :  { %v785_v54 = vpop.f32.mrf.mxu0 }
  0xc4   :  { %v687_v57 = vpop.f32.mrf.mxu2 }
  0xc5   :  { %v688_v58 = vadd.f32 %v687_v57, %v639_v56 }
  0xc6   :  { %v736_v59 = vpop.f32.mrf.mxu3  ;;  %v640_v60 = vpop.f32.mrf.mxu1 }
  0xc7   :  { %v737_v61 = vadd.f32 %v736_v59, %v688_v58  ;;  %v641_v2 = vadd.f32 %v640_v60, %v592_v63 }
  0xc8   :  { %v787_v62 = vpop.f32.mrf.mxu0 }
  0xc9   :  { %v786_v0 = vadd.f32 %v785_v54, %v737_v61  ;;  %v605_v61 = vadd.f32 %v1630_v18, %v1670_v39 }
  0xcb   :  { %v825_v1 = vmax.f32 %v786_v0, 0.0 }
  0xcc   :  { %v689_v3 = vpop.f32.mrf.mxu2 }
  0xcd   :  { %841 = vst [vmem:[%s1758_s3] sm:$0xff] %v825_v1  ;;  %v690_v4 = vadd.f32 %v689_v3, %v641_v2 }
  0xce   :  { %v738_v5 = vpop.f32.mrf.mxu3  ;;  %v643_v6 = vpop.f32.mrf.mxu1 }
  0xcf   :  { %v739_v7 = vadd.f32 %v738_v5, %v690_v4  ;;  %v644_v12 = vadd.f32 %v643_v6, %v595_v9  ;;  %v607_v6 = vadd.f32 %v1630_v18, %v1679_v47 }
  0xd0   :  { %v790_v8 = vpop.f32.mrf.mxu0 }
  0xd1   :  { %v788_v10 = vadd.f32 %v787_v62, %v739_v7 }
  0xd3   :  { %v826_v11 = vmax.f32 %v788_v10, 0.0 }
  0xd4   :  { %v692_v13 = vpop.f32.mrf.mxu2 }
  0xd5   :  { %842 = vst [vmem:[%s1758_s3 + $0x8] sm:$0xff] %v826_v11  ;;  %v693_v15 = vadd.f32 %v692_v13, %v644_v12 }
  0xd6   :  { %v741_v16 = vpop.f32.mrf.mxu3  ;;  %v645_v17 = vpop.f32.mrf.mxu1 }
  0xd7   :  { %v742_v19 = vadd.f32 %v741_v16, %v693_v15  ;;  %v646_v27 = vadd.f32 %v645_v17, %v597_v24 }
  0xd8   :  { %v792_v21 = vpop.f32.mrf.mxu0 }
  0xd9   :  { %v791_v25 = vadd.f32 %v790_v8, %v742_v19 }
  0xdb   :  { %v827_v26 = vmax.f32 %v791_v25, 0.0 }
  0xdc   :  { %v694_v28 = vpop.f32.mrf.mxu2 }
  0xdd   :  { %843 = vst [vmem:[%s1758_s3 + $0x10] sm:$0xff] %v827_v26  ;;  %v695_v29 = vadd.f32 %v694_v28, %v646_v27 }
  0xde   :  { %v743_v30 = vpop.f32.mrf.mxu3  ;;  %v648_v31 = vpop.f32.mrf.mxu1 }
  0xdf   :  { %v744_v32 = vadd.f32 %v743_v30, %v695_v29  ;;  %v649_v40 = vadd.f32 %v648_v31, %v600_v35 }
  0xe0   :  { %v795_v33 = vpop.f32.mrf.mxu0 }
  0xe1   :  { %v793_v36 = vadd.f32 %v792_v21, %v744_v32 }
  0xe3   :  { %v828_v37 = vmax.f32 %v793_v36, 0.0 }
  0xe4   :  { %v697_v41 = vpop.f32.mrf.mxu2 }
  0xe5   :  { %844 = vst [vmem:[%s1758_s3 + $0x18] sm:$0xff] %v828_v37  ;;  %v698_v42 = vadd.f32 %v697_v41, %v649_v40 }
  0xe6   :  { %v746_v43 = vpop.f32.mrf.mxu3  ;;  %v650_v45 = vpop.f32.mrf.mxu1 }
  0xe7   :  { %v747_v48 = vadd.f32 %v746_v43, %v698_v42  ;;  %v651_v55 = vadd.f32 %v650_v45, %v602_v51 }
  0xe8   :  { %v797_v49 = vpop.f32.mrf.mxu0 }
  0xe9   :  { %v796_v53 = vadd.f32 %v795_v33, %v747_v48 }
  0xeb   :  { %v829_v54 = vmax.f32 %v796_v53, 0.0 }
  0xec   :  { %v699_v14 = vpop.f32.mrf.mxu2 }
  0xed   :  { %845 = vst [vmem:[%s1758_s3 + $0x20] sm:$0xff] %v829_v54  ;;  %v700_v56 = vadd.f32 %v699_v14, %v651_v55 }
  0xee   :  { %v748_v57 = vpop.f32.mrf.mxu3  ;;  %v653_v58 = vpop.f32.mrf.mxu1 }
  0xef   :  { %v749_v59 = vadd.f32 %v748_v57, %v700_v56  ;;  %v654_v0 = vadd.f32 %v653_v58, %v605_v61 }
  0xf0   :  { %v800_v60 = vpop.f32.mrf.mxu0 }
  0xf1   :  { %v798_v62 = vadd.f32 %v797_v49, %v749_v59 }
  0xf3   :  { %v830_v63 = vmax.f32 %v798_v62, 0.0 }
  0xf4   :  { %v702_v23 = vpop.f32.mrf.mxu2 }
  0xf5   :  { %846 = vst [vmem:[%s1758_s3 + $0x28] sm:$0xff] %v830_v63  ;;  %v703_v1 = vadd.f32 %v702_v23, %v654_v0 }
  0xf6   :  { %v751_v2 = vpop.f32.mrf.mxu3  ;;  %v655_v3 = vpop.f32.mrf.mxu1 }
  0xf7   :  { %v752_v4 = vadd.f32 %v751_v2, %v703_v1  ;;  %v656_v9 = vadd.f32 %v655_v3, %v607_v6 }
  0xf8   :  { %v802_v5 = vpop.f32.mrf.mxu0 }
  0xf9   :  { %v801_v7 = vadd.f32 %v800_v60, %v752_v4 }
  0xfb   :  { %v831_v8 = vmax.f32 %v801_v7, 0.0 }
  0xfc   :  { %v704_v39 = vpop.f32.mrf.mxu2 }
  0xfd   :  { %847 = vst [vmem:[%s1758_s3 + $0x30] sm:$0xff] %v831_v8  ;;  %v705_v10 = vadd.f32 %v704_v39, %v656_v9 }
  0xfe   :  { %v753_v11 = vpop.f32.mrf.mxu3  ;;  %v658_v12 = vpop.f32.mrf.mxu1 }
  0xff   :  { %v754_v13 = vadd.f32 %v753_v11, %v705_v10  ;;  %v659_v19 = vadd.f32 %v658_v12, %v1633_v20 }
 0x100   :  { %v805_v15 = vpop.f32.mrf.mxu0 }
 0x101   :  { %v803_v16 = vadd.f32 %v802_v5, %v754_v13 }
 0x103   :  { %v832_v17 = vmax.f32 %v803_v16, 0.0 }
 0x104   :  { %v707_v21 = vpop.f32.mrf.mxu2 }
 0x105   :  { %848 = vst [vmem:[%s1758_s3 + $0x38] sm:$0xff] %v832_v17  ;;  %v708_v18 = vadd.f32 %v707_v21, %v659_v19 }
 0x106   :  { %v756_v47 = vpop.f32.mrf.mxu3  ;;  %v660_v24 = vpop.f32.mrf.mxu1 }
 0x107   :  { %v757_v25 = vadd.f32 %v756_v47, %v708_v18  ;;  %v661_v29 = vadd.f32 %v660_v24, %v1665_v34 }
 0x108   :  { %v807_v26 = vpop.f32.mrf.mxu0 }
 0x109   :  { %v806_v27 = vadd.f32 %v805_v15, %v757_v25 }
 0x10b   :  { %v833_v28 = vmax.f32 %v806_v27, 0.0 }
 0x10c   :  { %v709_v30 = vpop.f32.mrf.mxu2 }
 0x10d   :  { %849 = vst [vmem:[%s1758_s3 + $0x40] sm:$0xff] %v833_v28  ;;  %v710_v20 = vadd.f32 %v709_v30, %v661_v29 }
 0x10e   :  { %v758_v31 = vpop.f32.mrf.mxu3  ;;  %v663_v32 = vpop.f32.mrf.mxu1 }
 0x10f   :  { %v759_v33 = vadd.f32 %v758_v31, %v710_v20  ;;  %v664_v40 = vadd.f32 %v663_v32, %v1674_v44 }
 0x110   :  { %v810_v35 = vpop.f32.mrf.mxu0 }
 0x111   :  { %v808_v36 = vadd.f32 %v807_v26, %v759_v33 }
 0x113   :  { %v834_v37 = vmax.f32 %v808_v36, 0.0 }
 0x114   :  { %v712_v41 = vpop.f32.mrf.mxu2 }
 0x115   :  { %850 = vst [vmem:[%s1758_s3 + $0x48] sm:$0xff] %v834_v37  ;;  %v713_v34 = vadd.f32 %v712_v41, %v664_v40 }
 0x116   :  { %v761_v42 = vpop.f32.mrf.mxu3  ;;  %v665_v43 = vpop.f32.mrf.mxu1 }
 0x117   :  { %v762_v45 = vadd.f32 %v761_v42, %v713_v34  ;;  %v666_v53 = vadd.f32 %v665_v43, %v1682_v50 }
 0x118   :  { %v812_v48 = vpop.f32.mrf.mxu0 }
 0x119   :  { %v811_v49 = vadd.f32 %v810_v35, %v762_v45 }
 0x11b   :  { %v835_v51 = vmax.f32 %v811_v49, 0.0 }
 0x11c   :  { %v714_v54 = vpop.f32.mrf.mxu2 }
 0x11d   :  { %851 = vst [vmem:[%s1758_s3 + $0x50] sm:$0xff] %v835_v51  ;;  %v715_v44 = vadd.f32 %v714_v54, %v666_v53 }
 0x11e   :  { %v763_v55 = vpop.f32.mrf.mxu3  ;;  %v668_v14 = vpop.f32.mrf.mxu1 }
 0x11f   :  { %v764_v56 = vadd.f32 %v763_v55, %v715_v44  ;;  %v669_v60 = vadd.f32 %v668_v14, %v1636_v22 }
 0x120   :  { %v815_v58 = vpop.f32.mrf.mxu0 }
 0x121   :  { %v813_v57 = vadd.f32 %v812_v48, %v764_v56 }
 0x123   :  { %v836_v59 = vmax.f32 %v813_v57, 0.0 }
 0x124   :  { %v717_v61 = vpop.f32.mrf.mxu2 }
 0x125   :  { %852 = vst [vmem:[%s1758_s3 + $0x58] sm:$0xff] %v836_v59  ;;  %v718_v50 = vadd.f32 %v717_v61, %v669_v60 }
 0x126   :  { %v766_v62 = vpop.f32.mrf.mxu3  ;;  %v670_v63 = vpop.f32.mrf.mxu1 }
 0x127   :  { %v767_v0 = vadd.f32 %v766_v62, %v718_v50  ;;  %v671_v2 = vadd.f32 %v670_v63, %v1668_v38 }
 0x128   :  { %v817_v3 = vpop.f32.mrf.mxu0 }
 0x129   :  { %v816_v23 = vadd.f32 %v815_v58, %v767_v0 }
 0x12b   :  { %v837_v1 = vmax.f32 %v816_v23, 0.0 }
 0x12c   :  { %v719_v4 = vpop.f32.mrf.mxu2 }
 0x12d   :  { %853 = vst [vmem:[%s1758_s3 + $0x60] sm:$0xff] %v837_v1  ;;  %v720_v22 = vadd.f32 %v719_v4, %v671_v2 }
 0x12e   :  { %v768_v5 = vpop.f32.mrf.mxu3  ;;  %v673_v6 = vpop.f32.mrf.mxu1 }
 0x12f   :  { %v769_v7 = vadd.f32 %v768_v5, %v720_v22  ;;  %v674_v39 = vadd.f32 %v673_v6, %v1677_v46 }
 0x130   :  { %v820_v12 = vpop.f32.mrf.mxu0 }
 0x131   :  { %v818_v8 = vadd.f32 %v817_v3, %v769_v7 }
 0x133   :  { %v838_v9 = vmax.f32 %v818_v8, 0.0 }
 0x134   :  { %v722_v10 = vpop.f32.mrf.mxu2 }
 0x135   :  { %854 = vst [vmem:[%s1758_s3 + $0x68] sm:$0xff] %v838_v9  ;;  %v723_v38 = vadd.f32 %v722_v10, %v674_v39 }
 0x136   :  { %v771_v11 = vpop.f32.mrf.mxu3  ;;  %v675_v15 = vpop.f32.mrf.mxu1 }
 0x137   :  { %v772_v13 = vadd.f32 %v771_v11, %v723_v38  ;;  %v676_v19 = vadd.f32 %v675_v15, %v1685_v52 }
 0x138   :  { %v822_v24 = vpop.f32.mrf.mxu0 }
 0x139   :  { %v821_v16 = vadd.f32 %v820_v12, %v772_v13 }
 0x13b   :  { %v839_v17 = vmax.f32 %v821_v16, 0.0 }
 0x13c   :  { %v724_v21 = vpop.f32.mrf.mxu2 }
 0x13d   :  { %855 = vst [vmem:[%s1758_s3 + $0x70] sm:$0xff] %v839_v17  ;;  %v725_v46 = vadd.f32 %v724_v21, %v676_v19 }
 0x13e   :  { %v773_v18 = vpop.f32.mrf.mxu3 }
 0x13f   :  { %v774_v47 = vadd.f32 %v773_v18, %v725_v46 }
 0x141   :  { %v823_v25 = vadd.f32 %v822_v24, %v774_v47 }
 0x143   :  { %v840_v26 = vmax.f32 %v823_v25, 0.0 }
 0x145   :  { %856 = vst [vmem:[%s1758_s3 + $0x78] sm:$0xff] %v840_v26 }

// kernel: perceptual_loss.21
= control target key start
LH: loop header
LB: loop body
LE: loop exit
PB: predicated region body
PF: predicated region fallthrough
CT: control target
= control target key end

     0   :  { %s275_s0 = inlined_call_operand.vmem [shape: f32[128,128], index: 0, kind: input, shape index: {}]   ;;  %s276_s1 = inlined_call_operand.vmem [shape: f32[128,128], index: 1, kind: input, shape index: {}]   ;;  %s277_s2 = inlined_call_operand.hbm [shape: f32[1,1], index: 2, kind: output, shape index: {}]  }
   0x1   :  { %v18_v0 = vld [vmem:[%s275_s0] sm:$0xff]  ;;  %v19_v1 = vld [vmem:[%s275_s0 + $0x8] sm:$0xff]  ;;  %v20_v2 = vld [vmem:[%s275_s0 + $0x10] sm:$0xff] }
   0x2   :  { %v34_v3 = vld [vmem:[%s276_s1] sm:$0xff]  ;;  %v35_v4 = vld [vmem:[%s276_s1 + $0x8] sm:$0xff]  ;;  %v36_v5 = vld [vmem:[%s276_s1 + $0x10] sm:$0xff] }
   0x3   :  { %v50_v6 = vsub.f32 %v18_v0, %v34_v3  ;;  %v51_v7 = vsub.f32 %v19_v1, %v35_v4  ;;  %v21_v8 = vld [vmem:[%s275_s0 + $0x18] sm:$0xff]  ;;  %v52_v10 = vsub.f32 %v20_v2, %v36_v5  ;;  %v22_v11 = vld [vmem:[%s275_s0 + $0x20] sm:$0xff] }
   0x4   :  { %v37_v9 = vld [vmem:[%s276_s1 + $0x18] sm:$0xff]  ;;  %v38_v12 = vld [vmem:[%s276_s1 + $0x20] sm:$0xff] }
   0x5   :  { %v53_v13 = vsub.f32 %v21_v8, %v37_v9  ;;  %v67_v14 = vmul.f32 %v50_v6, %v50_v6  ;;  %v68_v15 = vmul.f32 %v51_v7, %v51_v7 }
   0x6   :  { %7 = vsyncpa [#allocation3], 0  ;;  %v23_v16 = vld [vmem:[%s275_s0 + $0x28] sm:$0xff]  ;;  %v54_v18 = vsub.f32 %v22_v11, %v38_v12  ;;  %v69_v19 = vmul.f32 %v52_v10, %v52_v10  ;;  %v24_v20 = vld [vmem:[%s275_s0 + $0x30] sm:$0xff]  ;;  %vm16_vm0 = vcmask 0   ;;  %s118_s19 = sshll.u32 %s277_s2, 4  ;;  %s119_s19 = int_to_ptr.hbm [resolvable:$true] %s118_s19 }
   0x7   :  { %v39_v17 = vld [vmem:[%s276_s1 + $0x28] sm:$0xff]  ;;  %v40_v21 = vld [vmem:[%s276_s1 + $0x30] sm:$0xff]  ;;  %v70_v23 = vmul.f32 %v53_v13, %v53_v13  ;;  %v83_v24 = vadd.f32 %v68_v15, %v67_v14  ;;  %v25_v25 = vld [vmem:[%s275_s0 + $0x38] sm:$0xff]  ;;  %v157_v15 = vmov 0.0  }
   0x8   :  { %v55_v22 = vsub.f32 %v23_v16, %v39_v17  ;;  %v41_v26 = vld [vmem:[%s276_s1 + $0x38] sm:$0xff]  ;;  %v56_v27 = vsub.f32 %v24_v20, %v40_v21  ;;  %v71_v28 = vmul.f32 %v54_v18, %v54_v18  ;;  %v26_v30 = vld [vmem:[%s275_s0 + $0x40] sm:$0xff]  ;;  %v27_v35 = vld [vmem:[%s275_s0 + $0x48] sm:$0xff]  ;;  %17 = vst.msk [vmem:[#allocation2] sm:$0x1] %vm16_vm0, %v157_v15 }
   0x9   :  { %v84_v29 = vadd.f32 %v83_v24, %v69_v19  ;;  %v42_v31 = vld [vmem:[%s276_s1 + $0x40] sm:$0xff]  ;;  %v57_v32 = vsub.f32 %v25_v25, %v41_v26  ;;  %v43_v36 = vld [vmem:[%s276_s1 + $0x48] sm:$0xff]  ;;  %v28_v40 = vld [vmem:[%s275_s0 + $0x50] sm:$0xff] }
   0xa   :  { %v72_v33 = vmul.f32 %v55_v22, %v55_v22  ;;  %v58_v37 = vsub.f32 %v26_v30, %v42_v31  ;;  %v73_v38 = vmul.f32 %v56_v27, %v56_v27  ;;  %v44_v41 = vld [vmem:[%s276_s1 + $0x50] sm:$0xff]  ;;  %v59_v42 = vsub.f32 %v27_v35, %v43_v36  ;;  %v29_v45 = vld [vmem:[%s275_s0 + $0x58] sm:$0xff]  ;;  %v30_v50 = vld [vmem:[%s275_s0 + $0x60] sm:$0xff] }
   0xb   :  { %v85_v34 = vadd.f32 %v84_v29, %v70_v23  ;;  %v74_v43 = vmul.f32 %v57_v32, %v57_v32  ;;  %v45_v46 = vld [vmem:[%s276_s1 + $0x58] sm:$0xff]  ;;  %v60_v47 = vsub.f32 %v28_v40, %v44_v41  ;;  %v46_v51 = vld [vmem:[%s276_s1 + $0x60] sm:$0xff]  ;;  %v31_v55 = vld [vmem:[%s275_s0 + $0x68] sm:$0xff] }
   0xc   :  { %v75_v48 = vmul.f32 %v58_v37, %v58_v37  ;;  %v61_v52 = vsub.f32 %v29_v45, %v45_v46  ;;  %v76_v53 = vmul.f32 %v59_v42, %v59_v42  ;;  %v47_v56 = vld [vmem:[%s276_s1 + $0x68] sm:$0xff]  ;;  %v62_v57 = vsub.f32 %v30_v50, %v46_v51  ;;  %v32_v60 = vld [vmem:[%s275_s0 + $0x70] sm:$0xff]  ;;  %v33_v1 = vld [vmem:[%s275_s0 + $0x78] sm:$0xff]  ;;  %s158_s0 = smov [#allocation2]  }
   0xd   :  { %v86_v39 = vadd.f32 %v85_v34, %v71_v28  ;;  %v77_v58 = vmul.f32 %v60_v47, %v60_v47  ;;  %v48_v61 = vld [vmem:[%s276_s1 + $0x70] sm:$0xff]  ;;  %v63_v62 = vsub.f32 %v31_v55, %v47_v56  ;;  %v49_v2 = vld [vmem:[%s276_s1 + $0x78] sm:$0xff]  ;;  %s116_s1 = sshll.u32 %s158_s0, 4  ;;  %s117_s1 = int_to_ptr.vmem [resolvable:$true] %s116_s1 }
   0xe   :  { %v78_v63 = vmul.f32 %v61_v52, %v61_v52  ;;  %v64_v3 = vsub.f32 %v32_v60, %v48_v61  ;;  %v79_v4 = vmul.f32 %v62_v57, %v62_v57  ;;  %v65_v6 = vsub.f32 %v33_v1, %v49_v2 }
   0xf   :  { %v87_v44 = vadd.f32 %v86_v39, %v72_v33  ;;  %v80_v7 = vmul.f32 %v63_v62, %v63_v62  ;;  %v66_v23 = vld [vmem:[#allocation2] sm:$0x1] }
  0x10   :  { %v81_v9 = vmul.f32 %v64_v3, %v64_v3  ;;  %v82_v11 = vmul.f32 %v65_v6, %v65_v6 }
  0x11   :  { %v88_v49 = vadd.f32 %v87_v44, %v73_v38 }
  0x13   :  { %v89_v54 = vadd.f32 %v88_v49, %v74_v43 }
  0x15   :  { %v90_v59 = vadd.f32 %v89_v54, %v75_v48 }
  0x17   :  { %v91_v0 = vadd.f32 %v90_v59, %v76_v53 }
  0x19   :  { %v92_v5 = vadd.f32 %v91_v0, %v77_v58 }
  0x1b   :  { %v93_v8 = vadd.f32 %v92_v5, %v78_v63 }
  0x1d   :  { %v94_v10 = vadd.f32 %v93_v8, %v79_v4 }
  0x1f   :  { %v95_v12 = vadd.f32 %v94_v10, %v80_v7 }
  0x21   :  { %v96_v13 = vadd.f32 %v95_v12, %v81_v9 }
  0x23   :  { %v97_v14 = vadd.f32 %v96_v13, %v82_v11 }
  0x25   :  { %98 = vadd.xlane.f32.xlu0 %v97_v14 }
  0x98   :  { %v99_v16 = vpop.xlane.xlu0 %98 }
  0x99   :  { %v100_v17 = vrot.slane %v99_v16, 4 }
  0x9b   :  { %v101_v18 = vadd.f32 %v100_v17, %v99_v16 }
  0x9d   :  { %v102_v19 = vrot.slane %v101_v18, 2 }
  0x9f   :  { %v103_v20 = vadd.f32 %v102_v19, %v101_v18 }
  0xa1   :  { %v104_v21 = vrot.slane %v103_v20, 1 }
  0xa3   :  { %v105_v22 = vadd.f32 %v104_v21, %v103_v20 }
  0xa5   :  { %127 = vpush %v105_v22 }
  0xd6   :  { %s128_s20 = spop %127 }
  0xd7   :  { %v107_v24 = vstv %s128_s20 }
  0xd8   :  { %v108_v25 = vadd.f32 %v107_v24, %v66_v23 }
  0xda   :  { %110 = vst.msk [vmem:[#allocation2] sm:$0x1] %vm16_vm0, %v108_v25 }
  0xdb   :  { %121 = dma.vmem_to_hbm [thread:$0]  %s117_s1, 16, %s119_s19, [#allocation3]  }
  0xdc   :  { %155 = dma.done.wait [#allocation3], 16  }
  0xdd   :  { %156 = vsyncadd [#allocation3], 4294967280 }
  0xde   :  { %126 = vsyncpa [#allocation3], 1 }

// kernel: perceptual_loss.20
= control target key start
LH: loop header
LB: loop body
LE: loop exit
PB: predicated region body
PF: predicated region fallthrough
CT: control target
= control target key end

     0   :  { %s3069_s1 = inlined_call_operand.vmem [shape: bf16[1152,128], index: 1, kind: input, shape index: {}]   ;;  %s3070_s2 = inlined_call_operand.vmem [shape: f32[1,128], index: 2, kind: input, shape index: {}]   ;;  %s3071_s0 = inlined_call_operand.vmem [shape: bf16[128,1152], index: 0, kind: input, shape index: {}]   ;;  %s3072_s3 = inlined_call_operand.vmem [shape: f32[128,128], index: 3, kind: output, shape index: {}]  }
   0x1   :  { %v2158_v0 = vld [vmem:[%s3069_s1 + $0x38] sm:$0xff]  ;;  %v2157_v1 = vld [vmem:[%s3069_s1 + $0x30] sm:$0xff]  ;;  %v2156_v2 = vld [vmem:[%s3069_s1 + $0x28] sm:$0xff] }
   0x2   :  { %2223 = vmatpush.bf16.msra.mxu1 %v2158_v0  ;;  %2224 = vmatpush.bf16.msra.mxu2 %v2158_v0  ;;  %v2155_v3 = vld [vmem:[%s3069_s1 + $0x20] sm:$0xff]  ;;  %v2154_v4 = vld [vmem:[%s3069_s1 + $0x18] sm:$0xff]  ;;  %v2153_v5 = vld [vmem:[%s3069_s1 + $0x10] sm:$0xff] }
   0x3   :  { %2225 = vmatpush.bf16.msra.mxu3 %v2158_v0  ;;  %1042 = vmatpush.bf16.msra.mxu0 %v2158_v0  ;;  %v2152_v6 = vld [vmem:[%s3069_s1 + $0x8] sm:$0xff]  ;;  %v2151_v7 = vld [vmem:[%s3069_s1] sm:$0xff]  ;;  %v1577_v8 = vld [vmem:[%s3071_s0 + $0x90] sm:$0xf] }
   0x4   :  { %v2101_v9 = vld [vmem:[%s3071_s0 + $0xb0] sm:$0xf0]  ;;  %v1649_v10 = vld [vmem:[%s3071_s0 + $0x120] sm:$0xf]  ;;  %v2119_v11 = vld [vmem:[%s3071_s0 + $0x140] sm:$0xf0] }
   0x5   :  { %v1721_v12 = vld [vmem:[%s3071_s0 + $0x1b0] sm:$0xf]  ;;  %v2137_v13 = vld [vmem:[%s3071_s0 + $0x1d0] sm:$0xf0]  ;;  %v1505_v14 = vld [vmem:[%s3071_s0] sm:$0xf]  ;;  %v1578_v18 = vor.u32 %v2101_v9, %v1577_v8  ;;  %v1650_v19 = vor.u32 %v2119_v11, %v1649_v10 }
   0x6   :  { %2226 = vmatpush.bf16.msra.mxu1 %v2157_v1  ;;  %2227 = vmatpush.bf16.msra.mxu2 %v2157_v1  ;;  %v2083_v15 = vld [vmem:[%s3071_s0 + $0x20] sm:$0xf0]  ;;  %v2174_v16 = vld [vmem:[%s3069_s1 + $0xb8] sm:$0xff]  ;;  %v1722_v20 = vor.u32 %v2137_v13, %v1721_v12  ;;  %v2173_v24 = vld [vmem:[%s3069_s1 + $0xb0] sm:$0xff] }
   0x7   :  { %2228 = vmatpush.bf16.msra.mxu3 %v2157_v1  ;;  %1043 = vmatpush.bf16.msra.mxu0 %v2157_v1  ;;  %v2166_v17 = vld [vmem:[%s3069_s1 + $0x78] sm:$0xff]  ;;  %v1506_v21 = vor.u32 %v2083_v15, %v1505_v14  ;;  %v2165_v25 = vld [vmem:[%s3069_s1 + $0x70] sm:$0xff]  ;;  %v2172_v28 = vld [vmem:[%s3069_s1 + $0xa8] sm:$0xff] }
   0x8   :  { %v2182_v22 = vld [vmem:[%s3069_s1 + $0xf8] sm:$0xff]  ;;  %v2181_v26 = vld [vmem:[%s3069_s1 + $0xf0] sm:$0xff]  ;;  %v2164_v29 = vld [vmem:[%s3069_s1 + $0x68] sm:$0xff] }
   0x9   :  { %v2190_v23 = vld [vmem:[%s3069_s1 + $0x138] sm:$0xff]  ;;  %v2189_v27 = vld [vmem:[%s3069_s1 + $0x130] sm:$0xff]  ;;  %v2180_v30 = vld [vmem:[%s3069_s1 + $0xe8] sm:$0xff] }
   0xa   :  { %2229 = vmatpush.bf16.msra.mxu1 %v2156_v2  ;;  %2230 = vmatpush.bf16.msra.mxu2 %v2156_v2  ;;  %v2188_v31 = vld [vmem:[%s3069_s1 + $0x128] sm:$0xff]  ;;  %v2171_v32 = vld [vmem:[%s3069_s1 + $0xa0] sm:$0xff]  ;;  %v1613_v36 = vld [vmem:[%s3071_s0 + $0xd8] sm:$0xf] }
   0xb   :  { %2231 = vmatpush.bf16.msra.mxu3 %v2156_v2  ;;  %1044 = vmatpush.bf16.msra.mxu0 %v2156_v2  ;;  %v2163_v33 = vld [vmem:[%s3069_s1 + $0x60] sm:$0xff]  ;;  %v2110_v37 = vld [vmem:[%s3071_s0 + $0xf8] sm:$0xf0]  ;;  %v1685_v38 = vld [vmem:[%s3071_s0 + $0x168] sm:$0xf] }
   0xc   :  { %v2179_v34 = vld [vmem:[%s3069_s1 + $0xe0] sm:$0xff]  ;;  %v2128_v39 = vld [vmem:[%s3071_s0 + $0x188] sm:$0xf0]  ;;  %v1757_v40 = vld [vmem:[%s3071_s0 + $0x1f8] sm:$0xf]  ;;  %v1614_v46 = vor.u32 %v2110_v37, %v1613_v36 }
   0xd   :  { %v2187_v35 = vld [vmem:[%s3069_s1 + $0x120] sm:$0xff]  ;;  %v2146_v41 = vld [vmem:[%s3071_s0 + $0x218] sm:$0xf0]  ;;  %v1541_v42 = vld [vmem:[%s3071_s0 + $0x48] sm:$0xf]  ;;  %v1686_v47 = vor.u32 %v2128_v39, %v1685_v38 }
   0xe   :  { %2232 = vmatpush.bf16.msra.mxu1 %v2155_v3  ;;  %2233 = vmatpush.bf16.msra.mxu2 %v2155_v3  ;;  %v2092_v43 = vld [vmem:[%s3071_s0 + $0x68] sm:$0xf0]  ;;  %v2170_v44 = vld [vmem:[%s3069_s1 + $0x98] sm:$0xff]  ;;  %v1758_v48 = vor.u32 %v2146_v41, %v1757_v40  ;;  %v2169_v52 = vld [vmem:[%s3069_s1 + $0x90] sm:$0xff] }
   0xf   :  { %2234 = vmatpush.bf16.msra.mxu3 %v2155_v3  ;;  %1045 = vmatpush.bf16.msra.mxu0 %v2155_v3  ;;  %v2162_v45 = vld [vmem:[%s3069_s1 + $0x58] sm:$0xff]  ;;  %v1542_v49 = vor.u32 %v2092_v43, %v1541_v42  ;;  %v2161_v53 = vld [vmem:[%s3069_s1 + $0x50] sm:$0xff]  ;;  %v2168_v56 = vld [vmem:[%s3069_s1 + $0x88] sm:$0xff] }
  0x10   :  { %v2178_v50 = vld [vmem:[%s3069_s1 + $0xd8] sm:$0xff]  ;;  %v2177_v54 = vld [vmem:[%s3069_s1 + $0xd0] sm:$0xff]  ;;  %v2160_v57 = vld [vmem:[%s3069_s1 + $0x48] sm:$0xff] }
  0x11   :  { %v2186_v51 = vld [vmem:[%s3069_s1 + $0x118] sm:$0xff]  ;;  %v2185_v55 = vld [vmem:[%s3069_s1 + $0x110] sm:$0xff]  ;;  %v2176_v58 = vld [vmem:[%s3069_s1 + $0xc8] sm:$0xff] }
  0x12   :  { %2235 = vmatpush.bf16.msra.mxu1 %v2154_v4  ;;  %2236 = vmatpush.bf16.msra.mxu2 %v2154_v4  ;;  %v2184_v59 = vld [vmem:[%s3069_s1 + $0x108] sm:$0xff]  ;;  %v2167_v60 = vld [vmem:[%s3069_s1 + $0x80] sm:$0xff]  ;;  %v2206_v2 = vld [vmem:[%s3069_s1 + $0x1b8] sm:$0xff] }
  0x13   :  { %2237 = vmatpush.bf16.msra.mxu3 %v2154_v4  ;;  %1046 = vmatpush.bf16.msra.mxu0 %v2154_v4  ;;  %v2159_v61 = vld [vmem:[%s3069_s1 + $0x40] sm:$0xff]  ;;  %v1507_v1 = vld [vmem:[%s3071_s0 + $0x24] sm:$0xf0]  ;;  %v2198_v3 = vld [vmem:[%s3069_s1 + $0x178] sm:$0xff] }
  0x14   :  { %v2079_v62 = vld [vmem:[%s3071_s0 + $0x4] sm:$0xf]  ;;  %v1513_v4 = vld [vmem:[%s3071_s0 + $0x8] sm:$0xf]  ;;  %v1521_v8 = vld [vmem:[%s3071_s0 + $0x10] sm:$0xf] }
  0x15   :  { %v2175_v63 = vld [vmem:[%s3069_s1 + $0xc0] sm:$0xff]  ;;  %v2085_v9 = vld [vmem:[%s3071_s0 + $0x30] sm:$0xf0]  ;;  %v2214_v10 = vld [vmem:[%s3069_s1 + $0x1f8] sm:$0xff]  ;;  %v1510_v12 = vor.u32 %v2079_v62, %v1507_v1 }
  0x16   :  { %2238 = vmatpush.bf16.msra.mxu1 %v2153_v5  ;;  %2239 = vmatpush.bf16.msra.mxu2 %v2153_v5  ;;  %v2183_v0 = vld [vmem:[%s3069_s1 + $0x100] sm:$0xff]  ;;  %v2222_v11 = vld [vmem:[%s3069_s1 + $0x238] sm:$0xff]  ;;  %v1522_v15 = vor.u32 %v2085_v9, %v1521_v8  ;;  %v2097_v40 = vld [vmem:[%s3071_s0 + $0x94] sm:$0xf] }
  0x17   :  { %2240 = vmatpush.bf16.msra.mxu3 %v2153_v5  ;;  %1047 = vmatpush.bf16.msra.mxu0 %v2153_v5  ;;  %v2084_v5 = vld [vmem:[%s3071_s0 + $0x28] sm:$0xf0]  ;;  %v2203_v36 = vld [vmem:[%s3069_s1 + $0x1a0] sm:$0xff]  ;;  %v1579_v41 = vld [vmem:[%s3071_s0 + $0xb4] sm:$0xf0] }
  0x18   :  { %v1514_v13 = vor.u32 %v2084_v5, %v1513_v4  ;;  %v2211_v37 = vld [vmem:[%s3069_s1 + $0x1e0] sm:$0xff]  ;;  %v1585_v42 = vld [vmem:[%s3071_s0 + $0x98] sm:$0xf]  ;;  %v2102_v43 = vld [vmem:[%s3071_s0 + $0xb8] sm:$0xf0] }
  0x19   :  { %v2195_v38 = vld [vmem:[%s3069_s1 + $0x160] sm:$0xff]  ;;  %v1629_v62 = vld [vmem:[%s3071_s0 + $0xe8] sm:$0xf]  ;;  %v2201_v4 = vld [vmem:[%s3069_s1 + $0x190] sm:$0xff] }
  0x1a   :  { %2241 = vmatpush.bf16.msra.mxu1 %v2152_v6  ;;  %2242 = vmatpush.bf16.msra.mxu2 %v2152_v6  ;;  %v2219_v39 = vld [vmem:[%s3069_s1 + $0x220] sm:$0xff]  ;;  %v2209_v5 = vld [vmem:[%s3069_s1 + $0x1d0] sm:$0xff]  ;;  %v1651_v9 = vld [vmem:[%s3071_s0 + $0x144] sm:$0xf0] }
  0x1b   :  { %2243 = vmatpush.bf16.msra.mxu3 %v2152_v6  ;;  %1048 = vmatpush.bf16.msra.mxu0 %v2152_v6  ;;  %v2080_v6 = vld [vmem:[%s3071_s0 + $0xc] sm:$0xf]  ;;  %v2115_v8 = vld [vmem:[%s3071_s0 + $0x124] sm:$0xf] }
  0x1e   :  { %2244 = vmatpush.bf16.msra.mxu1 %v2151_v7  ;;  %2245 = vmatpush.bf16.msra.mxu2 %v2151_v7 }
  0x1f   :  { %2246 = vmatpush.bf16.msra.mxu3 %v2151_v7  ;;  %1049 = vmatpush.bf16.msra.mxu0 %v2151_v7  ;;  %v1515_v7 = vld [vmem:[%s3071_s0 + $0x2c] sm:$0xf0] }
  0x20   :  { %v1518_v14 = vor.u32 %v2080_v6, %v1515_v7  ;;  %v2193_v6 = vld [vmem:[%s3069_s1 + $0x150] sm:$0xff] }
  0x21   :  { %1060 = vmatmul.bf16.vlgmr.msra.gmra.mxu1 %v1578_v18  ;;  %1070 = vmatmul.bf16.vlgmr.msra.gmra.mxu2 %v1650_v19  ;;  %v2213_v18 = vld [vmem:[%s3069_s1 + $0x1f0] sm:$0xff] }
  0x22   :  { %1140 = vmatpush.bf16.msrb.mxu2 %v2174_v16  ;;  %1091 = vmatpush.bf16.msrb.mxu1 %v2166_v17  ;;  %v2205_v16 = vld [vmem:[%s3069_s1 + $0x1b0] sm:$0xff] }
  0x23   :  { %1080 = vmatmul.bf16.vlgmr.msra.gmra.mxu3 %v1722_v20  ;;  %1050 = vmatmul.bf16.vlgmr.msra.gmra.mxu0 %v1506_v21  ;;  %v2197_v17 = vld [vmem:[%s3069_s1 + $0x170] sm:$0xff]  ;;  %v2204_v20 = vld [vmem:[%s3069_s1 + $0x1a8] sm:$0xff] }
  0x24   :  { %1189 = vmatpush.bf16.msrb.mxu3 %v2182_v22  ;;  %1238 = vmatpush.bf16.msrb.mxu0 %v2190_v23  ;;  %v2221_v19 = vld [vmem:[%s3069_s1 + $0x230] sm:$0xff]  ;;  %v2196_v21 = vld [vmem:[%s3069_s1 + $0x168] sm:$0xff] }
  0x25   :  { %v2212_v22 = vld [vmem:[%s3069_s1 + $0x1e8] sm:$0xff]  ;;  %v2217_v7 = vld [vmem:[%s3069_s1 + $0x210] sm:$0xff] }
  0x26   :  { %1141 = vmatpush.bf16.msrb.mxu2 %v2173_v24  ;;  %1092 = vmatpush.bf16.msrb.mxu1 %v2165_v25  ;;  %v2220_v23 = vld [vmem:[%s3069_s1 + $0x228] sm:$0xff]  ;;  %v1543_v25 = vld [vmem:[%s3071_s0 + $0x6c] sm:$0xf0] }
  0x27   :  { %v2088_v24 = vld [vmem:[%s3071_s0 + $0x4c] sm:$0xf] }
  0x28   :  { %1190 = vmatpush.bf16.msrb.mxu3 %v2181_v26  ;;  %1239 = vmatpush.bf16.msrb.mxu0 %v2189_v27  ;;  %v1549_v26 = vld [vmem:[%s3071_s0 + $0x50] sm:$0xf]  ;;  %v2093_v27 = vld [vmem:[%s3071_s0 + $0x70] sm:$0xf0] }
  0x2a   :  { %1142 = vmatpush.bf16.msrb.mxu2 %v2172_v28  ;;  %1093 = vmatpush.bf16.msrb.mxu1 %v2164_v29  ;;  %v2089_v28 = vld [vmem:[%s3071_s0 + $0x54] sm:$0xf]  ;;  %v1551_v29 = vld [vmem:[%s3071_s0 + $0x74] sm:$0xf0] }
  0x2c   :  { %1191 = vmatpush.bf16.msrb.mxu3 %v2180_v30  ;;  %1240 = vmatpush.bf16.msrb.mxu0 %v2188_v31  ;;  %v1557_v30 = vld [vmem:[%s3071_s0 + $0x58] sm:$0xf]  ;;  %v2094_v31 = vld [vmem:[%s3071_s0 + $0x78] sm:$0xf0] }
  0x2e   :  { %1143 = vmatpush.bf16.msrb.mxu2 %v2171_v32  ;;  %1094 = vmatpush.bf16.msrb.mxu1 %v2163_v33  ;;  %v1546_v32 = vor.u32 %v2088_v24, %v1543_v25  ;;  %v1550_v33 = vor.u32 %v2093_v27, %v1549_v26  ;;  %v2124_v24 = vld [vmem:[%s3071_s0 + $0x16c] sm:$0xf]  ;;  %v1687_v25 = vld [vmem:[%s3071_s0 + $0x18c] sm:$0xf0]  ;;  %v2129_v27 = vld [vmem:[%s3071_s0 + $0x190] sm:$0xf0] }
  0x2f   :  { %v1693_v26 = vld [vmem:[%s3071_s0 + $0x170] sm:$0xf] }
  0x30   :  { %1192 = vmatpush.bf16.msrb.mxu3 %v2179_v34  ;;  %1241 = vmatpush.bf16.msrb.mxu0 %v2187_v35  ;;  %v1554_v34 = vor.u32 %v2089_v28, %v1551_v29  ;;  %v1558_v35 = vor.u32 %v2094_v31, %v1557_v30  ;;  %v2125_v28 = vld [vmem:[%s3071_s0 + $0x174] sm:$0xf]  ;;  %v1695_v29 = vld [vmem:[%s3071_s0 + $0x194] sm:$0xf0]  ;;  %v2130_v31 = vld [vmem:[%s3071_s0 + $0x198] sm:$0xf0] }
  0x31   :  { %1065 = vmatmul.bf16.gmra.mxu1 %v1614_v46  ;;  %1075 = vmatmul.bf16.gmra.mxu2 %v1686_v47  ;;  %v1593_v46 = vld [vmem:[%s3071_s0 + $0xa0] sm:$0xf]  ;;  %v2103_v47 = vld [vmem:[%s3071_s0 + $0xc0] sm:$0xf0]  ;;  %v1701_v30 = vld [vmem:[%s3071_s0 + $0x178] sm:$0xf] }
  0x32   :  { %1144 = vmatpush.bf16.msrb.mxu2 %v2170_v44  ;;  %1095 = vmatpush.bf16.msrb.mxu1 %v2162_v45  ;;  %v2098_v44 = vld [vmem:[%s3071_s0 + $0x9c] sm:$0xf]  ;;  %v1587_v45 = vld [vmem:[%s3071_s0 + $0xbc] sm:$0xf0] }
  0x33   :  { %1085 = vmatmul.bf16.gmra.mxu3 %v1758_v48  ;;  %1055 = vmatmul.bf16.gmra.mxu0 %v1542_v49  ;;  %v1582_v48 = vor.u32 %v2097_v40, %v1579_v41  ;;  %v1586_v49 = vor.u32 %v2102_v43, %v1585_v42  ;;  %v2133_v40 = vld [vmem:[%s3071_s0 + $0x1b4] sm:$0xf]  ;;  %v1723_v41 = vld [vmem:[%s3071_s0 + $0x1d4] sm:$0xf0]  ;;  %v2138_v43 = vld [vmem:[%s3071_s0 + $0x1d8] sm:$0xf0] }
  0x34   :  { %1193 = vmatpush.bf16.msrb.mxu3 %v2178_v50  ;;  %1242 = vmatpush.bf16.msrb.mxu0 %v2186_v51  ;;  %v1590_v50 = vor.u32 %v2098_v44, %v1587_v45  ;;  %v1594_v51 = vor.u32 %v2103_v47, %v1593_v46  ;;  %v1729_v42 = vld [vmem:[%s3071_s0 + $0x1b8] sm:$0xf]  ;;  %v2134_v44 = vld [vmem:[%s3071_s0 + $0x1bc] sm:$0xf]  ;;  %v1731_v45 = vld [vmem:[%s3071_s0 + $0x1dc] sm:$0xf0] }
  0x35   :  { %v1737_v46 = vld [vmem:[%s3071_s0 + $0x1c0] sm:$0xf]  ;;  %v2139_v47 = vld [vmem:[%s3071_s0 + $0x1e0] sm:$0xf0] }
  0x36   :  { %1145 = vmatpush.bf16.msrb.mxu2 %v2169_v52  ;;  %1096 = vmatpush.bf16.msrb.mxu1 %v2161_v53  ;;  %v2202_v52 = vld [vmem:[%s3069_s1 + $0x198] sm:$0xff] }
  0x37   :  { %v2210_v53 = vld [vmem:[%s3069_s1 + $0x1d8] sm:$0xff] }
  0x38   :  { %1194 = vmatpush.bf16.msrb.mxu3 %v2177_v54  ;;  %1243 = vmatpush.bf16.msrb.mxu0 %v2185_v55  ;;  %v2194_v54 = vld [vmem:[%s3069_s1 + $0x158] sm:$0xff] }
  0x39   :  { %v2218_v55 = vld [vmem:[%s3069_s1 + $0x218] sm:$0xff] }
  0x3a   :  { %1146 = vmatpush.bf16.msrb.mxu2 %v2168_v56  ;;  %1097 = vmatpush.bf16.msrb.mxu1 %v2160_v57  ;;  %v2106_v56 = vld [vmem:[%s3071_s0 + $0xdc] sm:$0xf]  ;;  %v1615_v57 = vld [vmem:[%s3071_s0 + $0xfc] sm:$0xf0] }
  0x3c   :  { %1195 = vmatpush.bf16.msrb.mxu3 %v2176_v58  ;;  %1244 = vmatpush.bf16.msrb.mxu0 %v2184_v59  ;;  %v1621_v58 = vld [vmem:[%s3071_s0 + $0xe0] sm:$0xf]  ;;  %v2111_v59 = vld [vmem:[%s3071_s0 + $0x100] sm:$0xf0] }
  0x3d   :  { %v1622_v1 = vor.u32 %v2111_v59, %v1621_v58 }
  0x3e   :  { %1147 = vmatpush.bf16.msrb.mxu2 %v2167_v60  ;;  %1098 = vmatpush.bf16.msrb.mxu1 %v2159_v61  ;;  %v2107_v60 = vld [vmem:[%s3071_s0 + $0xe4] sm:$0xf]  ;;  %v1623_v61 = vld [vmem:[%s3071_s0 + $0x104] sm:$0xf0] }
  0x40   :  { %1196 = vmatpush.bf16.msrb.mxu3 %v2175_v63  ;;  %1245 = vmatpush.bf16.msrb.mxu0 %v2183_v0  ;;  %v2112_v63 = vld [vmem:[%s3071_s0 + $0x108] sm:$0xf0]  ;;  %v1618_v0 = vor.u32 %v2106_v56, %v1615_v57 }
  0x41   :  { %1099 = vmatmul.bf16.vlgmr.msrb.gmra.mxu1 %v1510_v12  ;;  %1148 = vmatmul.bf16.vlgmr.msrb.gmra.mxu2 %v1514_v13  ;;  %v2116_v12 = vld [vmem:[%s3071_s0 + $0x12c] sm:$0xf]  ;;  %v1659_v13 = vld [vmem:[%s3071_s0 + $0x14c] sm:$0xf0] }
  0x42   :  { %1336 = vmatpush.bf16.msra.mxu2 %v2206_v2  ;;  %1287 = vmatpush.bf16.msra.mxu1 %v2198_v3  ;;  %v1626_v2 = vor.u32 %v2107_v60, %v1623_v61  ;;  %v1630_v3 = vor.u32 %v2112_v63, %v1629_v62  ;;  %v2142_v61 = vld [vmem:[%s3071_s0 + $0x1fc] sm:$0xf]  ;;  %v1759_v62 = vld [vmem:[%s3071_s0 + $0x21c] sm:$0xf0] }
  0x43   :  { %1197 = vmatmul.bf16.vlgmr.msrb.gmra.mxu3 %v1518_v14  ;;  %1246 = vmatmul.bf16.vlgmr.msrb.gmra.mxu0 %v1522_v15  ;;  %v1665_v14 = vld [vmem:[%s3071_s0 + $0x130] sm:$0xf]  ;;  %v2121_v15 = vld [vmem:[%s3071_s0 + $0x150] sm:$0xf0]  ;;  %v1765_v63 = vld [vmem:[%s3071_s0 + $0x200] sm:$0xf] }
  0x44   :  { %1385 = vmatpush.bf16.msra.mxu3 %v2214_v10  ;;  %1434 = vmatpush.bf16.msra.mxu0 %v2222_v11  ;;  %v1657_v10 = vld [vmem:[%s3071_s0 + $0x128] sm:$0xf]  ;;  %v2120_v11 = vld [vmem:[%s3071_s0 + $0x148] sm:$0xf0] }
  0x46   :  { %1337 = vmatpush.bf16.msra.mxu2 %v2205_v16  ;;  %1288 = vmatpush.bf16.msra.mxu1 %v2197_v17  ;;  %v1654_v16 = vor.u32 %v2115_v8, %v1651_v9  ;;  %v1658_v17 = vor.u32 %v2120_v11, %v1657_v10  ;;  %v1762_v8 = vor.u32 %v2142_v61, %v1759_v62  ;;  %v1573_v61 = vld [vmem:[%s3071_s0 + $0x68] sm:$0xf]  ;;  %v2096_v62 = vld [vmem:[%s3071_s0 + $0x88] sm:$0xf0] }
  0x48   :  { %1386 = vmatpush.bf16.msra.mxu3 %v2213_v18  ;;  %1435 = vmatpush.bf16.msra.mxu0 %v2221_v19  ;;  %v1662_v18 = vor.u32 %v2116_v12, %v1659_v13  ;;  %v1666_v19 = vor.u32 %v2121_v15, %v1665_v14 }
  0x4a   :  { %1338 = vmatpush.bf16.msra.mxu2 %v2204_v20  ;;  %1289 = vmatpush.bf16.msra.mxu1 %v2196_v21  ;;  %v2200_v20 = vld [vmem:[%s3069_s1 + $0x188] sm:$0xff] }
  0x4b   :  { %v2208_v21 = vld [vmem:[%s3069_s1 + $0x1c8] sm:$0xff] }
  0x4c   :  { %1387 = vmatpush.bf16.msra.mxu3 %v2212_v22  ;;  %1436 = vmatpush.bf16.msra.mxu0 %v2220_v23  ;;  %v2192_v22 = vld [vmem:[%s3069_s1 + $0x148] sm:$0xff] }
  0x4d   :  { %v2216_v23 = vld [vmem:[%s3069_s1 + $0x208] sm:$0xff] }
  0x4e   :  { %1339 = vmatpush.bf16.msra.mxu2 %v2203_v36  ;;  %1290 = vmatpush.bf16.msra.mxu1 %v2195_v38  ;;  %v2199_v36 = vld [vmem:[%s3069_s1 + $0x180] sm:$0xff] }
  0x4f   :  { %v2191_v38 = vld [vmem:[%s3069_s1 + $0x140] sm:$0xff] }
  0x50   :  { %1388 = vmatpush.bf16.msra.mxu3 %v2211_v37  ;;  %1437 = vmatpush.bf16.msra.mxu0 %v2219_v39  ;;  %v2207_v37 = vld [vmem:[%s3069_s1 + $0x1c0] sm:$0xff] }
  0x51   :  { %1104 = vmatmul.bf16.gmra.mxu1 %v1546_v32  ;;  %1153 = vmatmul.bf16.gmra.mxu2 %v1550_v33  ;;  %v1690_v32 = vor.u32 %v2124_v24, %v1687_v25  ;;  %v1694_v33 = vor.u32 %v2129_v27, %v1693_v26  ;;  %v2215_v39 = vld [vmem:[%s3069_s1 + $0x200] sm:$0xff]  ;;  %v2086_v24 = vld [vmem:[%s3071_s0 + $0x38] sm:$0xf0] }
  0x52   :  { %1340 = vmatpush.bf16.msra.mxu2 %v2202_v52  ;;  %1291 = vmatpush.bf16.msra.mxu1 %v2194_v54  ;;  %v1738_v52 = vor.u32 %v2139_v47, %v1737_v46  ;;  %v2705_v54 = vld [vmem:[%s3070_s2] ss:$0 sm:$0xff]  ;;  %v2082_v25 = vld [vmem:[%s3071_s0 + $0x1c] sm:$0xf] }
  0x53   :  { %1202 = vmatmul.bf16.gmra.mxu3 %v1554_v34  ;;  %1251 = vmatmul.bf16.gmra.mxu0 %v1558_v35  ;;  %v1698_v34 = vor.u32 %v2125_v28, %v1695_v29  ;;  %v1702_v35 = vor.u32 %v2130_v31, %v1701_v30  ;;  %v1531_v26 = vld [vmem:[%s3071_s0 + $0x3c] sm:$0xf0]  ;;  %v2087_v28 = vld [vmem:[%s3071_s0 + $0x40] sm:$0xf0] }
  0x54   :  { %1389 = vmatpush.bf16.msra.mxu3 %v2210_v53  ;;  %1438 = vmatpush.bf16.msra.mxu0 %v2218_v55  ;;  %v1537_v27 = vld [vmem:[%s3071_s0 + $0x20] sm:$0xf] }
  0x56   :  { %1341 = vmatpush.bf16.msra.mxu2 %v2201_v4  ;;  %1292 = vmatpush.bf16.msra.mxu1 %v2193_v6  ;;  %v2148_v4 = vld [vmem:[%s3071_s0 + $0x228] sm:$0xf0] }
  0x58   :  { %1390 = vmatpush.bf16.msra.mxu3 %v2209_v5  ;;  %1439 = vmatpush.bf16.msra.mxu0 %v2217_v7 }
  0x5a   :  { %1342 = vmatpush.bf16.msra.mxu2 %v2200_v20  ;;  %1293 = vmatpush.bf16.msra.mxu1 %v2192_v22  ;;  %v1523_v22 = vld [vmem:[%s3071_s0 + $0x34] sm:$0xf0] }
  0x5c   :  { %1391 = vmatpush.bf16.msra.mxu3 %v2208_v21  ;;  %1440 = vmatpush.bf16.msra.mxu0 %v2216_v23  ;;  %v2081_v21 = vld [vmem:[%s3071_s0 + $0x14] sm:$0xf]  ;;  %v1529_v23 = vld [vmem:[%s3071_s0 + $0x18] sm:$0xf] }
  0x5e   :  { %1343 = vmatpush.bf16.msra.mxu2 %v2199_v36  ;;  %1294 = vmatpush.bf16.msra.mxu1 %v2191_v38  ;;  %v1538_v38 = vor.u32 %v2087_v28, %v1537_v27  ;;  %v2099_v27 = vld [vmem:[%s3071_s0 + $0xa4] sm:$0xf]  ;;  %v1595_v28 = vld [vmem:[%s3071_s0 + $0xc4] sm:$0xf0] }
  0x60   :  { %1392 = vmatpush.bf16.msra.mxu3 %v2207_v37  ;;  %1441 = vmatpush.bf16.msra.mxu0 %v2215_v39  ;;  %v1534_v37 = vor.u32 %v2082_v25, %v1531_v26 }
  0x61   :  { %1109 = vmatmul.bf16.gmra.mxu1 %v1582_v48  ;;  %1158 = vmatmul.bf16.gmra.mxu2 %v1586_v49  ;;  %v1726_v48 = vor.u32 %v2133_v40, %v1723_v41  ;;  %v1730_v49 = vor.u32 %v2138_v43, %v1729_v42 }
  0x63   :  { %1207 = vmatmul.bf16.gmra.mxu3 %v1590_v50  ;;  %1256 = vmatmul.bf16.gmra.mxu0 %v1594_v51  ;;  %v1734_v51 = vor.u32 %v2134_v44, %v1731_v45 }
  0x71   :  { %1114 = vmatmul.bf16.gmra.mxu1 %v1618_v0  ;;  %1163 = vmatmul.bf16.gmra.mxu2 %v1622_v1  ;;  %v2147_v0 = vld [vmem:[%s3071_s0 + $0x220] sm:$0xf0] }
  0x72   :  { %v2143_v1 = vld [vmem:[%s3071_s0 + $0x204] sm:$0xf]  ;;  %v1766_v9 = vor.u32 %v2147_v0, %v1765_v63 }
  0x73   :  { %1212 = vmatmul.bf16.gmra.mxu3 %v1626_v2  ;;  %1261 = vmatmul.bf16.gmra.mxu0 %v1630_v3  ;;  %v1767_v2 = vld [vmem:[%s3071_s0 + $0x224] sm:$0xf0] }
  0x74   :  { %v1773_v3 = vld [vmem:[%s3071_s0 + $0x208] sm:$0xf]  ;;  %v1770_v12 = vor.u32 %v2143_v1, %v1767_v2 }
  0x75   :  { %v1774_v13 = vor.u32 %v2148_v4, %v1773_v3 }
  0x81   :  { %1119 = vmatmul.bf16.gmra.mxu1 %v1654_v16  ;;  %1168 = vmatmul.bf16.gmra.mxu2 %v1658_v17 }
  0x83   :  { %1217 = vmatmul.bf16.gmra.mxu3 %v1662_v18  ;;  %1266 = vmatmul.bf16.gmra.mxu0 %v1666_v19 }
  0x91   :  { %1124 = vmatmul.bf16.gmra.mxu1 %v1690_v32  ;;  %1173 = vmatmul.bf16.gmra.mxu2 %v1694_v33  ;;  %v1526_v33 = vor.u32 %v2081_v21, %v1523_v22 }
  0x93   :  { %1222 = vmatmul.bf16.gmra.mxu3 %v1698_v34  ;;  %1271 = vmatmul.bf16.gmra.mxu0 %v1702_v35  ;;  %v1530_v34 = vor.u32 %v2086_v24, %v1529_v23 }
  0x9e   :  { %v2700_v50 = vpop.f32.mrf.mxu1 }
  0xa0   :  { %v1051_v53 = vpop.f32.mrf.mxu0 }
  0xa1   :  { %1129 = vmatmul.bf16.gmra.mxu1 %v1726_v48  ;;  %1178 = vmatmul.bf16.gmra.mxu2 %v1730_v49  ;;  %v1052_v30 = vadd.f32 %v2705_v54, %v1051_v53  ;;  %v2090_v49 = vld [vmem:[%s3071_s0 + $0x5c] sm:$0xf]  ;;  %v1565_v53 = vld [vmem:[%s3071_s0 + $0x60] sm:$0xf] }
  0xa3   :  { %1227 = vmatmul.bf16.gmra.mxu3 %v1734_v51  ;;  %1276 = vmatmul.bf16.gmra.mxu0 %v1738_v52  ;;  %v1559_v51 = vld [vmem:[%s3071_s0 + $0x7c] sm:$0xf0] }
  0xa4   :  { %v1071_v55 = vpop.f32.mrf.mxu2  ;;  %v1562_v3 = vor.u32 %v2090_v49, %v1559_v51 }
  0xa5   :  { %v2708_v56 = vadd.f32 %v2705_v54, %v1071_v55  ;;  %v2095_v55 = vld [vmem:[%s3071_s0 + $0x80] sm:$0xf0] }
  0xa6   :  { %v1081_v57 = vpop.f32.mrf.mxu3  ;;  %v2713_v59 = vpop.f32.mrf.mxu1  ;;  %v1566_v4 = vor.u32 %v2095_v55, %v1565_v53 }
  0xa7   :  { %v2711_v58 = vadd.f32 %v2705_v54, %v1081_v57  ;;  %v2091_v57 = vld [vmem:[%s3071_s0 + $0x64] sm:$0xf] }
  0xa8   :  { %v1053_v60 = vpop.f32.mrf.mxu0 }
  0xa9   :  { %v1054_v42 = vadd.f32 %v2705_v54, %v1053_v60  ;;  %v1567_v60 = vld [vmem:[%s3071_s0 + $0x84] sm:$0xf0] }
  0xac   :  { %v1073_v5 = vpop.f32.mrf.mxu2 }
  0xad   :  { %v2740_v6 = vadd.f32 %v2705_v54, %v1073_v5 }
  0xae   :  { %v1083_v7 = vpop.f32.mrf.mxu3  ;;  %v2745_v11 = vpop.f32.mrf.mxu1 }
  0xaf   :  { %v2743_v10 = vadd.f32 %v2705_v54, %v1083_v7  ;;  %v1570_v7 = vor.u32 %v2091_v57, %v1567_v60 }
  0xb0   :  { %v1056_v14 = vpop.f32.mrf.mxu0 }
  0xb1   :  { %1134 = vmatmul.bf16.gmra.mxu1 %v1762_v8  ;;  %1183 = vmatmul.bf16.gmra.mxu2 %v1766_v9  ;;  %v1057_v0 = vadd.f32 %v2705_v54, %v1056_v14  ;;  %v1574_v8 = vor.u32 %v2096_v62, %v1573_v61 }
  0xb3   :  { %1232 = vmatmul.bf16.gmra.mxu3 %v1770_v12  ;;  %1281 = vmatmul.bf16.gmra.mxu0 %v1774_v13 }
  0xb4   :  { %v1076_v15 = vpop.f32.mrf.mxu2 }
  0xb5   :  { %v2748_v16 = vadd.f32 %v2705_v54, %v1076_v15 }
  0xb6   :  { %v1086_v17 = vpop.f32.mrf.mxu3  ;;  %v2753_v19 = vpop.f32.mrf.mxu1 }
  0xb7   :  { %v2751_v18 = vadd.f32 %v2705_v54, %v1086_v17 }
  0xb8   :  { %v1058_v20 = vpop.f32.mrf.mxu0 }
  0xb9   :  { %v1059_v21 = vadd.f32 %v2705_v54, %v1058_v20  ;;  %v1601_v20 = vld [vmem:[%s3071_s0 + $0xa8] sm:$0xf] }
  0xbc   :  { %v1078_v29 = vpop.f32.mrf.mxu2 }
  0xbd   :  { %v2781_v31 = vadd.f32 %v2705_v54, %v1078_v29 }
  0xbe   :  { %v1088_v32 = vpop.f32.mrf.mxu3  ;;  %v1100_v36 = vpop.f32.mrf.mxu1 }
  0xbf   :  { %v2784_v35 = vadd.f32 %v2705_v54, %v1088_v32  ;;  %v1101_v39 = vadd.f32 %v1100_v36, %v1052_v30  ;;  %v2104_v30 = vld [vmem:[%s3071_s0 + $0xc8] sm:$0xf0]  ;;  %v2105_v36 = vld [vmem:[%s3071_s0 + $0xd0] sm:$0xf0] }
  0xc0   :  { %v1247_v40 = vpop.f32.mrf.mxu0  ;;  %v2100_v32 = vld [vmem:[%s3071_s0 + $0xac] sm:$0xf] }
  0xc1   :  { %1295 = vmatmul.bf16.vlgmr.msra.gmra.mxu1 %v1526_v33  ;;  %1344 = vmatmul.bf16.vlgmr.msra.gmra.mxu2 %v1530_v34  ;;  %v1603_v33 = vld [vmem:[%s3071_s0 + $0xcc] sm:$0xf0] }
  0xc2   :  { %v1609_v34 = vld [vmem:[%s3071_s0 + $0xb0] sm:$0xf] }
  0xc3   :  { %1393 = vmatmul.bf16.vlgmr.msra.gmra.mxu3 %v1534_v37  ;;  %1442 = vmatmul.bf16.vlgmr.msra.gmra.mxu0 %v1538_v38  ;;  %v1062_v38 = vadd.f32 %v2705_v54, %v2700_v50  ;;  %v1064_v50 = vadd.f32 %v2705_v54, %v2713_v59  ;;  %v1637_v59 = vld [vmem:[%s3071_s0 + $0xf0] sm:$0xf] }
  0xc4   :  { %v1149_v41 = vpop.f32.mrf.mxu2 }
  0xc5   :  { %v1150_v43 = vadd.f32 %v1149_v41, %v1101_v39  ;;  %v1598_v41 = vor.u32 %v2099_v27, %v1595_v28 }
  0xc6   :  { %v1198_v44 = vpop.f32.mrf.mxu3  ;;  %v1102_v45 = vpop.f32.mrf.mxu1 }
  0xc7   :  { %v1199_v46 = vadd.f32 %v1198_v44, %v1150_v43  ;;  %v1103_v47 = vadd.f32 %v1102_v45, %v1054_v42  ;;  %v1602_v42 = vor.u32 %v2104_v30, %v1601_v20  ;;  %v1606_v44 = vor.u32 %v2100_v32, %v1603_v33 }
  0xc8   :  { %v1249_v48 = vpop.f32.mrf.mxu0  ;;  %v1610_v45 = vor.u32 %v2105_v36, %v1609_v34 }
  0xc9   :  { %v2793_v52 = vadd.f32 %v1247_v40, %v1199_v46 }
  0xcc   :  { %v1151_v63 = vpop.f32.mrf.mxu2 }
  0xcd   :  { %v1152_v1 = vadd.f32 %v1151_v63, %v1103_v47  ;;  %v2108_v63 = vld [vmem:[%s3071_s0 + $0xec] sm:$0xf] }
  0xce   :  { %v1200_v2 = vpop.f32.mrf.mxu3  ;;  %v1105_v5 = vpop.f32.mrf.mxu1 }
  0xcf   :  { %v1201_v9 = vadd.f32 %v1200_v2, %v1152_v1  ;;  %v1106_v12 = vadd.f32 %v1105_v5, %v1057_v0  ;;  %v1631_v0 = vld [vmem:[%s3071_s0 + $0x10c] sm:$0xf0]  ;;  %v2113_v2 = vld [vmem:[%s3071_s0 + $0x110] sm:$0xf0]  ;;  %v1645_v5 = vld [vmem:[%s3071_s0 + $0xf8] sm:$0xf] }
  0xd0   :  { %v1252_v13 = vpop.f32.mrf.mxu0 }
  0xd1   :  { %1300 = vmatmul.bf16.gmra.mxu1 %v1562_v3  ;;  %1349 = vmatmul.bf16.gmra.mxu2 %v1566_v4  ;;  %v2814_v15 = vadd.f32 %v1249_v48, %v1201_v9  ;;  %v2109_v3 = vld [vmem:[%s3071_s0 + $0xf4] sm:$0xf]  ;;  %v1639_v4 = vld [vmem:[%s3071_s0 + $0x114] sm:$0xf0]  ;;  %v1067_v9 = vadd.f32 %v2705_v54, %v2745_v11  ;;  %v1069_v11 = vadd.f32 %v2705_v54, %v2753_v19  ;;  %v2122_v19 = vld [vmem:[%s3071_s0 + $0x158] sm:$0xf0] }
  0xd2   :  { %v1673_v54 = vld [vmem:[%s3071_s0 + $0x138] sm:$0xf] }
  0xd3   :  { %1398 = vmatmul.bf16.gmra.mxu3 %v1570_v7  ;;  %1447 = vmatmul.bf16.gmra.mxu0 %v1574_v8  ;;  %v2114_v7 = vld [vmem:[%s3071_s0 + $0x118] sm:$0xf0] }
  0xd4   :  { %v1154_v17 = vpop.f32.mrf.mxu2 }
  0xd5   :  { %v1155_v14 = vadd.f32 %v1154_v17, %v1106_v12  ;;  %v1634_v17 = vor.u32 %v2108_v63, %v1631_v0 }
  0xd6   :  { %v1203_v22 = vpop.f32.mrf.mxu3  ;;  %v1107_v23 = vpop.f32.mrf.mxu1 }
  0xd7   :  { %v1204_v24 = vadd.f32 %v1203_v22, %v1155_v14  ;;  %v1108_v25 = vadd.f32 %v1107_v23, %v1059_v21  ;;  %v1638_v21 = vor.u32 %v2113_v2, %v1637_v59  ;;  %v1642_v22 = vor.u32 %v2109_v3, %v1639_v4 }
  0xd8   :  { %v1254_v26 = vpop.f32.mrf.mxu0  ;;  %v1646_v23 = vor.u32 %v2114_v7, %v1645_v5  ;;  %v2126_v5 = vld [vmem:[%s3071_s0 + $0x17c] sm:$0xf] }
  0xd9   :  { %v2823_v29 = vadd.f32 %v1252_v13, %v1204_v24 }
  0xdc   :  { %v1156_v37 = vpop.f32.mrf.mxu2 }
  0xdd   :  { %v1157_v39 = vadd.f32 %v1156_v37, %v1108_v25  ;;  %v2117_v37 = vld [vmem:[%s3071_s0 + $0x134] sm:$0xf] }
  0xde   :  { %v1205_v40 = vpop.f32.mrf.mxu3  ;;  %v1110_v43 = vpop.f32.mrf.mxu1 }
  0xdf   :  { %v1206_v46 = vadd.f32 %v1205_v40, %v1157_v39  ;;  %v1111_v47 = vadd.f32 %v1110_v43, %v1062_v38  ;;  %v1667_v38 = vld [vmem:[%s3071_s0 + $0x154] sm:$0xf0]  ;;  %v2118_v40 = vld [vmem:[%s3071_s0 + $0x13c] sm:$0xf]  ;;  %v2123_v43 = vld [vmem:[%s3071_s0 + $0x160] sm:$0xf0] }
  0xe0   :  { %v1257_v48 = vpop.f32.mrf.mxu0 }
  0xe1   :  { %1305 = vmatmul.bf16.gmra.mxu1 %v1598_v41  ;;  %1354 = vmatmul.bf16.gmra.mxu2 %v1602_v42  ;;  %v2845_v49 = vadd.f32 %v1254_v26, %v1206_v46  ;;  %v1675_v41 = vld [vmem:[%s3071_s0 + $0x15c] sm:$0xf0] }
  0xe2   :  { %v1681_v42 = vld [vmem:[%s3071_s0 + $0x140] sm:$0xf] }
  0xe3   :  { %1403 = vmatmul.bf16.gmra.mxu3 %v1606_v44  ;;  %1452 = vmatmul.bf16.gmra.mxu0 %v1610_v45 }
  0xe4   :  { %v1159_v51 = vpop.f32.mrf.mxu2 }
  0xe5   :  { %v1160_v53 = vadd.f32 %v1159_v51, %v1111_v47  ;;  %v1670_v47 = vor.u32 %v2117_v37, %v1667_v38 }
  0xe6   :  { %v1208_v55 = vpop.f32.mrf.mxu3  ;;  %v1112_v57 = vpop.f32.mrf.mxu1 }
  0xe7   :  { %v1209_v60 = vadd.f32 %v1208_v55, %v1160_v53  ;;  %v1113_v61 = vadd.f32 %v1112_v57, %v1064_v50  ;;  %v1678_v50 = vor.u32 %v2118_v40, %v1675_v41  ;;  %v1682_v53 = vor.u32 %v2123_v43, %v1681_v42  ;;  %v2135_v40 = vld [vmem:[%s3071_s0 + $0x1c4] sm:$0xf]  ;;  %v1745_v42 = vld [vmem:[%s3071_s0 + $0x1c8] sm:$0xf]  ;;  %v2140_v43 = vld [vmem:[%s3071_s0 + $0x1e8] sm:$0xf0] }
  0xe8   :  { %v1259_v62 = vpop.f32.mrf.mxu0 }
  0xe9   :  { %v2855_v1 = vadd.f32 %v1257_v48, %v1209_v60  ;;  %v1674_v48 = vor.u32 %v2122_v19, %v1673_v54 }
  0xec   :  { %v1161_v8 = vpop.f32.mrf.mxu2 }
  0xed   :  { %v1162_v12 = vadd.f32 %v1161_v8, %v1113_v61  ;;  %v1709_v8 = vld [vmem:[%s3071_s0 + $0x180] sm:$0xf] }
  0xee   :  { %v1210_v13 = vpop.f32.mrf.mxu3  ;;  %v1115_v14 = vpop.f32.mrf.mxu1 }
  0xef   :  { %v1211_v24 = vadd.f32 %v1210_v13, %v1162_v12  ;;  %v1116_v25 = vadd.f32 %v1115_v14, %v1067_v9  ;;  %v2131_v9 = vld [vmem:[%s3071_s0 + $0x1a0] sm:$0xf0]  ;;  %v1711_v12 = vld [vmem:[%s3071_s0 + $0x1a4] sm:$0xf0] }
  0xf0   :  { %v1262_v26 = vpop.f32.mrf.mxu0  ;;  %v1717_v13 = vld [vmem:[%s3071_s0 + $0x188] sm:$0xf] }
  0xf1   :  { %1310 = vmatmul.bf16.gmra.mxu1 %v1634_v17  ;;  %1359 = vmatmul.bf16.gmra.mxu2 %v1638_v21  ;;  %v2877_v27 = vadd.f32 %v1259_v62, %v1211_v24  ;;  %v2132_v17 = vld [vmem:[%s3071_s0 + $0x1a8] sm:$0xf0]  ;;  %v1710_v24 = vor.u32 %v2131_v9, %v1709_v8 }
  0xf3   :  { %1408 = vmatmul.bf16.gmra.mxu3 %v1642_v22  ;;  %1457 = vmatmul.bf16.gmra.mxu0 %v1646_v23 }
  0xf4   :  { %v1164_v28 = vpop.f32.mrf.mxu2 }
  0xf5   :  { %v1165_v20 = vadd.f32 %v1164_v28, %v1116_v25  ;;  %v1718_v28 = vor.u32 %v2132_v17, %v1717_v13  ;;  %v1781_v13 = vld [vmem:[%s3071_s0 + $0x210] sm:$0xf]  ;;  %v2149_v17 = vld [vmem:[%s3071_s0 + $0x230] sm:$0xf0] }
  0xf6   :  { %v1213_v30 = vpop.f32.mrf.mxu3  ;;  %v1117_v32 = vpop.f32.mrf.mxu1 }
  0xf7   :  { %v1214_v33 = vadd.f32 %v1213_v30, %v1165_v20  ;;  %v1118_v34 = vadd.f32 %v1117_v32, %v1069_v11 }
  0xf8   :  { %v1264_v36 = vpop.f32.mrf.mxu0 }
  0xf9   :  { %v2887_v39 = vadd.f32 %v1262_v26, %v1214_v33 }
  0xfc   :  { %v1166_v44 = vpop.f32.mrf.mxu2 }
  0xfd   :  { %v1167_v45 = vadd.f32 %v1166_v44, %v1118_v34  ;;  %v1747_v44 = vld [vmem:[%s3071_s0 + $0x1ec] sm:$0xf0] }
  0xfe   :  { %v1215_v46 = vpop.f32.mrf.mxu3  ;;  %v1120_v51 = vpop.f32.mrf.mxu1 }
  0xff   :  { %v1216_v55 = vadd.f32 %v1215_v46, %v1167_v45  ;;  %v1121_v57 = vadd.f32 %v1120_v51, %v2708_v56  ;;  %v1703_v56 = vld [vmem:[%s3071_s0 + $0x19c] sm:$0xf0]  ;;  %v1753_v45 = vld [vmem:[%s3071_s0 + $0x1d0] sm:$0xf]  ;;  %v2141_v46 = vld [vmem:[%s3071_s0 + $0x1f0] sm:$0xf0] }
 0x100   :  { %v1267_v60 = vpop.f32.mrf.mxu0  ;;  %v1706_v23 = vor.u32 %v2126_v5, %v1703_v56 }
 0x101   :  { %1315 = vmatmul.bf16.gmra.mxu1 %v1670_v47  ;;  %1364 = vmatmul.bf16.gmra.mxu2 %v1674_v48  ;;  %v2908_v61 = vadd.f32 %v1264_v36, %v1216_v55 }
 0x103   :  { %1413 = vmatmul.bf16.gmra.mxu3 %v1678_v50  ;;  %1462 = vmatmul.bf16.gmra.mxu0 %v1682_v53  ;;  %v1746_v53 = vor.u32 %v2140_v43, %v1745_v42 }
 0x104   :  { %v1169_v62 = vpop.f32.mrf.mxu2 }
 0x105   :  { %v1170_v63 = vadd.f32 %v1169_v62, %v1121_v57 }
 0x106   :  { %v1218_v0 = vpop.f32.mrf.mxu3  ;;  %v1122_v59 = vpop.f32.mrf.mxu1 }
 0x107   :  { %v1219_v2 = vadd.f32 %v1218_v0, %v1170_v63  ;;  %v1123_v3 = vadd.f32 %v1122_v59, %v2740_v6  ;;  %v2127_v6 = vld [vmem:[%s3071_s0 + $0x184] sm:$0xf] }
 0x108   :  { %v1269_v4 = vpop.f32.mrf.mxu0  ;;  %v1714_v26 = vor.u32 %v2127_v6, %v1711_v12  ;;  %v2144_v6 = vld [vmem:[%s3071_s0 + $0x20c] sm:$0xf] }
 0x109   :  { %v2917_v7 = vadd.f32 %v1267_v60, %v1219_v2  ;;  %v1754_v60 = vor.u32 %v2141_v46, %v1753_v45 }
 0x10c   :  { %v1171_v21 = vpop.f32.mrf.mxu2 }
 0x10d   :  { %v1172_v14 = vadd.f32 %v1171_v21, %v1123_v3  ;;  %v1783_v21 = vld [vmem:[%s3071_s0 + $0x234] sm:$0xf0] }
 0x10e   :  { %v1220_v22 = vpop.f32.mrf.mxu3  ;;  %v1125_v25 = vpop.f32.mrf.mxu1 }
 0x10f   :  { %v1221_v11 = vadd.f32 %v1220_v22, %v1172_v14  ;;  %v1126_v20 = vadd.f32 %v1125_v25, %v2748_v16  ;;  %v1739_v16 = vld [vmem:[%s3071_s0 + $0x1e4] sm:$0xf0]  ;;  %v1789_v14 = vld [vmem:[%s3071_s0 + $0x218] sm:$0xf]  ;;  %v2150_v22 = vld [vmem:[%s3071_s0 + $0x238] sm:$0xf0] }
 0x110   :  { %v1272_v30 = vpop.f32.mrf.mxu0  ;;  %v1742_v50 = vor.u32 %v2135_v40, %v1739_v16 }
 0x111   :  { %1320 = vmatmul.bf16.gmra.mxu1 %v1706_v23  ;;  %1369 = vmatmul.bf16.gmra.mxu2 %v1710_v24  ;;  %v2938_v32 = vadd.f32 %v1269_v4, %v1221_v11 }
 0x113   :  { %1418 = vmatmul.bf16.gmra.mxu3 %v1714_v26  ;;  %1467 = vmatmul.bf16.gmra.mxu0 %v1718_v28  ;;  %v1782_v28 = vor.u32 %v2149_v17, %v1781_v13 }
 0x114   :  { %v1174_v33 = vpop.f32.mrf.mxu2 }
 0x115   :  { %v1175_v34 = vadd.f32 %v1174_v33, %v1126_v20 }
 0x116   :  { %v1223_v36 = vpop.f32.mrf.mxu3  ;;  %v1127_v37 = vpop.f32.mrf.mxu1 }
 0x117   :  { %v1224_v38 = vadd.f32 %v1223_v36, %v1175_v34  ;;  %v1128_v54 = vadd.f32 %v1127_v37, %v2781_v31  ;;  %v2136_v31 = vld [vmem:[%s3071_s0 + $0x1cc] sm:$0xf] }
 0x118   :  { %v1274_v19 = vpop.f32.mrf.mxu0  ;;  %v1750_v57 = vor.u32 %v2136_v31, %v1747_v44 }
 0x119   :  { %v2947_v41 = vadd.f32 %v1272_v30, %v1224_v38  ;;  %v1790_v30 = vor.u32 %v2150_v22, %v1789_v14 }
 0x11c   :  { %v1176_v47 = vpop.f32.mrf.mxu2 }
 0x11d   :  { %v1177_v48 = vadd.f32 %v1176_v47, %v1128_v54 }
 0x11e   :  { %v1225_v51 = vpop.f32.mrf.mxu3  ;;  %v1130_v55 = vpop.f32.mrf.mxu1 }
 0x11f   :  { %v1226_v62 = vadd.f32 %v1225_v51, %v1177_v48  ;;  %v1131_v63 = vadd.f32 %v1130_v55, %v2711_v58  ;;  %v1775_v58 = vld [vmem:[%s3071_s0 + $0x22c] sm:$0xf0] }
 0x120   :  { %v1277_v0 = vpop.f32.mrf.mxu0  ;;  %v1778_v26 = vor.u32 %v2144_v6, %v1775_v58 }
 0x121   :  { %1325 = vmatmul.bf16.gmra.mxu1 %v1742_v50  ;;  %1374 = vmatmul.bf16.gmra.mxu2 %v1746_v53  ;;  %v2968_v59 = vadd.f32 %v1274_v19, %v1226_v62 }
 0x123   :  { %1423 = vmatmul.bf16.gmra.mxu3 %v1750_v57  ;;  %1472 = vmatmul.bf16.gmra.mxu0 %v1754_v60 }
 0x124   :  { %v1179_v2 = vpop.f32.mrf.mxu2 }
 0x125   :  { %v1180_v3 = vadd.f32 %v1179_v2, %v1131_v63 }
 0x126   :  { %v1228_v4 = vpop.f32.mrf.mxu3  ;;  %v1132_v5 = vpop.f32.mrf.mxu1 }
 0x127   :  { %v1229_v56 = vadd.f32 %v1228_v4, %v1180_v3  ;;  %v1133_v8 = vadd.f32 %v1132_v5, %v2743_v10  ;;  %v2145_v10 = vld [vmem:[%s3071_s0 + $0x214] sm:$0xf] }
 0x128   :  { %v1279_v9 = vpop.f32.mrf.mxu0  ;;  %v1786_v20 = vor.u32 %v2145_v10, %v1783_v21 }
 0x129   :  { %v2977_v12 = vadd.f32 %v1277_v0, %v1229_v56 }
 0x12c   :  { %v1181_v23 = vpop.f32.mrf.mxu2 }
 0x12d   :  { %v1182_v24 = vadd.f32 %v1181_v23, %v1133_v8 }
 0x12e   :  { %v1230_v25 = vpop.f32.mrf.mxu3  ;;  %v1135_v11 = vpop.f32.mrf.mxu1 }
 0x12f   :  { %v1231_v33 = vadd.f32 %v1230_v25, %v1182_v24  ;;  %v1136_v34 = vadd.f32 %v1135_v11, %v2751_v18 }
 0x130   :  { %v1282_v36 = vpop.f32.mrf.mxu0 }
 0x131   :  { %1330 = vmatmul.bf16.gmra.mxu1 %v1778_v26  ;;  %1379 = vmatmul.bf16.gmra.mxu2 %v1782_v28  ;;  %v2998_v37 = vadd.f32 %v1279_v9, %v1231_v33 }
 0x133   :  { %1428 = vmatmul.bf16.gmra.mxu3 %v1786_v20  ;;  %1477 = vmatmul.bf16.gmra.mxu0 %v1790_v30 }
 0x134   :  { %v1184_v38 = vpop.f32.mrf.mxu2 }
 0x135   :  { %v1185_v54 = vadd.f32 %v1184_v38, %v1136_v34 }
 0x136   :  { %v1233_v19 = vpop.f32.mrf.mxu3  ;;  %v1137_v40 = vpop.f32.mrf.mxu1 }
 0x137   :  { %v1234_v16 = vadd.f32 %v1233_v19, %v1185_v54  ;;  %v1138_v42 = vadd.f32 %v1137_v40, %v2784_v35 }
 0x138   :  { %v1284_v43 = vpop.f32.mrf.mxu0 }
 0x139   :  { %v3001_v31 = vadd.f32 %v1282_v36, %v1234_v16 }
 0x13c   :  { %v1186_v44 = vpop.f32.mrf.mxu2 }
 0x13d   :  { %v1187_v45 = vadd.f32 %v1186_v44, %v1138_v42 }
 0x13e   :  { %v1235_v18 = vpop.f32.mrf.mxu3  ;;  %v1296_v46 = vpop.f32.mrf.mxu1 }
 0x13f   :  { %v1236_v47 = vadd.f32 %v1235_v18, %v1187_v45  ;;  %v1297_v50 = vadd.f32 %v1296_v46, %v2793_v52 }
 0x140   :  { %v1443_v48 = vpop.f32.mrf.mxu0 }
 0x141   :  { %v3003_v51 = vadd.f32 %v1284_v43, %v1236_v47 }
 0x144   :  { %v1345_v53 = vpop.f32.mrf.mxu2 }
 0x145   :  { %v1346_v55 = vadd.f32 %v1345_v53, %v1297_v50 }
 0x146   :  { %v1394_v57 = vpop.f32.mrf.mxu3  ;;  %v1298_v60 = vpop.f32.mrf.mxu1 }
 0x147   :  { %v1395_v62 = vadd.f32 %v1394_v57, %v1346_v55  ;;  %v1299_v0 = vadd.f32 %v1298_v60, %v2814_v15 }
 0x148   :  { %v1445_v63 = vpop.f32.mrf.mxu0 }
 0x149   :  { %v1444_v35 = vadd.f32 %v1443_v48, %v1395_v62 }
 0x14b   :  { %1483 = vst [vmem:[%s3072_s3] sm:$0xff] %v1444_v35 }
 0x14c   :  { %v1347_v2 = vpop.f32.mrf.mxu2 }
 0x14d   :  { %v1348_v3 = vadd.f32 %v1347_v2, %v1299_v0 }
 0x14e   :  { %v1396_v4 = vpop.f32.mrf.mxu3  ;;  %v1301_v5 = vpop.f32.mrf.mxu1 }
 0x14f   :  { %v1397_v56 = vadd.f32 %v1396_v4, %v1348_v3  ;;  %v1302_v9 = vadd.f32 %v1301_v5, %v2823_v29 }
 0x150   :  { %v1448_v8 = vpop.f32.mrf.mxu0 }
 0x151   :  { %v1446_v52 = vadd.f32 %v1445_v63, %v1397_v56 }
 0x153   :  { %1484 = vst [vmem:[%s3072_s3 + $0x8] sm:$0xff] %v1446_v52 }
 0x154   :  { %v1350_v6 = vpop.f32.mrf.mxu2 }
 0x155   :  { %v1351_v58 = vadd.f32 %v1350_v6, %v1302_v9 }
 0x156   :  { %v1399_v13 = vpop.f32.mrf.mxu3  ;;  %v1303_v17 = vpop.f32.mrf.mxu1 }
 0x157   :  { %v1400_v10 = vadd.f32 %v1399_v13, %v1351_v58  ;;  %v1304_v14 = vadd.f32 %v1303_v17, %v2845_v49 }
 0x158   :  { %v1450_v21 = vpop.f32.mrf.mxu0 }
 0x159   :  { %v1449_v15 = vadd.f32 %v1448_v8, %v1400_v10 }
 0x15b   :  { %1485 = vst [vmem:[%s3072_s3 + $0x10] sm:$0xff] %v1449_v15 }
 0x15c   :  { %v1352_v22 = vpop.f32.mrf.mxu2 }
 0x15d   :  { %v1353_v23 = vadd.f32 %v1352_v22, %v1304_v14 }
 0x15e   :  { %v1401_v24 = vpop.f32.mrf.mxu3  ;;  %v1306_v25 = vpop.f32.mrf.mxu1 }
 0x15f   :  { %v1402_v26 = vadd.f32 %v1401_v24, %v1353_v23  ;;  %v1307_v11 = vadd.f32 %v1306_v25, %v2855_v1 }
 0x160   :  { %v1453_v28 = vpop.f32.mrf.mxu0 }
 0x161   :  { %v1451_v29 = vadd.f32 %v1450_v21, %v1402_v26 }
 0x163   :  { %1486 = vst [vmem:[%s3072_s3 + $0x18] sm:$0xff] %v1451_v29 }
 0x164   :  { %v1355_v20 = vpop.f32.mrf.mxu2 }
 0x165   :  { %v1356_v30 = vadd.f32 %v1355_v20, %v1307_v11 }
 0x166   :  { %v1404_v33 = vpop.f32.mrf.mxu3  ;;  %v1308_v34 = vpop.f32.mrf.mxu1 }
 0x167   :  { %v1405_v36 = vadd.f32 %v1404_v33, %v1356_v30  ;;  %v1309_v54 = vadd.f32 %v1308_v34, %v2877_v27 }
 0x168   :  { %v1455_v38 = vpop.f32.mrf.mxu0 }
 0x169   :  { %v1454_v49 = vadd.f32 %v1453_v28, %v1405_v36 }
 0x16b   :  { %1487 = vst [vmem:[%s3072_s3 + $0x20] sm:$0xff] %v1454_v49 }
 0x16c   :  { %v1357_v19 = vpop.f32.mrf.mxu2 }
 0x16d   :  { %v1358_v40 = vadd.f32 %v1357_v19, %v1309_v54 }
 0x16e   :  { %v1406_v16 = vpop.f32.mrf.mxu3  ;;  %v1311_v42 = vpop.f32.mrf.mxu1 }
 0x16f   :  { %v1407_v43 = vadd.f32 %v1406_v16, %v1358_v40  ;;  %v1312_v45 = vadd.f32 %v1311_v42, %v2887_v39 }
 0x170   :  { %v1458_v44 = vpop.f32.mrf.mxu0 }
 0x171   :  { %v1456_v1 = vadd.f32 %v1455_v38, %v1407_v43 }
 0x173   :  { %1488 = vst [vmem:[%s3072_s3 + $0x28] sm:$0xff] %v1456_v1 }
 0x174   :  { %v1360_v18 = vpop.f32.mrf.mxu2 }
 0x175   :  { %v1361_v46 = vadd.f32 %v1360_v18, %v1312_v45 }
 0x176   :  { %v1409_v47 = vpop.f32.mrf.mxu3  ;;  %v1313_v48 = vpop.f32.mrf.mxu1 }
 0x177   :  { %v1410_v50 = vadd.f32 %v1409_v47, %v1361_v46  ;;  %v1314_v55 = vadd.f32 %v1313_v48, %v2908_v61 }
 0x178   :  { %v1460_v53 = vpop.f32.mrf.mxu0 }
 0x179   :  { %v1459_v27 = vadd.f32 %v1458_v44, %v1410_v50 }
 0x17b   :  { %1489 = vst [vmem:[%s3072_s3 + $0x30] sm:$0xff] %v1459_v27 }
 0x17c   :  { %v1362_v57 = vpop.f32.mrf.mxu2 }
 0x17d   :  { %v1363_v60 = vadd.f32 %v1362_v57, %v1314_v55 }
 0x17e   :  { %v1411_v62 = vpop.f32.mrf.mxu3  ;;  %v1316_v63 = vpop.f32.mrf.mxu1 }
 0x17f   :  { %v1412_v35 = vadd.f32 %v1411_v62, %v1363_v60  ;;  %v1317_v2 = vadd.f32 %v1316_v63, %v2917_v7 }
 0x180   :  { %v1463_v0 = vpop.f32.mrf.mxu0 }
 0x181   :  { %v1461_v39 = vadd.f32 %v1460_v53, %v1412_v35 }
 0x183   :  { %1490 = vst [vmem:[%s3072_s3 + $0x38] sm:$0xff] %v1461_v39 }
 0x184   :  { %v1365_v3 = vpop.f32.mrf.mxu2 }
 0x185   :  { %v1366_v4 = vadd.f32 %v1365_v3, %v1317_v2 }
 0x186   :  { %v1414_v5 = vpop.f32.mrf.mxu3  ;;  %v1318_v56 = vpop.f32.mrf.mxu1 }
 0x187   :  { %v1415_v8 = vadd.f32 %v1414_v5, %v1366_v4  ;;  %v1319_v9 = vadd.f32 %v1318_v56, %v2938_v32 }
 0x188   :  { %v1465_v52 = vpop.f32.mrf.mxu0 }
 0x189   :  { %v1464_v61 = vadd.f32 %v1463_v0, %v1415_v8 }
 0x18b   :  { %1491 = vst [vmem:[%s3072_s3 + $0x40] sm:$0xff] %v1464_v61 }
 0x18c   :  { %v1367_v6 = vpop.f32.mrf.mxu2 }
 0x18d   :  { %v1368_v58 = vadd.f32 %v1367_v6, %v1319_v9 }
 0x18e   :  { %v1416_v13 = vpop.f32.mrf.mxu3  ;;  %v1321_v17 = vpop.f32.mrf.mxu1 }
 0x18f   :  { %v1417_v10 = vadd.f32 %v1416_v13, %v1368_v58  ;;  %v1322_v15 = vadd.f32 %v1321_v17, %v2947_v41 }
 0x190   :  { %v1468_v21 = vpop.f32.mrf.mxu0 }
 0x191   :  { %v1466_v7 = vadd.f32 %v1465_v52, %v1417_v10 }
 0x193   :  { %1492 = vst [vmem:[%s3072_s3 + $0x48] sm:$0xff] %v1466_v7 }
 0x194   :  { %v1370_v14 = vpop.f32.mrf.mxu2 }
 0x195   :  { %v1371_v22 = vadd.f32 %v1370_v14, %v1322_v15 }
 0x196   :  { %v1419_v23 = vpop.f32.mrf.mxu3  ;;  %v1323_v24 = vpop.f32.mrf.mxu1 }
 0x197   :  { %v1420_v25 = vadd.f32 %v1419_v23, %v1371_v22  ;;  %v1324_v28 = vadd.f32 %v1323_v24, %v2968_v59 }
 0x198   :  { %v1470_v26 = vpop.f32.mrf.mxu0 }
 0x199   :  { %v1469_v32 = vadd.f32 %v1468_v21, %v1420_v25 }
 0x19b   :  { %1493 = vst [vmem:[%s3072_s3 + $0x50] sm:$0xff] %v1469_v32 }
 0x19c   :  { %v1372_v29 = vpop.f32.mrf.mxu2 }
 0x19d   :  { %v1373_v11 = vadd.f32 %v1372_v29, %v1324_v28 }
 0x19e   :  { %v1421_v20 = vpop.f32.mrf.mxu3  ;;  %v1326_v30 = vpop.f32.mrf.mxu1 }
 0x19f   :  { %v1422_v33 = vadd.f32 %v1421_v20, %v1373_v11  ;;  %v1327_v36 = vadd.f32 %v1326_v30, %v2977_v12 }
 0x1a0   :  { %v1473_v41 = vpop.f32.mrf.mxu0 }
 0x1a1   :  { %v1471_v34 = vadd.f32 %v1470_v26, %v1422_v33 }
 0x1a3   :  { %1494 = vst [vmem:[%s3072_s3 + $0x58] sm:$0xff] %v1471_v34 }
 0x1a4   :  { %v1375_v38 = vpop.f32.mrf.mxu2 }
 0x1a5   :  { %v1376_v49 = vadd.f32 %v1375_v38, %v1327_v36 }
 0x1a6   :  { %v1424_v54 = vpop.f32.mrf.mxu3  ;;  %v1328_v19 = vpop.f32.mrf.mxu1 }
 0x1a7   :  { %v1425_v40 = vadd.f32 %v1424_v54, %v1376_v49  ;;  %v1329_v59 = vadd.f32 %v1328_v19, %v2998_v37 }
 0x1a8   :  { %v1475_v42 = vpop.f32.mrf.mxu0 }
 0x1a9   :  { %v1474_v16 = vadd.f32 %v1473_v41, %v1425_v40 }
 0x1ab   :  { %1495 = vst [vmem:[%s3072_s3 + $0x60] sm:$0xff] %v1474_v16 }
 0x1ac   :  { %v1377_v43 = vpop.f32.mrf.mxu2 }
 0x1ad   :  { %v1378_v44 = vadd.f32 %v1377_v43, %v1329_v59 }
 0x1ae   :  { %v1426_v1 = vpop.f32.mrf.mxu3  ;;  %v1331_v45 = vpop.f32.mrf.mxu1 }
 0x1af   :  { %v1427_v18 = vadd.f32 %v1426_v1, %v1378_v44  ;;  %v1332_v12 = vadd.f32 %v1331_v45, %v3001_v31 }
 0x1b0   :  { %v1478_v53 = vpop.f32.mrf.mxu0 }
 0x1b1   :  { %v1476_v46 = vadd.f32 %v1475_v42, %v1427_v18 }
 0x1b3   :  { %1496 = vst [vmem:[%s3072_s3 + $0x68] sm:$0xff] %v1476_v46 }
 0x1b4   :  { %v1380_v47 = vpop.f32.mrf.mxu2 }
 0x1b5   :  { %v1381_v48 = vadd.f32 %v1380_v47, %v1332_v12 }
 0x1b6   :  { %v1429_v50 = vpop.f32.mrf.mxu3  ;;  %v1333_v55 = vpop.f32.mrf.mxu1 }
 0x1b7   :  { %v1430_v27 = vadd.f32 %v1429_v50, %v1381_v48  ;;  %v1334_v57 = vadd.f32 %v1333_v55, %v3003_v51 }
 0x1b8   :  { %v1480_v0 = vpop.f32.mrf.mxu0 }
 0x1b9   :  { %v1479_v37 = vadd.f32 %v1478_v53, %v1430_v27 }
 0x1bb   :  { %1497 = vst [vmem:[%s3072_s3 + $0x70] sm:$0xff] %v1479_v37 }
 0x1bc   :  { %v1382_v60 = vpop.f32.mrf.mxu2 }
 0x1bd   :  { %v1383_v62 = vadd.f32 %v1382_v60, %v1334_v57 }
 0x1be   :  { %v1431_v63 = vpop.f32.mrf.mxu3 }
 0x1bf   :  { %v1432_v35 = vadd.f32 %v1431_v63, %v1383_v62 }
 0x1c1   :  { %v1481_v39 = vadd.f32 %v1480_v0, %v1432_v35 }
 0x1c3   :  { %1498 = vst [vmem:[%s3072_s3 + $0x78] sm:$0xff] %v1481_v39 }

</bundles_post_ra>
